<compile_context>
chip_gen: v7x
topology: tpu7x:2x2x1
jax: 0.10.0
libtpu: 0.0.40
codegen_flags: <defaults>
</compile_context>

<pallas_src>
import functools
import numpy as np
import jax
import jax.numpy as jnp
from jax.experimental import pallas as pl
from jax.experimental.pallas import tpu as pltpu

SQRT2 = float(np.sqrt(2.0))

# ---------------- small synthetic config (StyleGAN2 structure, reduced sizes) ------
STYLE_DIM = 64          # latent_size (reduced from 512)
N_MLP = 8               # map_layers
IMG_SIZE = 16           # img_size (reduced from 256)
LOG_SIZE = 4            # log2(IMG_SIZE)
N_LATENT = LOG_SIZE * 2 - 2          # 6
CHANNELS = {4: 32, 8: 32, 16: 16}    # reduced channel table
BATCH = 2
SMAX = max(CHANNELS.values())        # padded row count of the style-linear stack

_BK = np.array([1.0, 3.0, 3.0, 1.0], dtype=np.float32)
_BK1 = (_BK / _BK.sum()).tolist()    # normalized separable blur taps

# style-linear layer order: conv1, to_rgb1, then per resolution (up-conv, conv, to_rgb)
S_CONV1, S_TORGB1 = 0, 1
STYLE_LATENT_IDX = (0, 1) + tuple(
    i for r in range(LOG_SIZE - 2) for i in (2 * r + 1, 2 * r + 2, 2 * r + 3))
N_STYLE_LAYERS = len(STYLE_LATENT_IDX)          # 8

_SMEM_SPEC = pl.BlockSpec(memory_space=pltpu.MemorySpace.SMEM)


# ---------------- in-kernel helpers ------------------------------------------------

def _lrelu(x):
    return jnp.where(x >= 0.0, x, 0.2 * x) * SQRT2


def _frame_rc(F, Wf):
    p = jax.lax.broadcasted_iota(jnp.int32, (1, F), 1)
    return p // Wf, p % Wf


def _square_mask(row, col, hi):
    # 1.0 inside the content square [1, hi] x [1, hi] of the frame, else 0.0
    return ((row >= 1) & (row <= hi) & (col >= 1) & (col <= hi)).astype(jnp.float32)


def _shift_cols(x, o):
    # shifted[:, p] = x[:, p + o] for every in-frame p we care about; wraparound only
    # lands on frame-border columns which are masked / cropped downstream.
    if o == 0:
        return x
    return jnp.roll(x, -o, axis=1)          # static shift -> slice + lane concat


def _conv3x3(x_bf, w_ref, Wf):
    """Same-frame 3x3 conv as 9 shifted MXU matmuls (fused im2col replacement).

    out[:, p] = sum_t  w[t] @ x[:, p + off_t],  off_t = (dy-1)*Wf + (dx-1).
    Only frame-interior columns are meaningful; borders hold junk and are masked.
    """
    acc = None
    t = 0
    for dy in range(3):
        for dx in range(3):
            o = (dy - 1) * Wf + (dx - 1)
            c = jnp.dot(w_ref[t], _shift_cols(x_bf, o),
                        preferred_element_type=jnp.float32)
            acc = c if acc is None else acc + c
            t += 1
    return acc


def _blur4(x, Wf, gain):
    """Separable [1,3,3,1]/8 blur * gain, same-frame (vertical then horizontal)."""
    def onepass(v, step, g):
        out = None
        for a in range(4):
            term = float(g * _BK1[a]) * _shift_cols(v, (a - 1) * step)
            out = term if out is None else out + term
        return out
    return onepass(onepass(x, Wf, gain), 1, 1.0)


# ---------------- Pallas kernels ----------------------------------------------------

def _mapping_kernel(z_ref, w_ref, b_ref, o_ref, *, n_layers, mean_scale):
    # Lane-dense: activations are (STYLE_DIM, B) so B sits on the 128-lane axis.
    x = z_ref[...]
    x = x * jax.lax.rsqrt(jnp.mean(x * x, axis=0, keepdims=True) + 1e-8)   # PixelNorm
    for l in range(n_layers):
        y = jnp.dot(w_ref[l], x.astype(jnp.bfloat16),
                    preferred_element_type=jnp.float32) + b_ref[l]
        x = _lrelu(y)                                                      # fused lrelu
    if mean_scale is None:
        o_ref[...] = x
    else:
        # mean_latent: accumulate the mean across the column grid inside the kernel
        @pl.when(pl.program_id(0) == 0)
        def _():
            o_ref[...] = jnp.zeros_like(o_ref)
        o_ref[...] += jnp.sum(x, axis=1, keepdims=True) * mean_scale


def _style_kernel(lat_ref, mw_ref, mb_ref, o_ref, *, layer_latents):
    # All per-layer modulation EqualLinears hoisted into one call.
    for l, li in enumerate(layer_latents):
        w_lat = lat_ref[:, li, :]                                          # (D, B)
        o_ref[l] = jnp.dot(mw_ref[l], w_lat,
                           preferred_element_type=jnp.float32) + mb_ref[l]


def _base_block_kernel(s_ref, x_ref, w_ref, wsq_ref, wrgb_ref, noise_ref, nstr_ref,
                       bias_ref, rgbb_ref, act_out_ref, skip_out_ref,
                       *, Wf, content, cin, cout, s_conv, s_rgb):
    """Fused 4x4 block: StyledConv(3x3) + noise + bias + lrelu + ToRGB."""
    F = x_ref.shape[2]
    nb = s_ref.shape[2]
    row, col = _frame_rc(F, Wf)
    m_act = _square_mask(row, col, content)
    bsel = (jax.lax.broadcasted_iota(jnp.int32, (1, nb), 1) ==
            pl.program_id(0)).astype(jnp.float32)

    def pick(v):                                   # (R, B) -> (R, 1): this grid step's batch
        return jnp.sum(v * bsel, axis=1, keepdims=True)

    # input-side modulation + demodulation (wsq = precomputed sum of squared taps)
    s_full = s_ref[s_conv, 0:cin, :]
    s1 = pick(s_full)
    d1 = pick(jax.lax.rsqrt(jnp.dot(wsq_ref[...], s_full * s_full,
                                    preferred_element_type=jnp.float32) + 1e-8))
    xmod = (x_ref[0] * s1).astype(jnp.bfloat16)
    y = _conv3x3(xmod, w_ref, Wf) * d1 + nstr_ref[0] * noise_ref[0] + bias_ref[...]
    act = _lrelu(y) * m_act
    act_out_ref[0] = act

    # ToRGB: 1x1 modulated conv (no demod) + bias
    srgb = pick(s_ref[s_rgb, 0:cout, :])
    xr = (act * srgb).astype(jnp.bfloat16)
    skip_out_ref[0] = jnp.dot(wrgb_ref[...], xr,
                              preferred_element_type=jnp.float32) + rgbb_ref[...]


def _res_block_kernel(s_ref, x_ref, skipin_ref, wup_ref, wsqup_ref, wc2_ref, wsqc2_ref,
                      wrgb_ref, noise_ref, nstr_ref, bias_ref, rgbb_ref,
                      act_out_ref, skip_out_ref,
                      *, Wf, H_out, cin, cmid, s_up, s_c2, s_rgb):
    """One whole resolution fused: upsample StyledConv (+blur+noise+lrelu), second
    StyledConv (+noise+lrelu), ToRGB, skip Upsample (blur) and skip accumulation.
    Everything lives in one (Hf x Hf) frame per batch, Hf = H_out + 3."""
    F = x_ref.shape[2]
    nb = s_ref.shape[2]
    row, col = _frame_rc(F, Wf)
    m_c1 = _square_mask(row, col, H_out + 1)     # transposed-conv output (2H+1)
    m_act = _square_mask(row, col, H_out)        # activation / rgb content (2H)
    bsel = (jax.lax.broadcasted_iota(jnp.int32, (1, nb), 1) ==
            pl.program_id(0)).astype(jnp.float32)

    def pick(v):
        return jnp.sum(v * bsel, axis=1, keepdims=True)

    noise = noise_ref[0]                                           # (2, F)

    # --- StyledConv(upsample): conv_transpose(3x3, stride 2) == 9 shifted matmuls
    #     on the zero-dilated + padded frame with pre-flipped taps ----------------
    s_full = s_ref[s_up, 0:cin, :]
    su = pick(s_full)
    du = pick(jax.lax.rsqrt(jnp.dot(wsqup_ref[...], s_full * s_full,
                                    preferred_element_type=jnp.float32) + 1e-8))
    xmod = (x_ref[0] * su).astype(jnp.bfloat16)
    c1 = _conv3x3(xmod, wup_ref, Wf) * du * m_c1

    # fused Blur([1,3,3,1], pad=(1,1), gain=4) + NoiseInjection + FusedLeakyReLU
    b1 = _blur4(c1, Wf, 4.0)
    act1 = _lrelu(b1 + nstr_ref[0] * noise[0:1, :] + bias_ref[0]) * m_act

    # --- second StyledConv (3x3, pad 1) + noise + bias + lrelu ------------------
    s_full = s_ref[s_c2, 0:cmid, :]
    s2 = pick(s_full)
    d2 = pick(jax.lax.rsqrt(jnp.dot(wsqc2_ref[...], s_full * s_full,
                                    preferred_element_type=jnp.float32) + 1e-8))
    xmod2 = (act1 * s2).astype(jnp.bfloat16)
    c2 = _conv3x3(xmod2, wc2_ref, Wf) * d2
    act2 = _lrelu(c2 + nstr_ref[1] * noise[1:2, :] + bias_ref[1]) * m_act
    act_out_ref[0] = act2

    # --- ToRGB + skip Upsample (blur pad=(2,1), gain=4) + skip add --------------
    srgb = pick(s_ref[s_rgb, 0:cmid, :])
    xr = (act2 * srgb).astype(jnp.bfloat16)
    rgb = jnp.dot(wrgb_ref[...], xr, preferred_element_type=jnp.float32) + rgbb_ref[...]
    skip_up = _blur4(skipin_ref[0], Wf, 4.0)
    skip_out_ref[0] = rgb + skip_up


# ---------------- kernel wrappers ---------------------------------------------------

def mapping_network(params, z_t, *, mean=False):
    """8-layer mapping (PixelNorm + EqualLinear + fused lrelu) in one pallas_call.
    z_t: (STYLE_DIM, B) lane-dense.  mean=True also folds the mean_latent reduction."""
    D, B = z_t.shape
    if not mean:
        return pl.pallas_call(
            functools.partial(_mapping_kernel, n_layers=N_MLP, mean_scale=None),
            out_shape=jax.ShapeDtypeStruct((D, B), jnp.float32),
            grid=(1,),
            in_specs=[pl.BlockSpec((D, B), lambda i: (0, 0)),
                      pl.BlockSpec((N_MLP, D, D), lambda i: (0, 0, 0)),
                      pl.BlockSpec((N_MLP, D, 1), lambda i: (0, 0, 0))],
            out_specs=pl.BlockSpec((D, B), lambda i: (0, 0)),
        )(z_t, params['map_w'], params['map_b'])
    blk = 512 if B % 512 == 0 else B
    return pl.pallas_call(
        functools.partial(_mapping_kernel, n_layers=N_MLP, mean_scale=1.0 / B),
        out_shape=jax.ShapeDtypeStruct((D, 1), jnp.float32),
        grid=(B // blk,),
        in_specs=[pl.BlockSpec((D, blk), lambda i: (0, i)),
                  pl.BlockSpec((N_MLP, D, D), lambda i: (0, 0, 0)),
                  pl.BlockSpec((N_MLP, D, 1), lambda i: (0, 0, 0))],
        out_specs=pl.BlockSpec((D, 1), lambda i: (0, 0)),
        compiler_params=pltpu.CompilerParams(dimension_semantics=("arbitrary",)),
    )(z_t, params['map_w'], params['map_b'])


def style_vectors(params, latent):
    """All modulation EqualLinears in one pallas_call.  latent: (D, N_LATENT, B)."""
    D, NL, B = latent.shape
    L = N_STYLE_LAYERS
    return pl.pallas_call(
        functools.partial(_style_kernel, layer_latents=STYLE_LATENT_IDX),
        out_shape=jax.ShapeDtypeStruct((L, SMAX, B), jnp.float32),
        grid=(1,),
        in_specs=[pl.BlockSpec((D, NL, B), lambda i: (0, 0, 0)),
                  pl.BlockSpec((L, SMAX, D), lambda i: (0, 0, 0)),
                  pl.BlockSpec((L, SMAX, 1), lambda i: (0, 0, 0))],
        out_specs=pl.BlockSpec((L, SMAX, B), lambda i: (0, 0, 0)),
    )(latent, params['smod_w'], params['smod_b'])


def base_block(params, s_all, x_framed, noise_framed):
    p, pr = params['conv1'], params['to_rgb1']
    B, Cin, F = x_framed.shape
    Cout = p['out_ch']
    L = N_STYLE_LAYERS
    Wf = 4 + 2
    assert F == Wf * Wf
    kernel = functools.partial(_base_block_kernel, Wf=Wf, content=4, cin=Cin,
                               cout=Cout, s_conv=S_CONV1, s_rgb=S_TORGB1)
    return pl.pallas_call(
        kernel,
        out_shape=(jax.ShapeDtypeStruct((B, Cout, F), jnp.float32),
                   jax.ShapeDtypeStruct((B, 3, F), jnp.float32)),
        grid=(B,),
        in_specs=[
            pl.BlockSpec((L, SMAX, B), lambda b: (0, 0, 0)),   # all styles
            pl.BlockSpec((1, Cin, F), lambda b: (b, 0, 0)),    # framed ConstantInput
            pl.BlockSpec((9, Cout, Cin), lambda b: (0, 0, 0)), # conv taps (bf16)
            pl.BlockSpec((Cout, Cin), lambda b: (0, 0)),       # sum-of-squares (f32)
            pl.BlockSpec((3, Cout), lambda b: (0, 0)),         # ToRGB weight
            pl.BlockSpec((1, 1, F), lambda b: (b, 0, 0)),      # unscaled noise
            _SMEM_SPEC,                                        # noise strength
            pl.BlockSpec((Cout, 1), lambda b: (0, 0)),         # act bias
            pl.BlockSpec((3, 1), lambda b: (0, 0)),            # rgb bias
        ],
        out_specs=(pl.BlockSpec((1, Cout, F), lambda b: (b, 0, 0)),
                   pl.BlockSpec((1, 3, F), lambda b: (b, 0, 0))),
        compiler_params=pltpu.CompilerParams(
            dimension_semantics=("parallel",),
            vmem_limit_bytes=32 * 1024 * 1024),
    )(s_all, x_framed, p['w'], p['wsq'], pr['w'], noise_framed, p['nstr'],
      p['act_bias'], pr['bias'])


def res_block(blk, s_all, x_framed, skip_framed, noise_framed, H_out):
    B, Cin, F = x_framed.shape
    Cmid = blk['out_ch']
    L = N_STYLE_LAYERS
    Wf = H_out + 3
    assert F == Wf * Wf
    s_up, s_c2, s_rgb = blk['s_idx']
    kernel = functools.partial(_res_block_kernel, Wf=Wf, H_out=H_out, cin=Cin,
                               cmid=Cmid, s_up=s_up, s_c2=s_c2, s_rgb=s_rgb)
    return pl.pallas_call(
        kernel,
        out_shape=(jax.ShapeDtypeStruct((B, Cmid, F), jnp.float32),
                   jax.ShapeDtypeStruct((B, 3, F), jnp.float32)),
        grid=(B,),
        in_specs=[
            pl.BlockSpec((L, SMAX, B), lambda b: (0, 0, 0)),   # all styles
            pl.BlockSpec((1, Cin, F), lambda b: (b, 0, 0)),    # dilated+padded input
            pl.BlockSpec((1, 3, F), lambda b: (b, 0, 0)),      # dilated+padded skip
            pl.BlockSpec((9, Cmid, Cin), lambda b: (0, 0, 0)), # up-conv taps (bf16)
            pl.BlockSpec((Cmid, Cin), lambda b: (0, 0)),       # demod sum-of-squares
            pl.BlockSpec((9, Cmid, Cmid), lambda b: (0, 0, 0)),# conv2 taps (bf16)
            pl.BlockSpec((Cmid, Cmid), lambda b: (0, 0)),
            pl.BlockSpec((3, Cmid), lambda b: (0, 0)),         # ToRGB weight
            pl.BlockSpec((1, 2, F), lambda b: (b, 0, 0)),      # 2 unscaled noise maps
            _SMEM_SPEC,                                        # 2 noise strengths
            pl.BlockSpec((2, Cmid, 1), lambda b: (0, 0, 0)),   # act biases
            pl.BlockSpec((3, 1), lambda b: (0, 0)),            # rgb bias
        ],
        out_specs=(pl.BlockSpec((1, Cmid, F), lambda b: (b, 0, 0)),
                   pl.BlockSpec((1, 3, F), lambda b: (b, 0, 0))),
        compiler_params=pltpu.CompilerParams(
            dimension_semantics=("parallel",),
            vmem_limit_bytes=32 * 1024 * 1024),
    )(s_all, x_framed, skip_framed, blk['up_w'], blk['up_wsq'], blk['c2_w'],
      blk['c2_wsq'], blk['rgb_w'], noise_framed, blk['nstr'], blk['act_bias'],
      blk['rgb_bias'])


# ---------------- plain-JAX framing glue (TODO(synk): fold into a megakernel) ------

def frame_pad1(x):
    # (B, C, H, W) -> (B, C, (H+2)^2); content at frame origin (1,1).
    B, C, H, W = x.shape
    xp = jnp.pad(x, ((0, 0), (0, 0), (1, 1), (1, 1)))
    return xp.reshape(B, C, (H + 2) * (W + 2))


def frame_upconv_input(x):
    # zero-dilate (stride 2) + pad 2 -> (B, C, (2H+3)^2): conv_transpose input frame.
    B, C, H, W = x.shape
    xd = jnp.zeros((B, C, 2 * H - 1, 2 * W - 1), x.dtype).at[:, :, ::2, ::2].set(x)
    xp = jnp.pad(xd, ((0, 0), (0, 0), (2, 2), (2, 2)))
    return xp.reshape(B, C, (2 * H + 3) * (2 * W + 3))


def frame_skip_input(skip, Hf):
    # Upsample-module input: zero-dilated skip at (2+2r, 2+2c) inside an Hf x Hf frame.
    B, C, H, W = skip.shape
    fr = jnp.zeros((B, C, Hf, Hf), skip.dtype)
    fr = fr.at[:, :, 2:2 + 2 * H:2, 2:2 + 2 * W:2].set(skip)
    return fr.reshape(B, C, Hf * Hf)


def frame_noise(noise_list, Hc, Hf):
    # (B,1,Hc,Hc) unscaled noise maps -> (B, n, Hf*Hf), placed at frame origin (1,1).
    framed = [jnp.pad(n, ((0, 0), (0, 0), (1, Hf - Hc - 1), (1, Hf - Hc - 1)))
              .reshape(n.shape[0], 1, Hf * Hf) for n in noise_list]
    return jnp.concatenate(framed, axis=1) if len(framed) > 1 else framed[0]


def unframe(x_framed, Hf, Hc):
    B, C, _ = x_framed.shape
    return x_framed.reshape(B, C, Hf, Hf)[:, :, 1:1 + Hc, 1:1 + Hc]


# ---------------- StyleGAN2 generator forward ---------------------------------------

def sg2_generator_forward(params, styles, *, return_latents=False, inject_index=None,
                          truncation=1.0, truncation_latent=None,
                          input_is_latent=False, noise=None):
    assert noise is not None
    styles = [jnp.transpose(s) for s in styles]                    # (D, B) lane-dense
    if not input_is_latent:
        styles = [mapping_network(params, s) for s in styles]
    if truncation < 1.0:
        styles = [truncation_latent + truncation * (s - truncation_latent)
                  for s in styles]
    if len(styles) < 2:
        inject_index = N_LATENT
        latent = jnp.repeat(styles[0][:, None, :], inject_index, axis=1)   # (D, n, B)
    else:
        if inject_index is None:
            inject_index = N_LATENT // 2
        l1 = jnp.repeat(styles[0][:, None, :], inject_index, axis=1)
        l2 = jnp.repeat(styles[1][:, None, :], N_LATENT - inject_index, axis=1)
        latent = jnp.concatenate([l1, l2], axis=1)
    B = latent.shape[2]

    s_all = style_vectors(params, latent)                          # (L, SMAX, B)

    # ConstantInput + fused 4x4 block (conv1 + noise/act + to_rgb1)
    const = jnp.tile(params['const'], (B, 1, 1, 1))                # (B, C, 4, 4)
    act_f, skip_f = base_block(params, s_all, frame_pad1(const),
                               frame_noise([noise[0]], 4, 6))
    act, skip = unframe(act_f, 6, 4), unframe(skip_f, 6, 4)

    H = 4
    for r, blk in enumerate(params['res_blocks']):
        H_out, Hf = 2 * H, 2 * H + 3
        act_f, skip_f = res_block(
            blk, s_all,
            frame_upconv_input(act),
            frame_skip_input(skip, Hf),
            frame_noise([noise[1 + 2 * r], noise[2 + 2 * r]], H_out, Hf),
            H_out)
        act, skip = unframe(act_f, Hf, H_out), unframe(skip_f, Hf, H_out)
        H = H_out

    image = skip                                                   # (B, 3, H, W) NCHW
    if return_latents:
        return image, jnp.transpose(latent, (2, 1, 0))
    return image, None


# ---------------- deterministic parameter init (synthetic; no checkpoint) ----------

def init_params(key):
    keys = iter(jax.random.split(key, 64))
    D = STYLE_DIM
    params = {}

    # mapping network: (out, in) weights so x_{l+1} = W @ x in the (D, B) layout.
    map_w = jnp.stack([jax.random.normal(next(keys), (D, D)) * (1.0 / np.sqrt(D))
                       for _ in range(N_MLP)])
    params['map_w'] = map_w.astype(jnp.bfloat16)
    params['map_b'] = jnp.zeros((N_MLP, D, 1), jnp.float32)

    params['const'] = jax.random.normal(next(keys),
                                        (1, CHANNELS[4], 4, 4)).astype(jnp.float32)

    smod = []                                  # padded (SMAX, D) style-linear weights

    def style_linear(cin):
        w = jax.random.normal(next(keys), (cin, D)) * (1.0 / np.sqrt(D))
        smod.append(jnp.zeros((SMAX, D), jnp.float32).at[:cin, :].set(w))

    def conv3x3(cin, cout, flip):
        w = jax.random.normal(next(keys), (cout, cin, 3, 3)) * (1.0 / np.sqrt(cin * 9))
        if flip:                               # conv_transpose == conv w/ flipped taps
            w = w[:, :, ::-1, ::-1]
        wsq = jnp.sum(w * w, axis=(2, 3)).astype(jnp.float32)        # demod weights
        taps = jnp.transpose(w, (2, 3, 0, 1)).reshape(9, cout, cin)   # tap-major
        return taps.astype(jnp.bfloat16), wsq

    def rgb_w(cin):
        w = jax.random.normal(next(keys), (3, cin)) * (1.0 / np.sqrt(cin))
        return w.astype(jnp.bfloat16)

    def nstrength():
        # torch inits noise strength to 0; nonzero here so the path is exercised
        return (jax.random.normal(next(keys), ()) * 0.1).astype(jnp.float32)

    c4 = CHANNELS[4]
    style_linear(c4)                                               # conv1 style
    w1, wsq1 = conv3x3(c4, c4, False)
    params['conv1'] = dict(w=w1, wsq=wsq1, out_ch=c4,
                           nstr=jnp.reshape(nstrength(), (1,)),
                           act_bias=jnp.zeros((c4, 1), jnp.float32))
    style_linear(c4)                                               # to_rgb1 style
    params['to_rgb1'] = dict(w=rgb_w(c4), bias=jnp.zeros((3, 1), jnp.float32))

    res_blocks, in_ch, s_idx = [], c4, 2
    for res_log in range(3, LOG_SIZE + 1):
        out_ch = CHANNELS[2 ** res_log]
        style_linear(in_ch)                                        # up-conv style
        wu, wsqu = conv3x3(in_ch, out_ch, True)
        nsu = nstrength()
        style_linear(out_ch)                                       # conv2 style
        w2, wsq2 = conv3x3(out_ch, out_ch, False)
        ns2 = nstrength()
        style_linear(out_ch)                                       # to_rgb style
        res_blocks.append(dict(
            up_w=wu, up_wsq=wsqu, c2_w=w2, c2_wsq=wsq2,
            rgb_w=rgb_w(out_ch), rgb_bias=jnp.zeros((3, 1), jnp.float32),
            nstr=jnp.stack([nsu, ns2]),
            act_bias=jnp.zeros((2, out_ch, 1), jnp.float32),
            out_ch=out_ch, s_idx=(s_idx, s_idx + 1, s_idx + 2)))
        s_idx += 3
        in_ch = out_ch
    params['res_blocks'] = res_blocks

    params['smod_w'] = jnp.stack(smod)                             # (L, SMAX, D)
    params['smod_b'] = jnp.ones((len(smod), SMAX, 1), jnp.float32) # bias_init = 1
    return params


# ---------------- main --------------------------------------------------------------

if __name__ == "__main__":
    key = jax.random.PRNGKey(0)
    kp, kz, kml, kn = jax.random.split(key, 4)
    params = init_params(kp)

    z = jax.random.normal(kz, (BATCH, STYLE_DIM), dtype=jnp.float32)

    # mean_latent (SG2Generator.__init__): mean of mapping over 4096 z's, fused
    z_ml = jax.random.normal(kml, (4096, STYLE_DIM), dtype=jnp.float32)
    mean_latent = mapping_network(params, jnp.transpose(z_ml), mean=True)   # (D, 1)

    # explicit per-layer noise (deterministic keys), unscaled (strength lives in SMEM)
    noise_shapes = [(BATCH, 1, 4, 4), (BATCH, 1, 8, 8), (BATCH, 1, 8, 8),
                    (BATCH, 1, 16, 16), (BATCH, 1, 16, 16)]
    nkeys = jax.random.split(kn, len(noise_shapes))
    noises = [jax.random.normal(k_, s, dtype=jnp.float32)
              for k_, s in zip(nkeys, noise_shapes)]

    image, _ = sg2_generator_forward(
        params, [z],
        truncation=0.7, truncation_latent=mean_latent,
        input_is_latent=False, noise=noises)

    image = jax.block_until_ready(image)
    assert image.shape == (BATCH, 3, IMG_SIZE, IMG_SIZE), image.shape
    assert bool(jnp.all(jnp.isfinite(image)))
    print("KERNEL_OK")
</pallas_src>

<mosaic_0001>
module attributes {stable_mosaic.version = 11 : i64} {
  func.func @_mapping_kernel(%arg0: i32, %arg1: memref<64x512xf32, #tpu.memory_space<vmem>>, %arg2: memref<8x64x64xbf16, #tpu.memory_space<vmem>>, %arg3: memref<8x64x1xf32, #tpu.memory_space<vmem>>, %arg4: memref<64x1xf32, #tpu.memory_space<vmem>>) attributes {dimension_semantics = [#tpu.dimension_semantics<arbitrary>], iteration_bounds = array<i64: 8>, scalar_prefetch = 0 : i64, scratch_operands = 0 : i64, tpu.core_type = #tpu.core_type<tc>, window_params = [{transform_indices = @transform_0, window_bounds = array<i64: 64, 512>}, {pipeline_mode = #tpu.pipeline_mode<synchronous>, transform_indices = @transform_1, window_bounds = array<i64: 8, 64, 64>}, {pipeline_mode = #tpu.pipeline_mode<synchronous>, transform_indices = @transform_2, window_bounds = array<i64: 8, 64, 1>}, {pipeline_mode = #tpu.pipeline_mode<synchronous>, transform_indices = @transform_3, window_bounds = array<i64: 64, 1>}]} {
    %c0 = arith.constant 0 : index
    %c0_0 = arith.constant 0 : index
    %0 = vector.load %arg1[%c0, %c0_0] : memref<64x512xf32, #tpu.memory_space<vmem>>, vector<64x512xf32>
    %1 = arith.mulf %0, %0 : vector<64x512xf32>
    %cst = arith.constant dense<0.000000e+00> : vector<512xf32>
    %2 = vector.multi_reduction <add>, %1, %cst [0] : vector<64x512xf32> to vector<512xf32>
    %3 = vector.shape_cast %2 : vector<512xf32> to vector<1x512xf32>
    %cst_1 = arith.constant 6.400000e+01 : f32
    %4 = vector.broadcast %cst_1 : f32 to vector<1x512xf32>
    %5 = arith.divf %3, %4 : vector<1x512xf32>
    %cst_2 = arith.constant 9.99999993E-9 : f32
    %6 = vector.broadcast %cst_2 : f32 to vector<1x512xf32>
    %7 = arith.addf %5, %6 : vector<1x512xf32>
    %8 = math.rsqrt %7 : vector<1x512xf32>
    %9 = vector.broadcast %8 : vector<1x512xf32> to vector<64x512xf32>
    %10 = arith.mulf %0, %9 : vector<64x512xf32>
    %c0_3 = arith.constant 0 : index
    %c0_4 = arith.constant 0 : index
    %c0_5 = arith.constant 0 : index
    %11 = vector.load %arg2[%c0_3, %c0_4, %c0_5] : memref<8x64x64xbf16, #tpu.memory_space<vmem>>, vector<1x64x64xbf16>
    %12 = vector.shape_cast %11 : vector<1x64x64xbf16> to vector<64x64xbf16>
    %13 = arith.truncf %10 : vector<64x512xf32> to vector<64x512xbf16>
    %cst_6 = arith.constant dense<0.000000e+00> : vector<64x512xf32>
    %14 = tpu.matmul %12, %13, %cst_6 {dimension_numbers = #tpu.dot_dimension_numbers<[1], [0], [0], [1], [0, 0, 1, 1], [], []>} : vector<64x64xbf16>, vector<64x512xbf16>, vector<64x512xf32> -> vector<64x512xf32>
    %c0_7 = arith.constant 0 : index
    %c0_8 = arith.constant 0 : index
    %c0_9 = arith.constant 0 : index
    %15 = vector.load %arg3[%c0_7, %c0_8, %c0_9] : memref<8x64x1xf32, #tpu.memory_space<vmem>>, vector<1x64x1xf32>
    %16 = vector.shape_cast %15 : vector<1x64x1xf32> to vector<64x1xf32>
    %17 = vector.broadcast %16 : vector<64x1xf32> to vector<64x512xf32>
    %18 = arith.addf %14, %17 : vector<64x512xf32>
    %cst_10 = arith.constant 0.000000e+00 : f32
    %19 = vector.broadcast %cst_10 : f32 to vector<64x512xf32>
    %20 = arith.cmpf oge, %18, %19 : vector<64x512xf32>
    %cst_11 = arith.constant 2.000000e-01 : f32
    %21 = vector.broadcast %cst_11 : f32 to vector<64x512xf32>
    %22 = arith.mulf %21, %18 : vector<64x512xf32>
    %23 = arith.select %20, %18, %22 : vector<64x512xi1>, vector<64x512xf32>
    %cst_12 = arith.constant 1.41421354 : f32
    %24 = vector.broadcast %cst_12 : f32 to vector<64x512xf32>
    %25 = arith.mulf %23, %24 : vector<64x512xf32>
    %c1 = arith.constant 1 : index
    %c0_13 = arith.constant 0 : index
    %c0_14 = arith.constant 0 : index
    %26 = vector.load %arg2[%c1, %c0_13, %c0_14] : memref<8x64x64xbf16, #tpu.memory_space<vmem>>, vector<1x64x64xbf16>
    %27 = vector.shape_cast %26 : vector<1x64x64xbf16> to vector<64x64xbf16>
    %28 = arith.truncf %25 : vector<64x512xf32> to vector<64x512xbf16>
    %cst_15 = arith.constant dense<0.000000e+00> : vector<64x512xf32>
    %29 = tpu.matmul %27, %28, %cst_15 {dimension_numbers = #tpu.dot_dimension_numbers<[1], [0], [0], [1], [0, 0, 1, 1], [], []>} : vector<64x64xbf16>, vector<64x512xbf16>, vector<64x512xf32> -> vector<64x512xf32>
    %c1_16 = arith.constant 1 : index
    %c0_17 = arith.constant 0 : index
    %c0_18 = arith.constant 0 : index
    %30 = vector.load %arg3[%c1_16, %c0_17, %c0_18] : memref<8x64x1xf32, #tpu.memory_space<vmem>>, vector<1x64x1xf32>
    %31 = vector.shape_cast %30 : vector<1x64x1xf32> to vector<64x1xf32>
    %32 = vector.broadcast %31 : vector<64x1xf32> to vector<64x512xf32>
    %33 = arith.addf %29, %32 : vector<64x512xf32>
    %cst_19 = arith.constant 0.000000e+00 : f32
    %34 = vector.broadcast %cst_19 : f32 to vector<64x512xf32>
    %35 = arith.cmpf oge, %33, %34 : vector<64x512xf32>
    %cst_20 = arith.constant 2.000000e-01 : f32
    %36 = vector.broadcast %cst_20 : f32 to vector<64x512xf32>
    %37 = arith.mulf %36, %33 : vector<64x512xf32>
    %38 = arith.select %35, %33, %37 : vector<64x512xi1>, vector<64x512xf32>
    %cst_21 = arith.constant 1.41421354 : f32
    %39 = vector.broadcast %cst_21 : f32 to vector<64x512xf32>
    %40 = arith.mulf %38, %39 : vector<64x512xf32>
    %c2 = arith.constant 2 : index
    %c0_22 = arith.constant 0 : index
    %c0_23 = arith.constant 0 : index
    %41 = vector.load %arg2[%c2, %c0_22, %c0_23] : memref<8x64x64xbf16, #tpu.memory_space<vmem>>, vector<1x64x64xbf16>
    %42 = vector.shape_cast %41 : vector<1x64x64xbf16> to vector<64x64xbf16>
    %43 = arith.truncf %40 : vector<64x512xf32> to vector<64x512xbf16>
    %cst_24 = arith.constant dense<0.000000e+00> : vector<64x512xf32>
    %44 = tpu.matmul %42, %43, %cst_24 {dimension_numbers = #tpu.dot_dimension_numbers<[1], [0], [0], [1], [0, 0, 1, 1], [], []>} : vector<64x64xbf16>, vector<64x512xbf16>, vector<64x512xf32> -> vector<64x512xf32>
    %c2_25 = arith.constant 2 : index
    %c0_26 = arith.constant 0 : index
    %c0_27 = arith.constant 0 : index
    %45 = vector.load %arg3[%c2_25, %c0_26, %c0_27] : memref<8x64x1xf32, #tpu.memory_space<vmem>>, vector<1x64x1xf32>
    %46 = vector.shape_cast %45 : vector<1x64x1xf32> to vector<64x1xf32>
    %47 = vector.broadcast %46 : vector<64x1xf32> to vector<64x512xf32>
    %48 = arith.addf %44, %47 : vector<64x512xf32>
    %cst_28 = arith.constant 0.000000e+00 : f32
    %49 = vector.broadcast %cst_28 : f32 to vector<64x512xf32>
    %50 = arith.cmpf oge, %48, %49 : vector<64x512xf32>
    %cst_29 = arith.constant 2.000000e-01 : f32
    %51 = vector.broadcast %cst_29 : f32 to vector<64x512xf32>
    %52 = arith.mulf %51, %48 : vector<64x512xf32>
    %53 = arith.select %50, %48, %52 : vector<64x512xi1>, vector<64x512xf32>
    %cst_30 = arith.constant 1.41421354 : f32
    %54 = vector.broadcast %cst_30 : f32 to vector<64x512xf32>
    %55 = arith.mulf %53, %54 : vector<64x512xf32>
    %c3 = arith.constant 3 : index
    %c0_31 = arith.constant 0 : index
    %c0_32 = arith.constant 0 : index
    %56 = vector.load %arg2[%c3, %c0_31, %c0_32] : memref<8x64x64xbf16, #tpu.memory_space<vmem>>, vector<1x64x64xbf16>
    %57 = vector.shape_cast %56 : vector<1x64x64xbf16> to vector<64x64xbf16>
    %58 = arith.truncf %55 : vector<64x512xf32> to vector<64x512xbf16>
    %cst_33 = arith.constant dense<0.000000e+00> : vector<64x512xf32>
    %59 = tpu.matmul %57, %58, %cst_33 {dimension_numbers = #tpu.dot_dimension_numbers<[1], [0], [0], [1], [0, 0, 1, 1], [], []>} : vector<64x64xbf16>, vector<64x512xbf16>, vector<64x512xf32> -> vector<64x512xf32>
    %c3_34 = arith.constant 3 : index
    %c0_35 = arith.constant 0 : index
    %c0_36 = arith.constant 0 : index
    %60 = vector.load %arg3[%c3_34, %c0_35, %c0_36] : memref<8x64x1xf32, #tpu.memory_space<vmem>>, vector<1x64x1xf32>
    %61 = vector.shape_cast %60 : vector<1x64x1xf32> to vector<64x1xf32>
    %62 = vector.broadcast %61 : vector<64x1xf32> to vector<64x512xf32>
    %63 = arith.addf %59, %62 : vector<64x512xf32>
    %cst_37 = arith.constant 0.000000e+00 : f32
    %64 = vector.broadcast %cst_37 : f32 to vector<64x512xf32>
    %65 = arith.cmpf oge, %63, %64 : vector<64x512xf32>
    %cst_38 = arith.constant 2.000000e-01 : f32
    %66 = vector.broadcast %cst_38 : f32 to vector<64x512xf32>
    %67 = arith.mulf %66, %63 : vector<64x512xf32>
    %68 = arith.select %65, %63, %67 : vector<64x512xi1>, vector<64x512xf32>
    %cst_39 = arith.constant 1.41421354 : f32
    %69 = vector.broadcast %cst_39 : f32 to vector<64x512xf32>
    %70 = arith.mulf %68, %69 : vector<64x512xf32>
    %c4 = arith.constant 4 : index
    %c0_40 = arith.constant 0 : index
    %c0_41 = arith.constant 0 : index
    %71 = vector.load %arg2[%c4, %c0_40, %c0_41] : memref<8x64x64xbf16, #tpu.memory_space<vmem>>, vector<1x64x64xbf16>
    %72 = vector.shape_cast %71 : vector<1x64x64xbf16> to vector<64x64xbf16>
    %73 = arith.truncf %70 : vector<64x512xf32> to vector<64x512xbf16>
    %cst_42 = arith.constant dense<0.000000e+00> : vector<64x512xf32>
    %74 = tpu.matmul %72, %73, %cst_42 {dimension_numbers = #tpu.dot_dimension_numbers<[1], [0], [0], [1], [0, 0, 1, 1], [], []>} : vector<64x64xbf16>, vector<64x512xbf16>, vector<64x512xf32> -> vector<64x512xf32>
    %c4_43 = arith.constant 4 : index
    %c0_44 = arith.constant 0 : index
    %c0_45 = arith.constant 0 : index
    %75 = vector.load %arg3[%c4_43, %c0_44, %c0_45] : memref<8x64x1xf32, #tpu.memory_space<vmem>>, vector<1x64x1xf32>
    %76 = vector.shape_cast %75 : vector<1x64x1xf32> to vector<64x1xf32>
    %77 = vector.broadcast %76 : vector<64x1xf32> to vector<64x512xf32>
    %78 = arith.addf %74, %77 : vector<64x512xf32>
    %cst_46 = arith.constant 0.000000e+00 : f32
    %79 = vector.broadcast %cst_46 : f32 to vector<64x512xf32>
    %80 = arith.cmpf oge, %78, %79 : vector<64x512xf32>
    %cst_47 = arith.constant 2.000000e-01 : f32
    %81 = vector.broadcast %cst_47 : f32 to vector<64x512xf32>
    %82 = arith.mulf %81, %78 : vector<64x512xf32>
    %83 = arith.select %80, %78, %82 : vector<64x512xi1>, vector<64x512xf32>
    %cst_48 = arith.constant 1.41421354 : f32
    %84 = vector.broadcast %cst_48 : f32 to vector<64x512xf32>
    %85 = arith.mulf %83, %84 : vector<64x512xf32>
    %c5 = arith.constant 5 : index
    %c0_49 = arith.constant 0 : index
    %c0_50 = arith.constant 0 : index
    %86 = vector.load %arg2[%c5, %c0_49, %c0_50] : memref<8x64x64xbf16, #tpu.memory_space<vmem>>, vector<1x64x64xbf16>
    %87 = vector.shape_cast %86 : vector<1x64x64xbf16> to vector<64x64xbf16>
    %88 = arith.truncf %85 : vector<64x512xf32> to vector<64x512xbf16>
    %cst_51 = arith.constant dense<0.000000e+00> : vector<64x512xf32>
    %89 = tpu.matmul %87, %88, %cst_51 {dimension_numbers = #tpu.dot_dimension_numbers<[1], [0], [0], [1], [0, 0, 1, 1], [], []>} : vector<64x64xbf16>, vector<64x512xbf16>, vector<64x512xf32> -> vector<64x512xf32>
    %c5_52 = arith.constant 5 : index
    %c0_53 = arith.constant 0 : index
    %c0_54 = arith.constant 0 : index
    %90 = vector.load %arg3[%c5_52, %c0_53, %c0_54] : memref<8x64x1xf32, #tpu.memory_space<vmem>>, vector<1x64x1xf32>
    %91 = vector.shape_cast %90 : vector<1x64x1xf32> to vector<64x1xf32>
    %92 = vector.broadcast %91 : vector<64x1xf32> to vector<64x512xf32>
    %93 = arith.addf %89, %92 : vector<64x512xf32>
    %cst_55 = arith.constant 0.000000e+00 : f32
    %94 = vector.broadcast %cst_55 : f32 to vector<64x512xf32>
    %95 = arith.cmpf oge, %93, %94 : vector<64x512xf32>
    %cst_56 = arith.constant 2.000000e-01 : f32
    %96 = vector.broadcast %cst_56 : f32 to vector<64x512xf32>
    %97 = arith.mulf %96, %93 : vector<64x512xf32>
    %98 = arith.select %95, %93, %97 : vector<64x512xi1>, vector<64x512xf32>
    %cst_57 = arith.constant 1.41421354 : f32
    %99 = vector.broadcast %cst_57 : f32 to vector<64x512xf32>
    %100 = arith.mulf %98, %99 : vector<64x512xf32>
    %c6 = arith.constant 6 : index
    %c0_58 = arith.constant 0 : index
    %c0_59 = arith.constant 0 : index
    %101 = vector.load %arg2[%c6, %c0_58, %c0_59] : memref<8x64x64xbf16, #tpu.memory_space<vmem>>, vector<1x64x64xbf16>
    %102 = vector.shape_cast %101 : vector<1x64x64xbf16> to vector<64x64xbf16>
    %103 = arith.truncf %100 : vector<64x512xf32> to vector<64x512xbf16>
    %cst_60 = arith.constant dense<0.000000e+00> : vector<64x512xf32>
    %104 = tpu.matmul %102, %103, %cst_60 {dimension_numbers = #tpu.dot_dimension_numbers<[1], [0], [0], [1], [0, 0, 1, 1], [], []>} : vector<64x64xbf16>, vector<64x512xbf16>, vector<64x512xf32> -> vector<64x512xf32>
    %c6_61 = arith.constant 6 : index
    %c0_62 = arith.constant 0 : index
    %c0_63 = arith.constant 0 : index
    %105 = vector.load %arg3[%c6_61, %c0_62, %c0_63] : memref<8x64x1xf32, #tpu.memory_space<vmem>>, vector<1x64x1xf32>
    %106 = vector.shape_cast %105 : vector<1x64x1xf32> to vector<64x1xf32>
    %107 = vector.broadcast %106 : vector<64x1xf32> to vector<64x512xf32>
    %108 = arith.addf %104, %107 : vector<64x512xf32>
    %cst_64 = arith.constant 0.000000e+00 : f32
    %109 = vector.broadcast %cst_64 : f32 to vector<64x512xf32>
    %110 = arith.cmpf oge, %108, %109 : vector<64x512xf32>
    %cst_65 = arith.constant 2.000000e-01 : f32
    %111 = vector.broadcast %cst_65 : f32 to vector<64x512xf32>
    %112 = arith.mulf %111, %108 : vector<64x512xf32>
    %113 = arith.select %110, %108, %112 : vector<64x512xi1>, vector<64x512xf32>
    %cst_66 = arith.constant 1.41421354 : f32
    %114 = vector.broadcast %cst_66 : f32 to vector<64x512xf32>
    %115 = arith.mulf %113, %114 : vector<64x512xf32>
    %c7 = arith.constant 7 : index
    %c0_67 = arith.constant 0 : index
    %c0_68 = arith.constant 0 : index
    %116 = vector.load %arg2[%c7, %c0_67, %c0_68] : memref<8x64x64xbf16, #tpu.memory_space<vmem>>, vector<1x64x64xbf16>
    %117 = vector.shape_cast %116 : vector<1x64x64xbf16> to vector<64x64xbf16>
    %118 = arith.truncf %115 : vector<64x512xf32> to vector<64x512xbf16>
    %cst_69 = arith.constant dense<0.000000e+00> : vector<64x512xf32>
    %119 = tpu.matmul %117, %118, %cst_69 {dimension_numbers = #tpu.dot_dimension_numbers<[1], [0], [0], [1], [0, 0, 1, 1], [], []>} : vector<64x64xbf16>, vector<64x512xbf16>, vector<64x512xf32> -> vector<64x512xf32>
    %c7_70 = arith.constant 7 : index
    %c0_71 = arith.constant 0 : index
    %c0_72 = arith.constant 0 : index
    %120 = vector.load %arg3[%c7_70, %c0_71, %c0_72] : memref<8x64x1xf32, #tpu.memory_space<vmem>>, vector<1x64x1xf32>
    %121 = vector.shape_cast %120 : vector<1x64x1xf32> to vector<64x1xf32>
    %122 = vector.broadcast %121 : vector<64x1xf32> to vector<64x512xf32>
    %123 = arith.addf %119, %122 : vector<64x512xf32>
    %cst_73 = arith.constant 0.000000e+00 : f32
    %124 = vector.broadcast %cst_73 : f32 to vector<64x512xf32>
    %125 = arith.cmpf oge, %123, %124 : vector<64x512xf32>
    %cst_74 = arith.constant 2.000000e-01 : f32
    %126 = vector.broadcast %cst_74 : f32 to vector<64x512xf32>
    %127 = arith.mulf %126, %123 : vector<64x512xf32>
    %128 = arith.select %125, %123, %127 : vector<64x512xi1>, vector<64x512xf32>
    %cst_75 = arith.constant 1.41421354 : f32
    %129 = vector.broadcast %cst_75 : f32 to vector<64x512xf32>
    %130 = arith.mulf %128, %129 : vector<64x512xf32>
    %c0_i32 = arith.constant 0 : i32
    %131 = arith.cmpi eq, %arg0, %c0_i32 : i32
    %132 = arith.extui %131 : i1 to i32
    %c0_i32_76 = arith.constant 0 : i32
    %133 = arith.cmpi ne, %132, %c0_i32_76 : i32
    scf.if %133 {
      %cst_83 = arith.constant 0.000000e+00 : f32
      %141 = vector.broadcast %cst_83 : f32 to vector<64x1xf32>
      %c0_84 = arith.constant 0 : index
      %c0_85 = arith.constant 0 : index
      %142 = vector.load %arg4[%c0_84, %c0_85] : memref<64x1xf32, #tpu.memory_space<vmem>>, vector<64x1xf32>
      tpu.vector_store %arg4[%c0_84, %c0_85], %141 {strides = array<i32>} : memref<64x1xf32, #tpu.memory_space<vmem>>, vector<64x1xf32>,
    } else {
    }
    %c0_77 = arith.constant 0 : index
    %c0_78 = arith.constant 0 : index
    %134 = vector.load %arg4[%c0_77, %c0_78] : memref<64x1xf32, #tpu.memory_space<vmem>>, vector<64x1xf32>
    %cst_79 = arith.constant dense<0.000000e+00> : vector<64xf32>
    %135 = vector.multi_reduction <add>, %130, %cst_79 [1] : vector<64x512xf32> to vector<64xf32>
    %136 = vector.shape_cast %135 : vector<64xf32> to vector<64x1xf32>
    %cst_80 = arith.constant 2.44140625E-4 : f32
    %137 = vector.broadcast %cst_80 : f32 to vector<64x1xf32>
    %138 = arith.mulf %136, %137 : vector<64x1xf32>
    %139 = arith.addf %134, %138 : vector<64x1xf32>
    %c0_81 = arith.constant 0 : index
    %c0_82 = arith.constant 0 : index
    %140 = vector.load %arg4[%c0_81, %c0_82] : memref<64x1xf32, #tpu.memory_space<vmem>>, vector<64x1xf32>
    tpu.vector_store %arg4[%c0_81, %c0_82], %139 {strides = array<i32>} : memref<64x1xf32, #tpu.memory_space<vmem>>, vector<64x1xf32>,
    return
  }
  func.func @transform_0(%arg0: i32) -> (i32, i32) {
    %c0_i32 = arith.constant 0 : i32
    %c0_i32_0 = arith.constant 0 : i32
    return %c0_i32, %arg0 : i32, i32
  }
  func.func @transform_1(%arg0: i32) -> (i32, i32, i32) {
    %c0_i32 = arith.constant 0 : i32
    %c0_i32_0 = arith.constant 0 : i32
    %c0_i32_1 = arith.constant 0 : i32
    %c0_i32_2 = arith.constant 0 : i32
    return %c0_i32, %c0_i32_0, %c0_i32_1 : i32, i32, i32
  }
  func.func @transform_2(%arg0: i32) -> (i32, i32, i32) {
    %c0_i32 = arith.constant 0 : i32
    %c0_i32_0 = arith.constant 0 : i32
    %c0_i32_1 = arith.constant 0 : i32
    %c0_i32_2 = arith.constant 0 : i32
    return %c0_i32, %c0_i32_0, %c0_i32_1 : i32, i32, i32
  }
  func.func @transform_3(%arg0: i32) -> (i32, i32) {
    %c0_i32 = arith.constant 0 : i32
    %c0_i32_0 = arith.constant 0 : i32
    %c0_i32_1 = arith.constant 0 : i32
    return %c0_i32, %c0_i32_0 : i32, i32
  }
}

</mosaic_0001>

<bundles_post_ra>
// kernel: tpu_custom_call.1
= control target key start
LH: loop header
LB: loop body
LE: loop exit
PB: predicated region body
PF: predicated region fallthrough
CT: control target
= control target key end

     0   :  { %8 = vsyncpa [#allocation3], 0  ;;  %s5062_s0 = inlined_call_operand.hbm [shape: f32[64,4096], index: 0, kind: input, shape index: {}]   ;;  %s5063_s1 = inlined_call_operand.vmem [shape: bf16[8,64,64], index: 1, kind: input, shape index: {}]   ;;  %s5064_s2 = inlined_call_operand.vmem [shape: f32[8,64,1], index: 2, kind: input, shape index: {}]   ;;  %s5065_s3 = inlined_call_operand.vmem [shape: f32[64,1], index: 3, kind: output, shape index: {}]  }
   0x1   :  { %10 = vsyncpa [#allocation3 + $0x1], 0  ;;  %s3901_s12 = smov 0   ;;  %s3903_s13 = smov 0  }
   0x2   :  { %s3905_s14 = smov 0   ;;  %s3907_s15 = smov 0  }
   0x3 LB: > { %s3503_s16 = sadd.s32 4294967295, %s3873_s15   ;;  %s3921_s17 = sadd.s32 1, %s3873_s15   ;;  %s3873_s15 = sphi %s3907_s15, %s5071_s15   ;;  %s3869_s14 = sphi %s3905_s14, %s5070_s14   ;;  %s3865_s13 = sphi %s3903_s13, %s5069_s13   ;;  %s3861_s12 = sphi %s3901_s12, %s5068_s12  }
   0x4   : > { %s20_s18 = ssub.s32 %s3873_s15, %s3921_s17  ;;  %s23_s19 = sadd.s32 1, %s3869_s14 }
   0x5   : > { %p21_p0 = scmp.eq.s32.totalorder %s20_s18, 0  ;;  %p30_p1 = scmp.ne.s32.totalorder %s3869_s14, %s3865_s13 }
   0x6   : > { %p31_p2 = scmp.eq.s32.totalorder %s3873_s15, 0  ;;  %p36_p3 = scmp.ne.s32.totalorder %s3865_s13, %s3861_s12 }
   0x7   : > { %s3931_s20 = scalar_select %p21_p0, %s3869_s14, %s23_s19  }
   0x8   : > { %p32_p4 = por %p31_p2, %p30_p1  ;;  %p37_p5 = scmp.eq.s32.totalorder %s3503_s16, 0 }
   0x9   : > { %p3729_p6 = scmp.lt.s32.totalorder %s3873_s15, 8  ;;  %s129_s22 = sand.u32 1, %s3869_s14  }
   0xa   : > { %p3936_p7 = por %p37_p5, %p36_p3  ;;  %s3506_s23 = sshll.u32 %s129_s22, 8 }
   0xb   : > { %s3722_s24 = sshll.u32 %s3873_s15, 9  ;;  %s133_s28 = scalar_lea.vmem [#allocation2], %s3506_s23 }
   0xc   : > { %s3945_s27 = scalar_lea.hbm %s5062_s0, %s3722_s24  ;;  %s140_s29 = sshll.u32 %s133_s28, 4  ;;  %s3947_s29 = int_to_ptr.vmem [resolvable:$true] %s140_s29 }
   0xd   : > { %p3949_p8 = pnand %p3729_p6, %p32_p4  ;;  %s3953_s4 = scalar_lea.sflag [#allocation3], %s129_s22 }
   0xe   : > { %s3809_s5 = scalar_lea.hbm %s3945_s27, 4096  ;;  %s3814_s8 = scalar_lea.hbm %s5062_s0, 32768 }
   0xf   : > { %p3810_p9 = scmp.ne.s32.totalorder %s3945_s27, %s3809_s5  ;;  %p3811_p10 = pneg %p3949_p8 }
  0x10   : > { %p3815_p13 = scmp.lt.u32.totalorder %s3945_s27, %s5062_s0  ;;  %p3816_p0 = scmp.lt.u32.totalorder %s3814_s8, %s3809_s5 }
  0x11   : > { %p3812_p11 = pnand %p3811_p10, %p3810_p9  ;;  %p3818_p2 = scmp.lt.u32.totalorder %s3809_s5, %s3945_s27 }
  0x12   : > { %p3817_p1 = por %p3816_p0, %p3815_p13 }
  0x13   : > { %p3813_p12 = pneg %p3812_p11 }
  0x14   : > { %p3819_p3 = por %p3818_p2, %p3817_p1 }
  0x16   : > { %p3820_p4 = pnand %p3819_p3, %p3813_p12 }
  0x18   : > { %3823 = shalt.err (!%p3820_p4)
}
  0x19   : > { %s3824_s11 = scalar_lea.vmem %s3947_s29, 4096  ;;  %s3875_s12 = smov [#allocation2]  }
  0x1a   : > { %p3825_p5 = scmp.ne.s32.totalorder %s3947_s29, %s3824_s11  ;;  %s3829_s18 = sshll.u32 %s3875_s12, 4  ;;  %s3830_s18 = int_to_ptr.vmem [resolvable:$false] %s3829_s18 }
  0x1b   : > { %s3831_s19 = scalar_lea.vmem %s3830_s18, 8192  ;;  %p3832_p11 = scmp.lt.s32.totalorder %s3947_s29, %s3830_s18 }
  0x1c   : > { %p3827_p6 = pnand %p3825_p5, %p3811_p10  ;;  %p3833_p13 = scmp.lt.s32.totalorder %s3831_s19, %s3824_s11 }
  0x1e   : > { %p3828_p9 = pneg %p3827_p6  ;;  %p3834_p0 = por %p3833_p13, %p3832_p11 }
  0x20   : > { %p3835_p1 = pnand %p3834_p0, %p3828_p9 }
  0x22   : > { %3838 = shalt.err (!%p3835_p1)
}
  0x23   : > { %s3876_s22 = smov 4096   ;;  %s3877_s23 = smov 512  }
  0x24   : > { %s3878_s24 = smov 32   ;;  %p3509_p10 = scmp.ge.s32.totalorder %s3873_s15, 1 }
  0x25   : > { %3728 = dma.hbm_to_vmem [thread:$0]  (!%p3949_p8), %s3945_s27, 4096, %s3947_s29, %s3953_s4, %s3876_s22, %s3877_s23, %s3878_s24  }
  0x26   : > { %p148_p12 = scmp.lt.s32.totalorder %s3873_s15, 9 }
  0x28   : > { %p149_p2 = pnand %p3509_p10, %p148_p12 }
  0x29   : > { %s154_s25 = sand.u32 (!%p149_p2), 1, %s3865_s13  }
  0x2a   : > { %152 = sbr.rel (%p149_p2) target bundleno = 2390 (0x956), region = 32  ;;  %s3510_s26 = sshll.u32 (!%p149_p2), %s154_s25, 8 }
  0x2b   : > { %s155_s28 = scalar_lea.sflag (!%p149_p2), [#allocation3], %s154_s25  ;;  %s3984_s5 = scalar_lea.vmem (!%p149_p2), [#allocation2], %s3510_s26 }
  0x31   : > { %3856 = dma.done.wait (%p3936_p7), %s155_s28, 4096  }
  0x32   : > { %3858 = vsyncadd (%p3936_p7), %s155_s28, 4294963200  ;;  %v3879_v0 = vmov 0   ;;  %v363_v1 = vld [vmem:[%s5064_s2] sm:$0xff]  ;;  %v365_v2 = vld [vmem:[%s5064_s2 + $0x10] sm:$0xff]  ;;  %vm431_vm0 = vcmask 523264   ;;  %p3719_p7 = scmp.ne.s32.totalorder %s3503_s16, 0 }
  0x33   : > { %3767 = vset.pattern.permute.xlu0 %v3879_v0  ;;  %3768 = vset.pattern.permute.xlu1 %v3879_v0  ;;  %v364_v3 = vld [vmem:[%s5064_s2 + $0x8] sm:$0xff]  ;;  %v366_v4 = vld [vmem:[%s5064_s2 + $0x18] sm:$0xff]  ;;  %v367_v8 = vld [vmem:[%s5064_s2 + $0x20] sm:$0xff] }
  0x34   : > { %476 = vmatprep.mubr.bf16.mxu0 %v3879_v0  ;;  %549 = vmatprep.mubr.bf16.mxu1 %v3879_v0  ;;  %v4007_v5 = vld [vmem:[%s3984_s5 + $0x8] sm:$0xff]  ;;  %v4034_v15 = vld [vmem:[%s3984_s5 + $0x18] sm:$0xff]  ;;  %v369_v22 = vld [vmem:[%s5064_s2 + $0x30] sm:$0xff] }
  0x35   : > { %373 = vperm.xlu0 %3767, %v363_v1   ;;  %383 = vperm.xlu1 %3768, %v365_v2   ;;  %v4010_v6 = vld [vmem:[%s3984_s5 + $0x28] sm:$0xff]  ;;  %v211_v10 = vmul.f32 %v4007_v5, %v4007_v5  ;;  %v4039_v18 = vld [vmem:[%s3984_s5 + $0x38] sm:$0xff]  ;;  %v213_v21 = vmul.f32 %v4034_v15, %v4034_v15  ;;  %v4071_v31 = vld [vmem:[%s3984_s5] sm:$0xff] }
  0x36   : > { %v4013_v7 = vld [vmem:[%s3984_s5 + $0x48] sm:$0xff]  ;;  %v215_v11 = vmul.f32 %v4010_v6, %v4010_v6  ;;  %v4042_v19 = vld [vmem:[%s3984_s5 + $0x58] sm:$0xff]  ;;  %v217_v26 = vmul.f32 %v4039_v18, %v4039_v18  ;;  %v4074_v32 = vld [vmem:[%s3984_s5 + $0x20] sm:$0xff]  ;;  %v210_v38 = vmul.f32 %v4071_v31, %v4071_v31 }
  0x37   : > { %v4019_v9 = vld [vmem:[%s3984_s5 + $0x68] sm:$0xff]  ;;  %v219_v12 = vmul.f32 %v4013_v7, %v4013_v7  ;;  %v4045_v20 = vld [vmem:[%s3984_s5 + $0x78] sm:$0xff]  ;;  %v221_v27 = vmul.f32 %v4042_v19, %v4042_v19  ;;  %v4082_v36 = vld [vmem:[%s3984_s5 + $0x40] sm:$0xff]  ;;  %v214_v43 = vmul.f32 %v4074_v32, %v4074_v32 }
  0x38   : > { %v368_v13 = vld [vmem:[%s5064_s2 + $0x28] sm:$0xff]  ;;  %v223_v16 = vmul.f32 %v4019_v9, %v4019_v9  ;;  %v255_v17 = vadd.f32 %v215_v11, %v211_v10  ;;  %v4068_v30 = vld [vmem:[%s3984_s5 + $0x98] sm:$0xff]  ;;  %v225_v34 = vmul.f32 %v4045_v20, %v4045_v20  ;;  %v281_v35 = vadd.f32 %v217_v26, %v213_v21  ;;  %v4085_v37 = vld [vmem:[%s3984_s5 + $0x60] sm:$0xff] }
  0x39   : > { %378 = vperm.xlu0 %3767, %v364_v3   ;;  %388 = vperm.xlu1 %3768, %v366_v4   ;;  %v4031_v14 = vld [vmem:[%s3984_s5 + $0x88] sm:$0xff]  ;;  %v370_v33 = vld [vmem:[%s5064_s2 + $0x38] sm:$0xff]  ;;  %v4095_v42 = vld [vmem:[%s3984_s5 + $0x80] sm:$0xff]  ;;  %v218_v44 = vmul.f32 %v4082_v36, %v4082_v36  ;;  %v229_v47 = vmul.f32 %v4068_v30, %v4068_v30  ;;  %v222_v55 = vmul.f32 %v4085_v37, %v4085_v37 }
  0x3a   : > { %v4053_v23 = vld [vmem:[%s3984_s5 + $0xa8] sm:$0xff]  ;;  %v227_v28 = vmul.f32 %v4031_v14, %v4031_v14  ;;  %v256_v29 = vadd.f32 %v255_v17, %v219_v12  ;;  %v4092_v41 = vld [vmem:[%s3984_s5 + $0xb8] sm:$0xff]  ;;  %v282_v48 = vadd.f32 %v281_v35, %v221_v27  ;;  %v4108_v49 = vld [vmem:[%s3984_s5 + $0x10] sm:$0xff]  ;;  %v242_v56 = vadd.f32 %v214_v43, %v210_v38 }
  0x3b   : > { %v4056_v24 = vld [vmem:[%s3984_s5 + $0xc8] sm:$0xff]  ;;  %v231_v39 = vmul.f32 %v4053_v23, %v4053_v23  ;;  %v4111_v50 = vld [vmem:[%s3984_s5 + $0x30] sm:$0xff]  ;;  %v4117_v53 = vld [vmem:[%s3984_s5 + $0xd8] sm:$0xff]  ;;  %v233_v60 = vmul.f32 %v4092_v41, %v4092_v41  ;;  %v212_v62 = vmul.f32 %v4108_v49, %v4108_v49  ;;  %v226_v4 = vmul.f32 %v4095_v42, %v4095_v42 }
  0x3c   : > { %v4059_v25 = vld [vmem:[%s3984_s5 + $0xe8] sm:$0xff]  ;;  %v257_v40 = vadd.f32 %v256_v29, %v223_v16  ;;  %v235_v45 = vmul.f32 %v4056_v24, %v4056_v24  ;;  %v4114_v51 = vld [vmem:[%s3984_s5 + $0x50] sm:$0xff]  ;;  %v4120_v54 = vld [vmem:[%s3984_s5 + $0xa0] sm:$0xff]  ;;  %v283_v61 = vadd.f32 %v282_v48, %v225_v34  ;;  %v216_v63 = vmul.f32 %v4111_v50, %v4111_v50 }
  0x3d   : > { %393 = vperm.xlu0 %3767, %v367_v8   ;;  %398 = vperm.xlu1 %3768, %v368_v13   ;;  %v239_v46 = vmul.f32 %v4059_v25, %v4059_v25  ;;  %v4125_v57 = vld [vmem:[%s3984_s5 + $0x70] sm:$0xff]  ;;  %v3531_v58 = vld [vmem:[%s5064_s2 + $0x40] sm:$0xff]  ;;  %v3532_v59 = vld [vmem:[%s5064_s2 + $0x48] sm:$0xff]  ;;  %v243_v8 = vadd.f32 %v242_v56, %v218_v44  ;;  %v220_v10 = vmul.f32 %v4114_v51, %v4114_v51 }
  0x3e   : > { %v258_v52 = vadd.f32 %v257_v40, %v227_v28  ;;  %v4140_v2 = vld [vmem:[%s3984_s5 + $0xf8] sm:$0xff]  ;;  %v4143_v3 = vld [vmem:[%s3984_s5 + $0xc0] sm:$0xff]  ;;  %v237_v11 = vmul.f32 %v4117_v53, %v4117_v53  ;;  %v284_v12 = vadd.f32 %v283_v61, %v229_v47  ;;  %v230_v13 = vmul.f32 %v4120_v54, %v4120_v54  ;;  %v4154_v16 = vld [vmem:[%s3984_s5 + $0x90] sm:$0xff] }
  0x3f   : > { %v224_v17 = vmul.f32 %v4125_v57, %v4125_v57  ;;  %v244_v26 = vadd.f32 %v243_v8, %v222_v55  ;;  %v268_v27 = vadd.f32 %v216_v63, %v212_v62  ;;  %v3533_v28 = vld [vmem:[%s5064_s2 + $0x50] sm:$0xff]  ;;  %v241_v29 = vmul.f32 %v4140_v2, %v4140_v2  ;;  %v3534_v38 = vld [vmem:[%s5064_s2 + $0x58] sm:$0xff]  ;;  %v3536_v61 = vld [vmem:[%s5064_s2 + $0x68] sm:$0xff] }
  0x40   : > { %v259_v1 = vadd.f32 %v258_v52, %v231_v39  ;;  %v234_v34 = vmul.f32 %v4143_v3, %v4143_v3  ;;  %v4169_v35 = vld [vmem:[%s3984_s5 + $0xb0] sm:$0xff]  ;;  %v228_v43 = vmul.f32 %v4154_v16, %v4154_v16  ;;  %v3535_v52 = vld [vmem:[%s5064_s2 + $0x60] sm:$0xff] }
  0x41   : > { %403 = vperm.xlu0 %3767, %v369_v22   ;;  %408 = vperm.xlu1 %3768, %v370_v33   ;;  %v4159_v22 = vld [vmem:[%s3984_s5 + $0xe0] sm:$0xff]  ;;  %v285_v33 = vadd.f32 %v284_v12, %v233_v60  ;;  %v245_v40 = vadd.f32 %v244_v26, %v226_v4  ;;  %v269_v44 = vadd.f32 %v268_v27, %v220_v10  ;;  %v4179_v48 = vld [vmem:[%s3984_s5 + $0xd0] sm:$0xff]  ;;  %v3538_v26 = vld [vmem:[%s5064_s2 + $0x78] sm:$0xff] }
  0x42   : > { %v260_v21 = vadd.f32 %v259_v1, %v235_v45  ;;  %v238_v47 = vmul.f32 %v4159_v22, %v4159_v22  ;;  %v236_v1 = vmul.f32 %v4179_v48, %v4179_v48 }
  0x43   : > { %v286_v45 = vadd.f32 %v285_v33, %v237_v11  ;;  %v246_v56 = vadd.f32 %v245_v40, %v230_v13 }
  0x44   : > { %v261_v39 = vadd.f32 %v260_v21, %v239_v46  ;;  %v232_v46 = vmul.f32 %v4169_v35, %v4169_v35  ;;  %v3537_v21 = vld [vmem:[%s5064_s2 + $0x70] sm:$0xff] }
  0x45   : > { %754 = vperm.xlu0 %3767, %v3531_v58   ;;  %759 = vperm.xlu1 %3768, %v3532_v59   ;;  %v4185_v58 = vld [vmem:[%s3984_s5 + $0xf0] sm:$0xff]  ;;  %v270_v59 = vadd.f32 %v269_v44, %v224_v17  ;;  %v287_v60 = vadd.f32 %v286_v45, %v241_v29  ;;  %v247_v63 = vadd.f32 %v246_v56, %v234_v34  ;;  %v3560_v44 = vld [vmem:[%s5064_s2 + $0x88] sm:$0xff] }
  0x46   : > { %v262_v55 = vrot.slane %v261_v39, 4  ;;  %v240_v12 = vmul.f32 %v4185_v58, %v4185_v58 }
  0x47   : > { %v271_v4 = vadd.f32 %v270_v59, %v228_v43  ;;  %v288_v8 = vrot.slane %v287_v60, 4  ;;  %v248_v11 = vadd.f32 %v247_v63, %v238_v47  ;;  %v3559_v43 = vld [vmem:[%s5064_s2 + $0x80] sm:$0xff] }
  0x48   : > { %v263_v62 = vadd.f32 %v262_v55, %v261_v39 }
  0x49   : > { %764 = vperm.xlu0 %3767, %v3533_v28   ;;  %769 = vperm.xlu1 %3768, %v3534_v38   ;;  %v272_v13 = vadd.f32 %v271_v4, %v232_v46  ;;  %v289_v17 = vadd.f32 %v288_v8, %v287_v60  ;;  %v249_v28 = vrot.slane %v248_v11, 4 }
  0x4a   : > { %v264_v10 = vrot.slane %v263_v62, 2 }
  0x4b   : > { %v273_v29 = vadd.f32 %v272_v13, %v236_v1  ;;  %v290_v33 = vrot.slane %v289_v17, 2  ;;  %v250_v38 = vadd.f32 %v249_v28, %v248_v11  ;;  %v3564_v11 = vld [vmem:[%s5064_s2 + $0xa8] sm:$0xff]  ;;  %v3566_v28 = vld [vmem:[%s5064_s2 + $0xb8] sm:$0xff] }
  0x4c   : > { %v265_v27 = vadd.f32 %v264_v10, %v263_v62  ;;  %v3562_v62 = vld [vmem:[%s5064_s2 + $0x98] sm:$0xff]  ;;  %v3563_v10 = vld [vmem:[%s5064_s2 + $0xa0] sm:$0xff] }
  0x4d   : > { %774 = vperm.xlu0 %3767, %v3535_v52   ;;  %779 = vperm.xlu1 %3768, %v3536_v61   ;;  %v274_v39 = vadd.f32 %v273_v29, %v240_v12  ;;  %v291_v40 = vadd.f32 %v290_v33, %v289_v17  ;;  %v251_v47 = vrot.slane %v250_v38, 2  ;;  %v3561_v61 = vld [vmem:[%s5064_s2 + $0x90] sm:$0xff] }
  0x4e   : > { %v266_v34 = vrot.slane %v265_v27, 1 }
  0x4f   : > { %v275_v52 = vrot.slane %v274_v39, 4  ;;  %v292_v55 = vrot.slane %v291_v40, 1  ;;  %v252_v46 = vadd.f32 %v251_v47, %v250_v38  ;;  %v3587_v38 = vld [vmem:[%s5064_s2 + $0xc0] sm:$0xff]  ;;  %v3589_v47 = vld [vmem:[%s5064_s2 + $0xd0] sm:$0xff] }
  0x50   : > { %v267_v45 = vadd.f32 %v266_v34, %v265_v27  ;;  %v3565_v27 = vld [vmem:[%s5064_s2 + $0xb0] sm:$0xff] }
  0x51   : > { %784 = vperm.xlu0 %3767, %v3537_v21   ;;  %789 = vperm.xlu1 %3768, %v3538_v26   ;;  %v276_v59 = vadd.f32 %v275_v52, %v274_v39  ;;  %v293_v60 = vadd.f32 %v292_v55, %v291_v40  ;;  %v253_v1 = vrot.slane %v252_v46, 1  ;;  %v3588_v40 = vld [vmem:[%s5064_s2 + $0xc8] sm:$0xff]  ;;  %v3590_v52 = vld [vmem:[%s5064_s2 + $0xd8] sm:$0xff] }
  0x52   : > { %v296_v56 = vmul.f32 0.015625, %v267_v45 }
  0x53   : > { %v277_v4 = vrot.slane %v276_v59, 2  ;;  %v298_v8 = vmul.f32 0.015625, %v293_v60  ;;  %v254_v12 = vadd.f32 %v253_v1, %v252_v46  ;;  %v3591_v60 = vld [vmem:[%s5064_s2 + $0xe0] sm:$0xff] }
  0x54   : > { %v300_v63 = vadd.f32 1e-08, %v296_v56 }
  0x55   : > { %1134 = vperm.xlu0 %3767, %v3559_v43   ;;  %1139 = vperm.xlu1 %3768, %v3560_v44   ;;  %v278_v13 = vadd.f32 %v277_v4, %v276_v59  ;;  %v302_v17 = vadd.f32 1e-08, %v298_v8  ;;  %v295_v21 = vmul.f32 0.015625, %v254_v12 }
  0x56   : > { %3801 = vrsqrt.f32 %v300_v63 }
  0x57   : > { %v279_v26 = vrot.slane %v278_v13, 1  ;;  %3803 = vrsqrt.f32 %v302_v17  ;;  %v299_v29 = vadd.f32 1e-08, %v295_v21 }
  0x59   : > { %1144 = vperm.xlu0 %3767, %v3561_v61   ;;  %1149 = vperm.xlu1 %3768, %v3562_v62   ;;  %v280_v33 = vadd.f32 %v279_v26, %v278_v13  ;;  %3805 = vrsqrt.f32 %v299_v29  ;;  %v3615_v29 = vld [vmem:[%s5064_s2 + $0x100] sm:$0xff] }
  0x5b   : > { %v297_v34 = vmul.f32 0.015625, %v280_v33 }
  0x5d   : > { %1154 = vperm.xlu0 %3767, %v3563_v10   ;;  %1159 = vperm.xlu1 %3768, %v3564_v11   ;;  %v301_v39 = vadd.f32 1e-08, %v297_v34 }
  0x5f   : > { %3807 = vrsqrt.f32 %v301_v39 }
  0x60   : > { %v3802_v43 = vpop.eup %3801 }
  0x61   : > { %1164 = vperm.xlu0 %3767, %v3565_v27   ;;  %1169 = vperm.xlu1 %3768, %v3566_v28   ;;  %v308_v44 = vmul.f32 %v3802_v43, %v4007_v5  ;;  %v312_v45 = vmul.f32 %v3802_v43, %v4010_v6  ;;  %v3804_v55 = vpop.eup %3803  ;;  %v316_v5 = vmul.f32 %v3802_v43, %v4013_v7 }
  0x62   : > { %v310_v46 = vmul.f32 %v3804_v55, %v4034_v15  ;;  %v314_v59 = vmul.f32 %v3804_v55, %v4039_v18  ;;  %v320_v6 = vmul.f32 %v3802_v43, %v4019_v9  ;;  %v324_v63 = vmul.f32 %v3802_v43, %v4031_v14 }
  0x63   : > { %v348_v56 = vpack.c.bf16 %v312_v45, %v308_v44  ;;  %v3806_v61 = vpop.eup %3805  ;;  %v318_v4 = vmul.f32 %v3804_v55, %v4042_v19  ;;  %v322_v8 = vmul.f32 %v3804_v55, %v4045_v20  ;;  %v328_v10 = vmul.f32 %v3802_v43, %v4053_v23  ;;  %v3592_v19 = vld [vmem:[%s5064_s2 + $0xe8] sm:$0xff]  ;;  %v3621_v45 = vld [vmem:[%s5064_s2 + $0x130] sm:$0xff] }
  0x64   : > { %v350_v62 = vpack.c.bf16 %v314_v59, %v310_v46  ;;  %v307_v1 = vmul.f32 %v3806_v61, %v4071_v31  ;;  %v311_v15 = vmul.f32 %v3806_v61, %v4074_v32  ;;  %v315_v18 = vmul.f32 %v3806_v61, %v4082_v36  ;;  %v3620_v44 = vld [vmem:[%s5064_s2 + $0x128] sm:$0xff]  ;;  %v3645_v46 = vld [vmem:[%s5064_s2 + $0x150] sm:$0xff] }
  0x65   : > { %1514 = vperm.xlu0 %3767, %v3587_v38   ;;  %1519 = vperm.xlu1 %3768, %v3588_v40   ;;  %v319_v7 = vmul.f32 %v3806_v61, %v4085_v37  ;;  %v352_v9 = vpack.c.bf16 %v320_v6, %v316_v5  ;;  %v332_v14 = vmul.f32 %v3802_v43, %v4056_v24  ;;  %v3769_v40 = vld [vmem:[%s5063_s1] sm:$0xff]   ;;  %v3771_v59 = vld [vmem:[%s5063_s1 + $0x10] sm:$0xff]   ;;  %v3646_v5 = vld [vmem:[%s5064_s2 + $0x158] sm:$0xff] }
  0x66   : > { %444 = vmatprep.subr.bf16.mxu0 %v348_v56  ;;  %517 = vmatprep.subr.bf16.mxu1 %v350_v62  ;;  %v347_v11 = vpack.c.bf16 %v311_v15, %v307_v1  ;;  %v323_v32 = vmul.f32 %v3806_v61, %v4095_v42  ;;  %v327_v36 = vmul.f32 %v3806_v61, %v4120_v54  ;;  %v3593_v42 = vld [vmem:[%s5064_s2 + $0xf0] sm:$0xff]  ;;  %v3644_v56 = vld [vmem:[%s5064_s2 + $0x148] sm:$0xff]  ;;  %v3647_v6 = vld [vmem:[%s5064_s2 + $0x160] sm:$0xff] }
  0x67   : > { %v351_v31 = vpack.c.bf16 %v319_v7, %v315_v18  ;;  %v336_v37 = vmul.f32 %v3802_v43, %v4059_v25  ;;  %v354_v25 = vpack.c.bf16 %v322_v8, %v318_v4  ;;  %v356_v54 = vpack.c.bf16 %v328_v10, %v324_v63  ;;  %v3618_v43 = vld [vmem:[%s5064_s2 + $0x118] sm:$0xff]  ;;  %v3671_v1 = vld [vmem:[%s5064_s2 + $0x180] sm:$0xff]  ;;  %v3672_v15 = vld [vmem:[%s5064_s2 + $0x188] sm:$0xff] }
  0x68   : > { %445 = vmatpush1.bf16.msra.mxu0 %v347_v11  ;;  %v326_v17 = vmul.f32 %v3804_v55, %v4068_v30  ;;  %v330_v21 = vmul.f32 %v3804_v55, %v4092_v41  ;;  %v338_v33 = vmul.f32 %v3804_v55, %v4140_v2  ;;  %v3772_v62 = vld [vmem:[%s5063_s1 + $0x18] sm:$0xff]   ;;  %v3673_v18 = vld [vmem:[%s5064_s2 + $0x190] sm:$0xff]  ;;  %v3676_v4 = vld [vmem:[%s5064_s2 + $0x1a8] sm:$0xff] }
  0x69   : > { %1524 = vperm.xlu0 %3767, %v3589_v47   ;;  %1529 = vperm.xlu1 %3768, %v3590_v52   ;;  %v3808_v12 = vpop.eup %3807  ;;  %v360_v27 = vpack.c.bf16 %v336_v37, %v332_v14  ;;  %v3770_v47 = vld [vmem:[%s5063_s1 + $0x8] sm:$0xff]   ;;  %v3622_v52 = vld [vmem:[%s5064_s2 + $0x138] sm:$0xff]  ;;  %v3677_v8 = vld [vmem:[%s5064_s2 + $0x1b0] sm:$0xff] }
  0x6a   : > { %v309_v20 = vmul.f32 %v3808_v12, %v4108_v49  ;;  %v313_v23 = vmul.f32 %v3808_v12, %v4111_v50  ;;  %v317_v24 = vmul.f32 %v3808_v12, %v4114_v51  ;;  %v321_v13 = vmul.f32 %v3808_v12, %v4125_v57  ;;  %446 = vmatprep.subr.bf16.mxu0 %v352_v9  ;;  %v3594_v57 = vld [vmem:[%s5064_s2 + $0xf8] sm:$0xff]  ;;  %v3675_v9 = vld [vmem:[%s5064_s2 + $0x1a0] sm:$0xff]  ;;  %v3700_v14 = vld [vmem:[%s5064_s2 + $0x1c8] sm:$0xff] }
  0x6b   : > { %v355_v49 = vpack.c.bf16 %v327_v36, %v323_v32  ;;  %v331_v50 = vmul.f32 %v3806_v61, %v4143_v3  ;;  %v335_v51 = vmul.f32 %v3806_v61, %v4159_v22  ;;  %v325_v30 = vmul.f32 %v3808_v12, %v4154_v16  ;;  %v3616_v16 = vld [vmem:[%s5064_s2 + $0x108] sm:$0xff]  ;;  %v3649_v61 = vld [vmem:[%s5064_s2 + $0x170] sm:$0xff]  ;;  %v3650_v63 = vld [vmem:[%s5064_s2 + $0x178] sm:$0xff] }
  0x6c   : > { %v349_v26 = vpack.c.bf16 %v313_v23, %v309_v20  ;;  %447 = vmatpush1.bf16.msra.mxu0 %v351_v31  ;;  %v353_v28 = vpack.c.bf16 %v321_v13, %v317_v24  ;;  %v329_v41 = vmul.f32 %v3808_v12, %v4169_v35  ;;  %v358_v3 = vpack.c.bf16 %v330_v21, %v326_v17  ;;  %v3674_v7 = vld [vmem:[%s5064_s2 + $0x198] sm:$0xff]  ;;  %v3699_v11 = vld [vmem:[%s5064_s2 + $0x1c0] sm:$0xff]  ;;  %v3704_v36 = vld [vmem:[%s5064_s2 + $0x1e8] sm:$0xff] }
  0x6d   : > { %1534 = vperm.xlu0 %3767, %v3591_v60   ;;  %1539 = vperm.xlu1 %3768, %v3592_v19   ;;  %v334_v22 = vmul.f32 %v3804_v55, %v4117_v53  ;;  %v359_v34 = vpack.c.bf16 %v335_v51, %v331_v50  ;;  %v333_v38 = vmul.f32 %v3808_v12, %v4179_v48  ;;  %v3617_v53 = vld [vmem:[%s5064_s2 + $0x110] sm:$0xff]  ;;  %v3643_v55 = vld [vmem:[%s5064_s2 + $0x140] sm:$0xff]  ;;  %v3648_v60 = vld [vmem:[%s5064_s2 + $0x168] sm:$0xff] }
  0x6e   : > { %518 = vmatpush1.bf16.msra.mxu1 %v349_v26  ;;  %448 = vmatprep.subr.bf16.mxu0 %v356_v54  ;;  %v357_v35 = vpack.c.bf16 %v329_v41, %v325_v30  ;;  %v337_v39 = vmul.f32 %v3808_v12, %v4185_v58  ;;  %v3619_v58 = vld [vmem:[%s5064_s2 + $0x120] sm:$0xff]  ;;  %v3678_v10 = vld [vmem:[%s5064_s2 + $0x1b8] sm:$0xff]  ;;  %v3701_v12 = vld [vmem:[%s5064_s2 + $0x1d0] sm:$0xff] }
  0x6f   : > { %519 = vmatprep.subr.bf16.mxu1 %v354_v25  ;;  %v362_v2 = vpack.c.bf16 %v338_v33, %v334_v22  ;;  %v3702_v31 = vld [vmem:[%s5064_s2 + $0x1d8] sm:$0xff]  ;;  %v3703_v32 = vld [vmem:[%s5064_s2 + $0x1e0] sm:$0xff]  ;;  %v3705_v37 = vld [vmem:[%s5064_s2 + $0x1f0] sm:$0xff] }
  0x70   : > { %449 = vmatpush1.bf16.msra.mxu0 %v355_v49  ;;  %v361_v48 = vpack.c.bf16 %v337_v39, %v333_v38  ;;  %v3706_v19 = vld [vmem:[%s5064_s2 + $0x1f8] sm:$0xff] }
  0x71   : > { %1544 = vperm.xlu0 %3767, %v3593_v42   ;;  %1549 = vperm.xlu1 %3768, %v3594_v57  }
  0x72   : > { %520 = vmatpush1.bf16.msra.mxu1 %v353_v28  ;;  %450 = vmatprep.subr.bf16.mxu0 %v360_v27 }
  0x73   : > { %521 = vmatprep.subr.bf16.mxu1 %v358_v3 }
  0x74   : > { %451 = vmatpush1.bf16.msra.mxu0 %v359_v34 }
  0x75   : > { %1894 = vperm.xlu0 %3767, %v3615_v29   ;;  %1899 = vperm.xlu1 %3768, %v3616_v16  }
  0x76   : > { %522 = vmatpush1.bf16.msra.mxu1 %v357_v35 }
  0x77   : > { %523 = vmatprep.subr.bf16.mxu1 %v362_v2  ;;  %3515 = vmatmul.mubr.msk.bf16.vlgmr.msra.gmra.mrb[0].mxu0 %vm431_vm0, %v3769_v40 }
  0x78   : > { %486 = vmatprep.mubr.bf16.mxu0 %v3879_v0 }
  0x79   : > { %1904 = vperm.xlu0 %3767, %v3617_v53   ;;  %1909 = vperm.xlu1 %3768, %v3618_v43  }
  0x7a   : > { %524 = vmatpush1.bf16.msra.mxu1 %v361_v48 }
  0x7d   : > { %1914 = vperm.xlu0 %3767, %v3619_v58   ;;  %1919 = vperm.xlu1 %3768, %v3620_v44  }
  0x7e   : > { %3519 = vmatmul.mubr.msk.bf16.vlgmr.msra.gmra.mrb[0].mxu1 %vm431_vm0, %v3769_v40 }
  0x7f   : > { %559 = vmatprep.mubr.bf16.mxu1 %v3879_v0  ;;  %3516 = vmatmul.mubr.msk.bf16.gmra.mrb[4].mxu0 %vm431_vm0, %v3770_v47 }
  0x80   : > { %496 = vmatprep.mubr.bf16.mxu0 %v3879_v0 }
  0x81   : > { %1924 = vperm.xlu0 %3767, %v3621_v45   ;;  %1929 = vperm.xlu1 %3768, %v3622_v52  }
  0x85   : > { %2274 = vperm.xlu0 %3767, %v3643_v55   ;;  %2279 = vperm.xlu1 %3768, %v3644_v56  }
  0x86   : > { %3520 = vmatmul.mubr.msk.bf16.gmra.mrb[4].mxu1 %vm431_vm0, %v3770_v47 }
  0x87   : > { %569 = vmatprep.mubr.bf16.mxu1 %v3879_v0  ;;  %3517 = vmatmul.mubr.msk.bf16.gmra.mrb[8].mxu0 %vm431_vm0, %v3771_v59 }
  0x88   : > { %506 = vmatprep.mubr.bf16.mxu0 %v3879_v0 }
  0x89   : > { %2284 = vperm.xlu0 %3767, %v3645_v46   ;;  %2289 = vperm.xlu1 %3768, %v3646_v5  }
  0x8d   : > { %2294 = vperm.xlu0 %3767, %v3647_v6   ;;  %2299 = vperm.xlu1 %3768, %v3648_v60  }
  0x8e   : > { %3521 = vmatmul.mubr.msk.bf16.gmra.mrb[8].mxu1 %vm431_vm0, %v3771_v59 }
  0x8f   : > { %579 = vmatprep.mubr.bf16.mxu1 %v3879_v0  ;;  %3518 = vmatmul.mubr.msk.bf16.gmra.mrb[12].mxu0 %vm431_vm0, %v3772_v62 }
  0x90   : > { %856 = vmatprep.mubr.bf16.mxu0 %v3879_v0 }
  0x91   : > { %2304 = vperm.xlu0 %3767, %v3649_v61   ;;  %2309 = vperm.xlu1 %3768, %v3650_v63  }
  0x95   : > { %2654 = vperm.xlu0 %3767, %v3671_v1   ;;  %2659 = vperm.xlu1 %3768, %v3672_v15  }
  0x96   : > { %3522 = vmatmul.mubr.msk.bf16.gmra.mrb[12].mxu1 %vm431_vm0, %v3772_v62 }
  0x97   : > { %929 = vmatprep.mubr.bf16.mxu1 %v3879_v0 }
  0x99   : > { %2664 = vperm.xlu0 %3767, %v3673_v18   ;;  %2669 = vperm.xlu1 %3768, %v3674_v7  }
  0x9d   : > { %2674 = vperm.xlu0 %3767, %v3675_v9   ;;  %2679 = vperm.xlu1 %3768, %v3676_v4  }
  0xa1   : > { %2684 = vperm.xlu0 %3767, %v3677_v8   ;;  %2689 = vperm.xlu1 %3768, %v3678_v10  }
  0xa5   : > { %3034 = vperm.xlu0 %3767, %v3699_v11   ;;  %3039 = vperm.xlu1 %3768, %v3700_v14  }
  0xa9   : > { %3044 = vperm.xlu0 %3767, %v3701_v12   ;;  %3049 = vperm.xlu1 %3768, %v3702_v31  }
  0xad   : > { %3054 = vperm.xlu0 %3767, %v3703_v32   ;;  %3059 = vperm.xlu1 %3768, %v3704_v36  }
  0xb1   : > { %3064 = vperm.xlu0 %3767, %v3705_v37   ;;  %3069 = vperm.xlu1 %3768, %v3706_v19  }
  0xb4   : > { %v374_v20 = vpop.permute.xlu0 %373  ;;  %v384_v41 = vpop.permute.xlu1 %383 }
  0xb8   : > { %v379_v42 = vpop.permute.xlu0 %378  ;;  %v389_v6 = vpop.permute.xlu1 %388 }
 0x14a   : > { %v478_v23 = vpop.f32.mrb[0].mxu0 }
 0x14b   : > { %v479_v24 = vadd.f32 %v478_v23, %v374_v20  ;;  %v480_v13 = vpop.f32.mrb[1].mxu0 }
 0x14c   : > { %v481_v25 = vadd.f32 %v480_v13, %v374_v20  ;;  %v482_v54 = vpop.f32.mrb[2].mxu0 }
 0x14d   : > { %vm590_vm1 = vcmp.ge.f32.partialorder %v479_v24, 0.0  ;;  %v622_v17 = vmul.f32 0.2, %v479_v24  ;;  %v483_v21 = vadd.f32 %v482_v54, %v379_v42  ;;  %v484_v26 = vpop.f32.mrb[3].mxu0 }
 0x14e   : > { %vm591_vm2 = vcmp.ge.f32.partialorder %v481_v25, 0.0  ;;  %v623_v27 = vmul.f32 0.2, %v481_v25  ;;  %v485_v50 = vadd.f32 %v484_v26, %v379_v42 }
 0x14f   : > { %v654_v51 = vsel %vm590_vm1, %v479_v24, %v622_v17  ;;  %vm594_vm3 = vcmp.ge.f32.partialorder %v483_v21, 0.0  ;;  %v626_v30 = vmul.f32 0.2, %v483_v21 }
 0x150   : > { %v4406_v29 = vmul.f32 1.4142135, %v654_v51  ;;  %v655_v3 = vsel %vm591_vm2, %v481_v25, %v623_v27  ;;  %vm595_vm5 = vcmp.ge.f32.partialorder %v485_v50, 0.0  ;;  %v627_v43 = vmul.f32 0.2, %v485_v50 }
 0x151   : > { %v551_v49 = vpop.f32.mrb[0].mxu1  ;;  %v658_v16 = vsel %vm594_vm3, %v483_v21, %v626_v30  ;;  %v687_v45 = vmul.f32 1.4142135, %v655_v3 }
 0x152   : > { %v552_v57 = vadd.f32 %v551_v49, %v374_v20  ;;  %v553_v28 = vpop.f32.mrb[1].mxu1  ;;  %v4408_v39 = vmul.f32 1.4142135, %v658_v16  ;;  %v488_v2 = vpop.f32.mrb[4].mxu0  ;;  %v659_v59 = vsel %vm595_vm5, %v485_v50, %v627_v43 }
 0x153   : > { %v554_v22 = vadd.f32 %v553_v28, %v374_v20  ;;  %v555_v33 = vpop.f32.mrb[2].mxu1  ;;  %v489_v58 = vadd.f32 %v488_v2, %v384_v41  ;;  %v490_v44 = vpop.f32.mrb[5].mxu0  ;;  %v691_v8 = vmul.f32 1.4142135, %v659_v59 }
 0x154   : > { %vm592_vm4 = vcmp.ge.f32.partialorder %v552_v57, 0.0  ;;  %v624_v34 = vmul.f32 0.2, %v552_v57  ;;  %v557_v35 = vpop.f32.mrb[3].mxu1  ;;  %v556_v53 = vadd.f32 %v555_v33, %v379_v42  ;;  %v727_v52 = vpack.c.bf16 %v4408_v39, %v4406_v29  ;;  %v492_v55 = vpop.f32.mrb[6].mxu0 }
 0x155   : > { %vm593_vm6 = vcmp.ge.f32.partialorder %v554_v22, 0.0  ;;  %v625_v38 = vmul.f32 0.2, %v554_v22  ;;  %v558_v48 = vadd.f32 %v557_v35, %v379_v42  ;;  %v494_v5 = vpop.f32.mrb[7].mxu0  ;;  %vm598_vm9 = vcmp.ge.f32.partialorder %v489_v58, 0.0  ;;  %v394_v33 = vpop.permute.xlu0 %393 }
 0x156   : > { %v656_v40 = vsel %vm592_vm4, %v552_v57, %v624_v34  ;;  %vm596_vm7 = vcmp.ge.f32.partialorder %v556_v53, 0.0  ;;  %v628_v46 = vmul.f32 0.2, %v556_v53  ;;  %v491_v63 = vadd.f32 %v490_v44, %v384_v41 }
 0x157   : > { %v657_v47 = vsel %vm593_vm6, %v554_v22, %v625_v38  ;;  %v4412_v56 = vmul.f32 1.4142135, %v656_v40  ;;  %vm597_vm8 = vcmp.ge.f32.partialorder %v558_v48, 0.0  ;;  %v629_v61 = vmul.f32 0.2, %v558_v48 }
 0x158   : > { %v4415_v60 = vmul.f32 1.4142135, %v657_v47  ;;  %v660_v1 = vsel %vm596_vm7, %v556_v53, %v628_v46  ;;  %v630_v15 = vmul.f32 0.2, %v489_v58  ;;  %v493_v9 = vadd.f32 %v492_v55, %v389_v6 }
 0x159   : > { %v561_v62 = vpop.f32.mrb[4].mxu1  ;;  %v692_v4 = vmul.f32 1.4142135, %v660_v1  ;;  %v661_v10 = vsel %vm597_vm8, %v558_v48, %v629_v61  ;;  %vm599_vm11 = vcmp.ge.f32.partialorder %v491_v63, 0.0  ;;  %v631_v37 = vmul.f32 0.2, %v491_v63 }
 0x15a   : > { %v562_v18 = vadd.f32 %v561_v62, %v384_v41  ;;  %v563_v7 = vpop.f32.mrb[5].mxu1  ;;  %v662_v14 = vsel %vm598_vm9, %v489_v58, %v630_v15  ;;  %v693_v36 = vmul.f32 1.4142135, %v661_v10  ;;  %v498_v20 = vpop.f32.mrb[8].mxu0  ;;  %vm602_vm12 = vcmp.ge.f32.partialorder %v493_v9, 0.0 }
 0x15b   : > { %v565_v11 = vpop.f32.mrb[6].mxu1  ;;  %v729_v32 = vpack.c.bf16 %v692_v4, %v4412_v56  ;;  %v564_v19 = vadd.f32 %v563_v7, %v384_v41  ;;  %v4418_v23 = vmul.f32 1.4142135, %v662_v14  ;;  %v634_v13 = vmul.f32 0.2, %v493_v9  ;;  %v500_v42 = vpop.f32.mrb[9].mxu0 }
 0x15c   : > { %vm600_vm10 = vcmp.ge.f32.partialorder %v562_v18, 0.0  ;;  %v632_v12 = vmul.f32 0.2, %v562_v18  ;;  %v567_v31 = vpop.f32.mrb[7].mxu1  ;;  %v566_v17 = vadd.f32 %v565_v11, %v389_v6  ;;  %v502_v21 = vpop.f32.mrb[10].mxu0  ;;  %v495_v49 = vadd.f32 %v494_v5, %v389_v6 }
 0x15d   : > { %vm601_vm13 = vcmp.ge.f32.partialorder %v564_v19, 0.0  ;;  %v633_v54 = vmul.f32 0.2, %v564_v19  ;;  %v666_v26 = vsel %vm602_vm12, %v493_v9, %v634_v13  ;;  %v568_v27 = vadd.f32 %v567_v31, %v389_v6  ;;  %v504_v51 = vpop.f32.mrb[11].mxu0 }
 0x15e   : > { %v664_v24 = vsel %vm600_vm10, %v562_v18, %v632_v12  ;;  %v728_v50 = vpack.c.bf16 %v691_v8, %v687_v45  ;;  %v663_v57 = vsel %vm599_vm11, %v491_v63, %v631_v37  ;;  %v4423_v28 = vmul.f32 1.4142135, %v666_v26 }
 0x15f   : > { %v4420_v25 = vmul.f32 1.4142135, %v664_v24  ;;  %vm604_vm14 = vcmp.ge.f32.partialorder %v566_v17, 0.0  ;;  %v636_v30 = vmul.f32 0.2, %v566_v17  ;;  %v665_v3 = vsel %vm601_vm13, %v564_v19, %v633_v54  ;;  %v404_v19 = vpop.permute.xlu0 %403 }
 0x160   : > { %vm603_vm15 = vcmp.ge.f32.partialorder %v495_v49, 0.0  ;;  %v635_v22 = vmul.f32 0.2, %v495_v49  ;;  %vm605_vm1 = vcmp.ge.f32.partialorder %v568_v27, 0.0  ;;  %824 = vmatprep.subr.bf16.mxu0 %v728_v50  ;;  %v731_v34 = vpack.c.bf16 %v4423_v28, %v4418_v23 }
 0x161   : > { %v571_v41 = vpop.f32.mrb[8].mxu1  ;;  %v668_v16 = vsel %vm604_vm14, %v566_v17, %v636_v30  ;;  %v637_v35 = vmul.f32 0.2, %v568_v27  ;;  %v730_v38 = vpack.c.bf16 %v693_v36, %v4415_v60  ;;  %825 = vmatpush1.bf16.msra.mxu0 %v727_v52  ;;  %v499_v43 = vadd.f32 %v498_v20, %v394_v33  ;;  %v399_v52 = vpop.permute.xlu1 %398 }
 0x162   : > { %v573_v53 = vpop.f32.mrb[9].mxu1  ;;  %v4431_v2 = vmul.f32 1.4142135, %v668_v16  ;;  %v667_v40 = vsel %vm603_vm15, %v495_v49, %v635_v22  ;;  %v572_v48 = vadd.f32 %v571_v41, %v394_v33  ;;  %v501_v47 = vadd.f32 %v500_v42, %v394_v33  ;;  %v508_v46 = vpop.f32.mrb[12].mxu0 }
 0x163   : > { %v575_v58 = vpop.f32.mrb[10].mxu1  ;;  %v699_v44 = vmul.f32 1.4142135, %v667_v40  ;;  %v669_v45 = vsel %vm605_vm1, %v568_v27, %v637_v35  ;;  %897 = vmatprep.subr.bf16.mxu1 %v730_v38  ;;  %v574_v55 = vadd.f32 %v573_v53, %v394_v33  ;;  %vm606_vm2 = vcmp.ge.f32.partialorder %v499_v43, 0.0  ;;  %v510_v39 = vpop.f32.mrb[13].mxu0 }
 0x164   : > { %v577_v56 = vpop.f32.mrb[11].mxu1  ;;  %v733_v59 = vpack.c.bf16 %v4431_v2, %v4420_v25  ;;  %v701_v5 = vmul.f32 1.4142135, %v669_v45  ;;  %898 = vmatpush1.bf16.msra.mxu1 %v729_v32  ;;  %v638_v29 = vmul.f32 0.2, %v499_v43  ;;  %vm608_vm3 = vcmp.ge.f32.partialorder %v572_v48, 0.0 }
 0x165   : > { %v640_v6 = vmul.f32 0.2, %v572_v48  ;;  %vm607_vm4 = vcmp.ge.f32.partialorder %v501_v47, 0.0  ;;  %v639_v60 = vmul.f32 0.2, %v501_v47  ;;  %vm609_vm5 = vcmp.ge.f32.partialorder %v574_v55, 0.0  ;;  %v409_v53 = vpop.permute.xlu1 %408 }
 0x166   : > { %v670_v61 = vsel %vm606_vm2, %v499_v43, %v638_v29  ;;  %v641_v62 = vmul.f32 0.2, %v574_v55  ;;  %v503_v63 = vadd.f32 %v502_v21, %v399_v52  ;;  %v512_v1 = vpop.f32.mrb[14].mxu0  ;;  %v695_v15 = vmul.f32 1.4142135, %v663_v57 }
 0x167   : > { %v697_v18 = vmul.f32 1.4142135, %v665_v3  ;;  %v672_v7 = vsel %vm608_vm3, %v572_v48, %v640_v6  ;;  %v576_v9 = vadd.f32 %v575_v58, %v399_v52  ;;  %v514_v8 = vpop.f32.mrb[15].mxu0  ;;  %v4435_v10 = vmul.f32 1.4142135, %v670_v61 }
 0x168   : > { %v4437_v11 = vmul.f32 1.4142135, %v672_v7  ;;  %v671_v14 = vsel %vm607_vm4, %v501_v47, %v639_v60  ;;  %vm610_vm6 = vcmp.ge.f32.partialorder %v503_v63, 0.0  ;;  %v673_v31 = vsel %vm609_vm5, %v574_v55, %v641_v62 }
 0x169   : > { %v581_v4 = vpop.f32.mrb[12].mxu1  ;;  %v642_v32 = vmul.f32 0.2, %v503_v63  ;;  %vm612_vm7 = vcmp.ge.f32.partialorder %v576_v9, 0.0  ;;  %v505_v36 = vadd.f32 %v504_v51, %v399_v52  ;;  %v644_v20 = vmul.f32 0.2, %v576_v9 }
 0x16a   : > { %v583_v12 = vpop.f32.mrb[13].mxu1  ;;  %v578_v24 = vadd.f32 %v577_v56, %v399_v52  ;;  %v732_v13 = vpack.c.bf16 %v699_v44, %v695_v15  ;;  %v734_v42 = vpack.c.bf16 %v701_v5, %v697_v18  ;;  %v509_v21 = vadd.f32 %v508_v46, %v404_v19 }
 0x16b   : > { %v585_v37 = vpop.f32.mrb[14].mxu1  ;;  %v674_v54 = vsel %vm610_vm6, %v503_v63, %v642_v32  ;;  %vm611_vm8 = vcmp.ge.f32.partialorder %v505_v36, 0.0  ;;  %v643_v17 = vmul.f32 0.2, %v505_v36  ;;  %v676_v49 = vsel %vm612_vm7, %v576_v9, %v644_v20  ;;  %v3774_v32 = vld [vmem:[%s5063_s1 + $0x28] sm:$0xff]  }
 0x16c   : > { %v587_v25 = vpop.f32.mrb[15].mxu1  ;;  %v706_v26 = vmul.f32 1.4142135, %v674_v54  ;;  %vm613_vm9 = vcmp.ge.f32.partialorder %v578_v24, 0.0  ;;  %v645_v27 = vmul.f32 0.2, %v578_v24  ;;  %826 = vmatprep.subr.bf16.mxu0 %v732_v13  ;;  %899 = vmatprep.subr.bf16.mxu1 %v734_v42  ;;  %v582_v22 = vadd.f32 %v581_v4, %v404_v19  ;;  %v760_v42 = vpop.permute.xlu1 %759 }
 0x16d   : > { %v708_v50 = vmul.f32 1.4142135, %v676_v49  ;;  %v675_v57 = vsel %vm611_vm8, %v505_v36, %v643_v17  ;;  %827 = vmatpush1.bf16.msra.mxu0 %v731_v34  ;;  %900 = vmatpush1.bf16.msra.mxu1 %v733_v59  ;;  %vm614_vm10 = vcmp.ge.f32.partialorder %v509_v21, 0.0  ;;  %v646_v51 = vmul.f32 0.2, %v509_v21  ;;  %v3775_v36 = vld [vmem:[%s5063_s1 + $0x30] sm:$0xff]  }
 0x16e   : > { %v703_v30 = vmul.f32 1.4142135, %v671_v14  ;;  %v705_v41 = vmul.f32 1.4142135, %v673_v31  ;;  %v735_v3 = vpack.c.bf16 %v706_v26, %v4435_v10  ;;  %v677_v16 = vsel %vm613_vm9, %v578_v24, %v645_v27 }
 0x16f   : > { %v737_v33 = vpack.c.bf16 %v708_v50, %v4437_v11  ;;  %v678_v35 = vsel %vm614_vm10, %v509_v21, %v646_v51  ;;  %v511_v38 = vadd.f32 %v510_v39, %v404_v19  ;;  %v707_v2 = vmul.f32 1.4142135, %v675_v57 }
 0x170   : > { %vm616_vm11 = vcmp.ge.f32.partialorder %v582_v22, 0.0  ;;  %v648_v40 = vmul.f32 0.2, %v582_v22  ;;  %v584_v43 = vadd.f32 %v583_v12, %v404_v19  ;;  %v513_v28 = vadd.f32 %v512_v1, %v409_v53  ;;  %v3773_v12 = vld [vmem:[%s5063_s1 + $0x20] sm:$0xff]   ;;  %v755_v19 = vpop.permute.xlu0 %754 }
 0x171   : > { %vm615_vm12 = vcmp.ge.f32.partialorder %v511_v38, 0.0  ;;  %v647_v23 = vmul.f32 0.2, %v511_v38  ;;  %v586_v34 = vadd.f32 %v585_v37, %v409_v53  ;;  %v709_v48 = vmul.f32 1.4142135, %v677_v16  ;;  %v3776_v37 = vld [vmem:[%s5063_s1 + $0x38] sm:$0xff]  }
 0x172   : > { %v710_v58 = vmul.f32 1.4142135, %v678_v35  ;;  %v680_v44 = vsel %vm616_vm11, %v582_v22, %v648_v40  ;;  %v515_v45 = vadd.f32 %v514_v8, %v409_v53  ;;  %v649_v55 = vmul.f32 0.2, %v584_v43 }
 0x173   : > { %v679_v47 = vsel %vm615_vm12, %v511_v38, %v647_v23  ;;  %vm618_vm13 = vcmp.ge.f32.partialorder %v513_v28, 0.0  ;;  %v650_v56 = vmul.f32 0.2, %v513_v28  ;;  %v712_v46 = vmul.f32 1.4142135, %v680_v44 }
 0x174   : > { %vm617_vm14 = vcmp.ge.f32.partialorder %v584_v43, 0.0  ;;  %vm620_vm15 = vcmp.ge.f32.partialorder %v586_v34, 0.0  ;;  %v652_v59 = vmul.f32 0.2, %v586_v34  ;;  %v711_v5 = vmul.f32 1.4142135, %v679_v47 }
 0x175   : > { %v682_v29 = vsel %vm618_vm13, %v513_v28, %v650_v56  ;;  %vm619_vm1 = vcmp.ge.f32.partialorder %v515_v45, 0.0  ;;  %v651_v39 = vmul.f32 0.2, %v515_v45  ;;  %v588_v60 = vadd.f32 %v587_v25, %v409_v53 }
 0x176   : > { %v714_v52 = vmul.f32 1.4142135, %v682_v29  ;;  %v684_v6 = vsel %vm620_vm15, %v586_v34, %v652_v59  ;;  %v736_v61 = vpack.c.bf16 %v707_v2, %v703_v30  ;;  %v681_v62 = vsel %vm617_vm14, %v584_v43, %v649_v55  ;;  %v765_v55 = vpop.permute.xlu0 %764 }
 0x177   : > { %v716_v63 = vmul.f32 1.4142135, %v684_v6  ;;  %v683_v1 = vsel %vm619_vm1, %v515_v45, %v651_v39  ;;  %v738_v15 = vpack.c.bf16 %v709_v48, %v705_v41  ;;  %vm621_vm2 = vcmp.ge.f32.partialorder %v588_v60, 0.0 }
 0x178   : > { %v739_v18 = vpack.c.bf16 %v714_v52, %v710_v58  ;;  %v715_v7 = vmul.f32 1.4142135, %v683_v1  ;;  %v653_v9 = vmul.f32 0.2, %v588_v60  ;;  %828 = vmatprep.subr.bf16.mxu0 %v736_v61  ;;  %v713_v11 = vmul.f32 1.4142135, %v681_v62 }
 0x179   : > { %v741_v4 = vpack.c.bf16 %v716_v63, %v712_v46  ;;  %901 = vmatprep.subr.bf16.mxu1 %v738_v15  ;;  %829 = vmatpush1.bf16.msra.mxu0 %v735_v3 }
 0x17a   : > { %v685_v8 = vsel %vm621_vm2, %v588_v60, %v653_v9  ;;  %902 = vmatpush1.bf16.msra.mxu1 %v737_v33  ;;  %v740_v10 = vpack.c.bf16 %v715_v7, %v711_v5 }
 0x17b   : > { %v717_v14 = vmul.f32 1.4142135, %v685_v8 }
 0x17c   : > { %830 = vmatprep.subr.bf16.mxu0 %v740_v10 }
 0x17d   : > { %v742_v31 = vpack.c.bf16 %v717_v14, %v713_v11  ;;  %831 = vmatpush1.bf16.msra.mxu0 %v739_v18  ;;  %v770_v11 = vpop.permute.xlu1 %769 }
 0x17f   : > { %903 = vmatprep.subr.bf16.mxu1 %v742_v31 }
 0x180   : > { %904 = vmatpush1.bf16.msra.mxu1 %v741_v4  ;;  %3543 = vmatmul.mubr.msk.bf16.vlgmr.msra.gmra.mrb[16].mxu0 %vm431_vm0, %v3773_v12 }
 0x181   : > { %866 = vmatprep.mubr.bf16.mxu0 %v3879_v0 }
 0x183   : > { %3547 = vmatmul.mubr.msk.bf16.vlgmr.msra.gmra.mrb[16].mxu1 %vm431_vm0, %v3773_v12 }
 0x184   : > { %939 = vmatprep.mubr.bf16.mxu1 %v3879_v0 }
 0x188   : > { %3544 = vmatmul.mubr.msk.bf16.gmra.mrb[20].mxu0 %vm431_vm0, %v3774_v32 }
 0x189   : > { %876 = vmatprep.mubr.bf16.mxu0 %v3879_v0 }
 0x18b   : > { %3548 = vmatmul.mubr.msk.bf16.gmra.mrb[20].mxu1 %vm431_vm0, %v3774_v32 }
 0x18c   : > { %949 = vmatprep.mubr.bf16.mxu1 %v3879_v0 }
 0x190   : > { %3545 = vmatmul.mubr.msk.bf16.gmra.mrb[24].mxu0 %vm431_vm0, %v3775_v36 }
 0x191   : > { %886 = vmatprep.mubr.bf16.mxu0 %v3879_v0 }
 0x193   : > { %3549 = vmatmul.mubr.msk.bf16.gmra.mrb[24].mxu1 %vm431_vm0, %v3775_v36 }
 0x194   : > { %959 = vmatprep.mubr.bf16.mxu1 %v3879_v0 }
 0x198   : > { %3546 = vmatmul.mubr.msk.bf16.gmra.mrb[28].mxu0 %vm431_vm0, %v3776_v37 }
 0x199   : > { %1236 = vmatprep.mubr.bf16.mxu0 %v3879_v0 }
 0x19b   : > { %3550 = vmatmul.mubr.msk.bf16.gmra.mrb[28].mxu1 %vm431_vm0, %v3776_v37 }
 0x19c   : > { %1309 = vmatprep.mubr.bf16.mxu1 %v3879_v0 }
 0x253   : > { %v858_v20 = vpop.f32.mrb[16].mxu0 }
 0x254   : > { %v859_v24 = vadd.f32 %v858_v20, %v755_v19  ;;  %v860_v13 = vpop.f32.mrb[17].mxu0 }
 0x255   : > { %v861_v25 = vadd.f32 %v860_v13, %v755_v19  ;;  %v862_v54 = vpop.f32.mrb[18].mxu0 }
 0x256   : > { %vm970_vm3 = vcmp.ge.f32.partialorder %v859_v24, 0.0  ;;  %v1002_v17 = vmul.f32 0.2, %v859_v24  ;;  %v931_v21 = vpop.f32.mrb[16].mxu1  ;;  %v863_v26 = vadd.f32 %v862_v54, %v760_v42  ;;  %v864_v49 = vpop.f32.mrb[19].mxu0 }
 0x257   : > { %v932_v27 = vadd.f32 %v931_v21, %v755_v19  ;;  %vm971_vm4 = vcmp.ge.f32.partialorder %v861_v25, 0.0  ;;  %v1003_v50 = vmul.f32 0.2, %v861_v25  ;;  %v933_v57 = vpop.f32.mrb[17].mxu1  ;;  %v865_v51 = vadd.f32 %v864_v49, %v760_v42 }
 0x258   : > { %v1034_v30 = vsel %vm970_vm3, %v859_v24, %v1002_v17  ;;  %v934_v41 = vadd.f32 %v933_v57, %v755_v19  ;;  %vm974_vm5 = vcmp.ge.f32.partialorder %v863_v26, 0.0  ;;  %v1006_v3 = vmul.f32 0.2, %v863_v26  ;;  %v935_v22 = vpop.f32.mrb[18].mxu1 }
 0x259   : > { %v4472_v33 = vmul.f32 1.4142135, %v1034_v30  ;;  %vm972_vm6 = vcmp.ge.f32.partialorder %v932_v27, 0.0  ;;  %v1004_v16 = vmul.f32 0.2, %v932_v27  ;;  %v1035_v35 = vsel %vm971_vm4, %v861_v25, %v1003_v50  ;;  %v937_v38 = vpop.f32.mrb[19].mxu1 }
 0x25a   : > { %v4474_v53 = vmul.f32 1.4142135, %v1035_v35  ;;  %vm973_vm7 = vcmp.ge.f32.partialorder %v934_v41, 0.0  ;;  %v1005_v2 = vmul.f32 0.2, %v934_v41  ;;  %v1038_v40 = vsel %vm974_vm5, %v863_v26, %v1006_v3  ;;  %v775_v35 = vpop.permute.xlu0 %774 }
 0x25b   : > { %v1036_v43 = vsel %vm972_vm6, %v932_v27, %v1004_v16  ;;  %v4476_v23 = vmul.f32 1.4142135, %v1038_v40  ;;  %v936_v28 = vadd.f32 %v935_v22, %v760_v42  ;;  %vm975_vm8 = vcmp.ge.f32.partialorder %v865_v51, 0.0  ;;  %v868_v34 = vpop.f32.mrb[20].mxu0 }
 0x25c   : > { %v4478_v48 = vmul.f32 1.4142135, %v1036_v43  ;;  %v1037_v58 = vsel %vm973_vm7, %v934_v41, %v1005_v2  ;;  %v1007_v44 = vmul.f32 0.2, %v865_v51  ;;  %v938_v45 = vadd.f32 %v937_v38, %v760_v42  ;;  %v870_v47 = vpop.f32.mrb[21].mxu0 }
 0x25d   : > { %v4480_v56 = vmul.f32 1.4142135, %v1037_v58  ;;  %v1107_v46 = vpack.c.bf16 %v4476_v23, %v4472_v33  ;;  %vm976_vm9 = vcmp.ge.f32.partialorder %v936_v28, 0.0  ;;  %v1008_v59 = vmul.f32 0.2, %v936_v28  ;;  %v872_v5 = vpop.f32.mrb[22].mxu0 }
 0x25e   : > { %v1039_v29 = vsel %vm975_vm8, %v865_v51, %v1007_v44  ;;  %vm977_vm10 = vcmp.ge.f32.partialorder %v938_v45, 0.0  ;;  %v1009_v39 = vmul.f32 0.2, %v938_v45  ;;  %v869_v52 = vadd.f32 %v868_v34, %v765_v55  ;;  %v941_v6 = vpop.f32.mrb[20].mxu1  ;;  %v874_v60 = vpop.f32.mrb[23].mxu0 }
 0x25f   : > { %v1040_v61 = vsel %vm976_vm9, %v936_v28, %v1008_v59  ;;  %v1071_v62 = vmul.f32 1.4142135, %v1039_v29  ;;  %v942_v63 = vadd.f32 %v941_v6, %v765_v55  ;;  %v871_v1 = vadd.f32 %v870_v47, %v765_v55  ;;  %v943_v15 = vpop.f32.mrb[21].mxu1  ;;  %v780_v29 = vpop.permute.xlu1 %779 }
 0x260   : > { %v1072_v18 = vmul.f32 1.4142135, %v1040_v61  ;;  %v1041_v7 = vsel %vm977_vm10, %v938_v45, %v1009_v39  ;;  %vm978_vm11 = vcmp.ge.f32.partialorder %v869_v52, 0.0  ;;  %v1010_v9 = vmul.f32 0.2, %v869_v52  ;;  %v945_v4 = vpop.f32.mrb[22].mxu1 }
 0x261   : > { %v1073_v8 = vmul.f32 1.4142135, %v1041_v7  ;;  %vm980_vm12 = vcmp.ge.f32.partialorder %v942_v63, 0.0  ;;  %v1012_v10 = vmul.f32 0.2, %v942_v63  ;;  %v944_v32 = vadd.f32 %v943_v15, %v765_v55  ;;  %v947_v36 = vpop.f32.mrb[23].mxu1 }
 0x262   : > { %v1109_v14 = vpack.c.bf16 %v1072_v18, %v4478_v48  ;;  %v1042_v12 = vsel %vm978_vm11, %v869_v52, %v1010_v9  ;;  %v1011_v31 = vmul.f32 0.2, %v871_v1  ;;  %vm979_vm13 = vcmp.ge.f32.partialorder %v871_v1, 0.0 }
 0x263   : > { %v1044_v37 = vsel %vm980_vm12, %v942_v63, %v1012_v10  ;;  %v873_v19 = vadd.f32 %v872_v5, %v770_v11  ;;  %v946_v20 = vadd.f32 %v945_v4, %v770_v11  ;;  %v878_v24 = vpop.f32.mrb[24].mxu0  ;;  %v4485_v13 = vmul.f32 1.4142135, %v1042_v12 }
 0x264   : > { %vm981_vm14 = vcmp.ge.f32.partialorder %v944_v32, 0.0  ;;  %v1013_v42 = vmul.f32 0.2, %v944_v32  ;;  %v880_v25 = vpop.f32.mrb[25].mxu0  ;;  %v4487_v54 = vmul.f32 1.4142135, %v1044_v37  ;;  %v1043_v21 = vsel %vm979_vm13, %v871_v1, %v1011_v31 }
 0x265   : > { %vm982_vm15 = vcmp.ge.f32.partialorder %v873_v19, 0.0  ;;  %v1014_v17 = vmul.f32 0.2, %v873_v19  ;;  %vm984_vm1 = vcmp.ge.f32.partialorder %v946_v20, 0.0  ;;  %v1016_v26 = vmul.f32 0.2, %v946_v20 }
 0x266   : > { %v875_v49 = vadd.f32 %v874_v60, %v770_v11  ;;  %v948_v27 = vadd.f32 %v947_v36, %v770_v11  ;;  %v951_v50 = vpop.f32.mrb[24].mxu1  ;;  %v882_v57 = vpop.f32.mrb[26].mxu0  ;;  %v1045_v51 = vsel %vm981_vm14, %v944_v32, %v1013_v42  ;;  %v1108_v41 = vpack.c.bf16 %v1071_v62, %v4474_v53 }
 0x267   : > { %v1046_v30 = vsel %vm982_vm15, %v873_v19, %v1014_v17  ;;  %v1110_v3 = vpack.c.bf16 %v1073_v8, %v4480_v56  ;;  %v953_v22 = vpop.f32.mrb[25].mxu1  ;;  %v884_v16 = vpop.f32.mrb[27].mxu0  ;;  %v1048_v2 = vsel %vm984_vm1, %v946_v20, %v1016_v26  ;;  %v879_v48 = vadd.f32 %v878_v24, %v775_v35 }
 0x268   : > { %v4491_v38 = vmul.f32 1.4142135, %v1046_v30  ;;  %vm983_vm2 = vcmp.ge.f32.partialorder %v875_v49, 0.0  ;;  %v1015_v40 = vmul.f32 0.2, %v875_v49  ;;  %v955_v43 = vpop.f32.mrb[26].mxu1  ;;  %1204 = vmatprep.subr.bf16.mxu0 %v1108_v41  ;;  %v952_v47 = vadd.f32 %v951_v50, %v775_v35  ;;  %v785_v24 = vpop.permute.xlu0 %784 }
 0x269   : > { %v4493_v28 = vmul.f32 1.4142135, %v1048_v2  ;;  %vm985_vm3 = vcmp.ge.f32.partialorder %v948_v27, 0.0  ;;  %v1017_v34 = vmul.f32 0.2, %v948_v27  ;;  %1277 = vmatprep.subr.bf16.mxu1 %v1110_v3  ;;  %v957_v58 = vpop.f32.mrb[27].mxu1  ;;  %1205 = vmatpush1.bf16.msra.mxu0 %v1107_v46  ;;  %v881_v6 = vadd.f32 %v880_v25, %v775_v35 }
 0x26a   : > { %v1075_v53 = vmul.f32 1.4142135, %v1043_v21  ;;  %v1111_v44 = vpack.c.bf16 %v4491_v38, %v4485_v13  ;;  %v1047_v45 = vsel %vm983_vm2, %v875_v49, %v1015_v40  ;;  %1278 = vmatpush1.bf16.msra.mxu1 %v1109_v14  ;;  %v1077_v55 = vmul.f32 1.4142135, %v1045_v51  ;;  %v790_v51 = vpop.permute.xlu1 %789 }
 0x26b   : > { %v1113_v56 = vpack.c.bf16 %v4493_v28, %v4487_v54  ;;  %v1049_v59 = vsel %vm985_vm3, %v948_v27, %v1017_v34  ;;  %vm986_vm4 = vcmp.ge.f32.partialorder %v879_v48, 0.0  ;;  %v888_v5 = vpop.f32.mrb[28].mxu0  ;;  %v1079_v39 = vmul.f32 1.4142135, %v1047_v45 }
 0x26c   : > { %v1018_v52 = vmul.f32 0.2, %v879_v48  ;;  %vm988_vm5 = vcmp.ge.f32.partialorder %v952_v47, 0.0  ;;  %v890_v60 = vpop.f32.mrb[29].mxu0  ;;  %v1020_v61 = vmul.f32 0.2, %v952_v47  ;;  %v954_v62 = vadd.f32 %v953_v22, %v775_v35 }
 0x26d   : > { %v883_v63 = vadd.f32 %v882_v57, %v780_v29  ;;  %v956_v33 = vadd.f32 %v955_v43, %v780_v29  ;;  %v892_v23 = vpop.f32.mrb[30].mxu0  ;;  %v1081_v46 = vmul.f32 1.4142135, %v1049_v59  ;;  %v1019_v15 = vmul.f32 0.2, %v881_v6 }
 0x26e   : > { %v1050_v1 = vsel %vm986_vm4, %v879_v48, %v1018_v52  ;;  %v885_v18 = vadd.f32 %v884_v16, %v780_v29  ;;  %v961_v7 = vpop.f32.mrb[28].mxu1  ;;  %v894_v9 = vpop.f32.mrb[31].mxu0  ;;  %v1052_v8 = vsel %vm988_vm5, %v952_v47, %v1020_v61  ;;  %vm987_vm6 = vcmp.ge.f32.partialorder %v881_v6, 0.0 }
 0x26f   : > { %v4502_v4 = vmul.f32 1.4142135, %v1050_v1  ;;  %vm989_vm7 = vcmp.ge.f32.partialorder %v954_v62, 0.0  ;;  %v963_v10 = vpop.f32.mrb[29].mxu1  ;;  %v1021_v11 = vmul.f32 0.2, %v954_v62  ;;  %v1051_v37 = vsel %vm987_vm6, %v881_v6, %v1019_v15 }
 0x270   : > { %vm990_vm8 = vcmp.ge.f32.partialorder %v883_v63, 0.0  ;;  %v1022_v14 = vmul.f32 0.2, %v883_v63  ;;  %v965_v12 = vpop.f32.mrb[30].mxu1  ;;  %v4504_v31 = vmul.f32 1.4142135, %v1052_v8  ;;  %v958_v25 = vadd.f32 %v957_v58, %v780_v29 }
 0x271   : > { %vm992_vm9 = vcmp.ge.f32.partialorder %v956_v33, 0.0  ;;  %v1024_v32 = vmul.f32 0.2, %v956_v33  ;;  %v967_v36 = vpop.f32.mrb[31].mxu1  ;;  %vm991_vm10 = vcmp.ge.f32.partialorder %v885_v18, 0.0  ;;  %v1112_v54 = vpack.c.bf16 %v1079_v39, %v1075_v53 }
 0x272   : > { %v1054_v19 = vsel %vm990_vm8, %v883_v63, %v1022_v14  ;;  %v1023_v20 = vmul.f32 0.2, %v885_v18  ;;  %v1053_v17 = vsel %vm989_vm7, %v954_v62, %v1021_v11  ;;  %v1114_v26 = vpack.c.bf16 %v1081_v46, %v1077_v55 }
 0x273   : > { %v4506_v13 = vmul.f32 1.4142135, %v1054_v19  ;;  %v1056_v42 = vsel %vm992_vm9, %v956_v33, %v1024_v32  ;;  %v889_v49 = vadd.f32 %v888_v5, %v785_v24  ;;  %vm993_vm11 = vcmp.ge.f32.partialorder %v958_v25, 0.0  ;;  %1206 = vmatprep.subr.bf16.mxu0 %v1112_v54  ;;  %v3779_v32 = vld [vmem:[%s5063_s1 + $0x50] sm:$0xff]   ;;  %v1140_v19 = vpop.permute.xlu1 %1139 }
 0x274   : > { %v4509_v21 = vmul.f32 1.4142135, %v1056_v42  ;;  %v1055_v50 = vsel %vm991_vm10, %v885_v18, %v1023_v20  ;;  %v1025_v57 = vmul.f32 0.2, %v958_v25  ;;  %1279 = vmatprep.subr.bf16.mxu1 %v1114_v26  ;;  %1207 = vmatpush1.bf16.msra.mxu0 %v1111_v44  ;;  %v962_v3 = vadd.f32 %v961_v7, %v785_v24 }
 0x275   : > { %v1115_v27 = vpack.c.bf16 %v4506_v13, %v4502_v4  ;;  %vm994_vm12 = vcmp.ge.f32.partialorder %v889_v49, 0.0  ;;  %v1026_v41 = vmul.f32 0.2, %v889_v49  ;;  %1280 = vmatpush1.bf16.msra.mxu1 %v1113_v56  ;;  %v891_v16 = vadd.f32 %v890_v60, %v785_v24 }
 0x276   : > { %v1117_v30 = vpack.c.bf16 %v4509_v21, %v4504_v31  ;;  %v1057_v22 = vsel %vm993_vm11, %v958_v25, %v1025_v57  ;;  %v964_v35 = vadd.f32 %v963_v10, %v785_v24  ;;  %v893_v38 = vadd.f32 %v892_v23, %v790_v51  ;;  %v3778_v31 = vld [vmem:[%s5063_s1 + $0x48] sm:$0xff]  }
 0x277   : > { %v1083_v2 = vmul.f32 1.4142135, %v1051_v37  ;;  %v1085_v40 = vmul.f32 1.4142135, %v1053_v17  ;;  %v1058_v43 = vsel %vm994_vm12, %v889_v49, %v1026_v41  ;;  %v1028_v28 = vmul.f32 0.2, %v962_v3  ;;  %v1135_v37 = vpop.permute.xlu0 %1134 }
 0x278   : > { %v1087_v34 = vmul.f32 1.4142135, %v1055_v50  ;;  %vm996_vm13 = vcmp.ge.f32.partialorder %v962_v3, 0.0  ;;  %v1027_v48 = vmul.f32 0.2, %v891_v16  ;;  %vm995_vm14 = vcmp.ge.f32.partialorder %v891_v16, 0.0 }
 0x279   : > { %v1089_v58 = vmul.f32 1.4142135, %v1057_v22  ;;  %vm998_vm15 = vcmp.ge.f32.partialorder %v893_v38, 0.0  ;;  %v1030_v53 = vmul.f32 0.2, %v893_v38  ;;  %v966_v47 = vadd.f32 %v965_v12, %v790_v51  ;;  %v3777_v12 = vld [vmem:[%s5063_s1 + $0x40] sm:$0xff]  }
 0x27a   : > { %v1090_v44 = vmul.f32 1.4142135, %v1058_v43  ;;  %v1029_v45 = vmul.f32 0.2, %v964_v35  ;;  %v895_v55 = vadd.f32 %v894_v9, %v790_v51  ;;  %v1060_v59 = vsel %vm996_vm13, %v962_v3, %v1028_v28 }
 0x27b   : > { %vm997_vm1 = vcmp.ge.f32.partialorder %v964_v35, 0.0  ;;  %v1062_v56 = vsel %vm998_vm15, %v893_v38, %v1030_v53  ;;  %v968_v5 = vadd.f32 %v967_v36, %v790_v51  ;;  %v1059_v29 = vsel %vm995_vm14, %v891_v16, %v1027_v48  ;;  %v3780_v36 = vld [vmem:[%s5063_s1 + $0x58] sm:$0xff]   ;;  %v1145_v48 = vpop.permute.xlu0 %1144 }
 0x27c   : > { %v1094_v39 = vmul.f32 1.4142135, %v1062_v56  ;;  %vm1000_vm2 = vcmp.ge.f32.partialorder %v966_v47, 0.0  ;;  %vm999_vm3 = vcmp.ge.f32.partialorder %v895_v55, 0.0  ;;  %v1032_v52 = vmul.f32 0.2, %v966_v47 }
 0x27d   : > { %v1031_v6 = vmul.f32 0.2, %v895_v55  ;;  %vm1001_vm4 = vcmp.ge.f32.partialorder %v968_v5, 0.0  ;;  %v1116_v60 = vpack.c.bf16 %v1087_v34, %v1083_v2  ;;  %v1061_v61 = vsel %vm997_vm1, %v964_v35, %v1029_v45 }
 0x27e   : > { %v1119_v62 = vpack.c.bf16 %v1094_v39, %v1090_v44  ;;  %v1033_v63 = vmul.f32 0.2, %v968_v5  ;;  %v1118_v33 = vpack.c.bf16 %v1089_v58, %v1085_v40  ;;  %v1092_v23 = vmul.f32 1.4142135, %v1060_v59 }
 0x27f   : > { %v1064_v46 = vsel %vm1000_vm2, %v966_v47, %v1032_v52  ;;  %v1063_v1 = vsel %vm999_vm3, %v895_v55, %v1031_v6  ;;  %1208 = vmatprep.subr.bf16.mxu0 %v1116_v60  ;;  %v1091_v15 = vmul.f32 1.4142135, %v1059_v29  ;;  %v1093_v4 = vmul.f32 1.4142135, %v1061_v61 }
 0x280   : > { %v1096_v18 = vmul.f32 1.4142135, %v1064_v46  ;;  %v1095_v7 = vmul.f32 1.4142135, %v1063_v1  ;;  %v1065_v9 = vsel %vm1001_vm4, %v968_v5, %v1033_v63  ;;  %1281 = vmatprep.subr.bf16.mxu1 %v1118_v33  ;;  %1209 = vmatpush1.bf16.msra.mxu0 %v1115_v27 }
 0x281   : > { %v1097_v8 = vmul.f32 1.4142135, %v1065_v9  ;;  %1282 = vmatpush1.bf16.msra.mxu1 %v1117_v30 }
 0x282   : > { %v1121_v10 = vpack.c.bf16 %v1096_v18, %v1092_v23  ;;  %v1120_v11 = vpack.c.bf16 %v1095_v7, %v1091_v15 }
 0x283   : > { %v1122_v14 = vpack.c.bf16 %v1097_v8, %v1093_v4 }
 0x284   : > { %1210 = vmatprep.subr.bf16.mxu0 %v1120_v11 }
 0x285   : > { %1283 = vmatprep.subr.bf16.mxu1 %v1122_v14  ;;  %1211 = vmatpush1.bf16.msra.mxu0 %v1119_v62 }
 0x286   : > { %1284 = vmatpush1.bf16.msra.mxu1 %v1121_v10  ;;  %v1150_v10 = vpop.permute.xlu1 %1149 }
 0x288   : > { %3571 = vmatmul.mubr.msk.bf16.vlgmr.msra.gmra.mrb[32].mxu0 %vm431_vm0, %v3777_v12 }
 0x289   : > { %3575 = vmatmul.mubr.msk.bf16.vlgmr.msra.gmra.mrb[32].mxu1 %vm431_vm0, %v3777_v12  ;;  %1246 = vmatprep.mubr.bf16.mxu0 %v3879_v0 }
 0x28a   : > { %1319 = vmatprep.mubr.bf16.mxu1 %v3879_v0 }
 0x290   : > { %3572 = vmatmul.mubr.msk.bf16.gmra.mrb[36].mxu0 %vm431_vm0, %v3778_v31 }
 0x291   : > { %3576 = vmatmul.mubr.msk.bf16.gmra.mrb[36].mxu1 %vm431_vm0, %v3778_v31  ;;  %1256 = vmatprep.mubr.bf16.mxu0 %v3879_v0 }
 0x292   : > { %1329 = vmatprep.mubr.bf16.mxu1 %v3879_v0 }
 0x298   : > { %3573 = vmatmul.mubr.msk.bf16.gmra.mrb[40].mxu0 %vm431_vm0, %v3779_v32 }
 0x299   : > { %3577 = vmatmul.mubr.msk.bf16.gmra.mrb[40].mxu1 %vm431_vm0, %v3779_v32  ;;  %1266 = vmatprep.mubr.bf16.mxu0 %v3879_v0 }
 0x29a   : > { %1339 = vmatprep.mubr.bf16.mxu1 %v3879_v0 }
 0x2a0   : > { %3574 = vmatmul.mubr.msk.bf16.gmra.mrb[44].mxu0 %vm431_vm0, %v3780_v36 }
 0x2a1   : > { %3578 = vmatmul.mubr.msk.bf16.gmra.mrb[44].mxu1 %vm431_vm0, %v3780_v36  ;;  %1616 = vmatprep.mubr.bf16.mxu0 %v3879_v0 }
 0x2a2   : > { %1689 = vmatprep.mubr.bf16.mxu1 %v3879_v0 }
 0x35b   : > { %v1238_v20 = vpop.f32.mrb[32].mxu0 }
 0x35c   : > { %v1239_v24 = vadd.f32 %v1238_v20, %v1135_v37  ;;  %v1311_v13 = vpop.f32.mrb[32].mxu1  ;;  %v1240_v42 = vpop.f32.mrb[33].mxu0 }
 0x35d   : > { %v1312_v25 = vadd.f32 %v1311_v13, %v1135_v37  ;;  %v1241_v54 = vadd.f32 %v1240_v42, %v1135_v37  ;;  %v1313_v17 = vpop.f32.mrb[33].mxu1  ;;  %v1242_v21 = vpop.f32.mrb[34].mxu0 }
 0x35e   : > { %vm1350_vm5 = vcmp.ge.f32.partialorder %v1239_v24, 0.0  ;;  %v1382_v26 = vmul.f32 0.2, %v1239_v24  ;;  %v1314_v49 = vadd.f32 %v1313_v17, %v1135_v37  ;;  %v1243_v27 = vadd.f32 %v1242_v21, %v1140_v19  ;;  %v1315_v50 = vpop.f32.mrb[34].mxu1  ;;  %v1244_v57 = vpop.f32.mrb[35].mxu0 }
 0x35f   : > { %vm1352_vm6 = vcmp.ge.f32.partialorder %v1312_v25, 0.0  ;;  %v1384_v51 = vmul.f32 0.2, %v1312_v25  ;;  %vm1351_vm7 = vcmp.ge.f32.partialorder %v1241_v54, 0.0  ;;  %v1383_v30 = vmul.f32 0.2, %v1241_v54 }
 0x360   : > { %v1414_v41 = vsel %vm1350_vm5, %v1239_v24, %v1382_v26  ;;  %vm1353_vm8 = vcmp.ge.f32.partialorder %v1314_v49, 0.0  ;;  %v1385_v3 = vmul.f32 0.2, %v1314_v49  ;;  %vm1354_vm9 = vcmp.ge.f32.partialorder %v1243_v27, 0.0  ;;  %v1317_v22 = vpop.f32.mrb[35].mxu1 }
 0x361   : > { %v4543_v16 = vmul.f32 1.4142135, %v1414_v41  ;;  %v1416_v35 = vsel %vm1352_vm6, %v1312_v25, %v1384_v51  ;;  %v1415_v38 = vsel %vm1351_vm7, %v1241_v54, %v1383_v30  ;;  %v1386_v2 = vmul.f32 0.2, %v1243_v27  ;;  %v1155_v51 = vpop.permute.xlu0 %1154 }
 0x362   : > { %v4545_v40 = vmul.f32 1.4142135, %v1416_v35  ;;  %v4547_v43 = vmul.f32 1.4142135, %v1415_v38  ;;  %v1417_v28 = vsel %vm1353_vm8, %v1314_v49, %v1385_v3  ;;  %v1316_v34 = vadd.f32 %v1315_v50, %v1140_v19 }
 0x363   : > { %v4549_v58 = vmul.f32 1.4142135, %v1417_v28  ;;  %v1418_v53 = vsel %vm1354_vm9, %v1243_v27, %v1386_v2  ;;  %v1245_v44 = vadd.f32 %v1244_v57, %v1140_v19  ;;  %v1318_v45 = vadd.f32 %v1317_v22, %v1140_v19  ;;  %v1248_v47 = vpop.f32.mrb[36].mxu0 }
 0x364   : > { %v4551_v55 = vmul.f32 1.4142135, %v1418_v53  ;;  %vm1356_vm10 = vcmp.ge.f32.partialorder %v1316_v34, 0.0  ;;  %v1388_v59 = vmul.f32 0.2, %v1316_v34  ;;  %v1249_v56 = vadd.f32 %v1248_v47, %v1145_v48  ;;  %v1321_v5 = vpop.f32.mrb[36].mxu1 }
 0x365   : > { %vm1355_vm11 = vcmp.ge.f32.partialorder %v1245_v44, 0.0  ;;  %v1387_v29 = vmul.f32 0.2, %v1245_v44  ;;  %vm1357_vm12 = vcmp.ge.f32.partialorder %v1318_v45, 0.0  ;;  %v1389_v39 = vmul.f32 0.2, %v1318_v45 }
 0x366   : > { %v1487_v52 = vpack.c.bf16 %v4551_v55, %v4543_v16  ;;  %v1420_v6 = vsel %vm1356_vm10, %v1316_v34, %v1388_v59  ;;  %vm1358_vm13 = vcmp.ge.f32.partialorder %v1249_v56, 0.0  ;;  %v1390_v60 = vmul.f32 0.2, %v1249_v56  ;;  %v1250_v61 = vpop.f32.mrb[37].mxu0  ;;  %v1323_v62 = vpop.f32.mrb[37].mxu1 }
 0x367   : > { %v4555_v63 = vmul.f32 1.4142135, %v1420_v6  ;;  %v1419_v33 = vsel %vm1355_vm11, %v1245_v44, %v1387_v29  ;;  %v1421_v23 = vsel %vm1357_vm12, %v1318_v45, %v1389_v39  ;;  %v1322_v46 = vadd.f32 %v1321_v5, %v1145_v48  ;;  %v1252_v1 = vpop.f32.mrb[38].mxu0  ;;  %v1325_v15 = vpop.f32.mrb[38].mxu1 }
 0x368   : > { %v1451_v18 = vmul.f32 1.4142135, %v1419_v33  ;;  %v1453_v7 = vmul.f32 1.4142135, %v1421_v23  ;;  %v1251_v9 = vadd.f32 %v1250_v61, %v1145_v48  ;;  %v1254_v4 = vpop.f32.mrb[39].mxu0  ;;  %v1327_v8 = vpop.f32.mrb[39].mxu1  ;;  %v1422_v14 = vsel %vm1358_vm13, %v1249_v56, %v1390_v60 }
 0x369   : > { %v1489_v11 = vpack.c.bf16 %v4555_v63, %v4545_v40  ;;  %vm1360_vm14 = vcmp.ge.f32.partialorder %v1322_v46, 0.0  ;;  %v1392_v12 = vmul.f32 0.2, %v1322_v46  ;;  %v1324_v32 = vadd.f32 %v1323_v62, %v1145_v48  ;;  %v1160_v33 = vpop.permute.xlu1 %1159 }
 0x36a   : > { %vm1359_vm15 = vcmp.ge.f32.partialorder %v1251_v9, 0.0  ;;  %v1391_v31 = vmul.f32 0.2, %v1251_v9  ;;  %v1253_v36 = vadd.f32 %v1252_v1, %v1150_v10  ;;  %v1326_v19 = vadd.f32 %v1325_v15, %v1150_v10 }
 0x36b   : > { %v1424_v37 = vsel %vm1360_vm14, %v1322_v46, %v1392_v12  ;;  %v1255_v20 = vadd.f32 %v1254_v4, %v1150_v10  ;;  %v1328_v24 = vadd.f32 %v1327_v8, %v1150_v10  ;;  %v1258_v13 = vpop.f32.mrb[40].mxu0  ;;  %v4560_v42 = vmul.f32 1.4142135, %v1422_v14  ;;  %v1165_v8 = vpop.permute.xlu0 %1164 }
 0x36c   : > { %v1423_v25 = vsel %vm1359_vm15, %v1251_v9, %v1391_v31  ;;  %vm1361_vm1 = vcmp.ge.f32.partialorder %v1324_v32, 0.0  ;;  %v1393_v54 = vmul.f32 0.2, %v1324_v32  ;;  %v1331_v17 = vpop.f32.mrb[40].mxu1  ;;  %v4562_v21 = vmul.f32 1.4142135, %v1424_v37 }
 0x36d   : > { %vm1362_vm2 = vcmp.ge.f32.partialorder %v1253_v36, 0.0  ;;  %v1394_v26 = vmul.f32 0.2, %v1253_v36  ;;  %vm1364_vm3 = vcmp.ge.f32.partialorder %v1326_v19, 0.0  ;;  %v1396_v27 = vmul.f32 0.2, %v1326_v19 }
 0x36e   : > { %v1425_v49 = vsel %vm1361_vm1, %v1324_v32, %v1393_v54  ;;  %vm1363_vm4 = vcmp.ge.f32.partialorder %v1255_v20, 0.0  ;;  %v1395_v50 = vmul.f32 0.2, %v1255_v20  ;;  %v1260_v57 = vpop.f32.mrb[41].mxu0  ;;  %v4564_v30 = vmul.f32 1.4142135, %v1423_v25 }
 0x36f   : > { %v1426_v41 = vsel %vm1362_vm2, %v1253_v36, %v1394_v26  ;;  %vm1365_vm5 = vcmp.ge.f32.partialorder %v1328_v24, 0.0  ;;  %v1397_v3 = vmul.f32 0.2, %v1328_v24  ;;  %v1333_v22 = vpop.f32.mrb[41].mxu1  ;;  %v1428_v38 = vsel %vm1364_vm3, %v1326_v19, %v1396_v27  ;;  %v1262_v28 = vpop.f32.mrb[42].mxu0 }
 0x370   : > { %v4566_v35 = vmul.f32 1.4142135, %v1426_v41  ;;  %v1427_v2 = vsel %vm1363_vm4, %v1255_v20, %v1395_v50  ;;  %v1488_v40 = vpack.c.bf16 %v1451_v18, %v4547_v43  ;;  %v1335_v34 = vpop.f32.mrb[42].mxu1  ;;  %v1457_v48 = vmul.f32 1.4142135, %v1425_v49  ;;  %v1264_v47 = vpop.f32.mrb[43].mxu0 }
 0x371   : > { %v4569_v53 = vmul.f32 1.4142135, %v1428_v38  ;;  %v1429_v44 = vsel %vm1365_vm5, %v1328_v24, %v1397_v3  ;;  %v1490_v45 = vpack.c.bf16 %v1453_v7, %v4549_v58  ;;  %v1337_v59 = vpop.f32.mrb[43].mxu1  ;;  %v1459_v5 = vmul.f32 1.4142135, %v1427_v2 }
 0x372   : > { %v1491_v56 = vpack.c.bf16 %v4566_v35, %v4560_v42  ;;  %1584 = vmatprep.subr.bf16.mxu0 %v1488_v40  ;;  %v1259_v29 = vadd.f32 %v1258_v13, %v1155_v51  ;;  %v1332_v39 = vadd.f32 %v1331_v17, %v1155_v51  ;;  %v1461_v6 = vmul.f32 1.4142135, %v1429_v44 }
 0x373   : > { %v1493_v43 = vpack.c.bf16 %v4569_v53, %v4562_v21  ;;  %1657 = vmatprep.subr.bf16.mxu1 %v1490_v45  ;;  %1585 = vmatpush1.bf16.msra.mxu0 %v1487_v52  ;;  %v1261_v60 = vadd.f32 %v1260_v57, %v1155_v51  ;;  %v1334_v58 = vadd.f32 %v1333_v22, %v1155_v51  ;;  %v1268_v61 = vpop.f32.mrb[44].mxu0  ;;  %v1170_v22 = vpop.permute.xlu1 %1169 }
 0x374   : > { %1658 = vmatpush1.bf16.msra.mxu1 %v1489_v11  ;;  %vm1366_vm6 = vcmp.ge.f32.partialorder %v1259_v29, 0.0  ;;  %v1398_v62 = vmul.f32 0.2, %v1259_v29  ;;  %vm1368_vm7 = vcmp.ge.f32.partialorder %v1332_v39, 0.0  ;;  %v1400_v63 = vmul.f32 0.2, %v1332_v39 }
 0x375   : > { %vm1367_vm8 = vcmp.ge.f32.partialorder %v1261_v60, 0.0  ;;  %v1399_v23 = vmul.f32 0.2, %v1261_v60  ;;  %v1401_v46 = vmul.f32 0.2, %v1334_v58  ;;  %v1263_v18 = vadd.f32 %v1262_v28, %v1160_v33  ;;  %v1341_v9 = vpop.f32.mrb[44].mxu1 }
 0x376   : > { %v1430_v1 = vsel %vm1366_vm6, %v1259_v29, %v1398_v62  ;;  %v1432_v15 = vsel %vm1368_vm7, %v1332_v39, %v1400_v63  ;;  %v1336_v7 = vadd.f32 %v1335_v34, %v1160_v33  ;;  %v1270_v4 = vpop.f32.mrb[45].mxu0  ;;  %vm1369_vm9 = vcmp.ge.f32.partialorder %v1334_v58, 0.0  ;;  %v1343_v55 = vpop.f32.mrb[45].mxu1 }
 0x377   : > { %v4579_v16 = vmul.f32 1.4142135, %v1430_v1  ;;  %v1272_v52 = vpop.f32.mrb[46].mxu0  ;;  %v4581_v10 = vmul.f32 1.4142135, %v1432_v15  ;;  %v1431_v11 = vsel %vm1367_vm8, %v1261_v60, %v1399_v23  ;;  %vm1370_vm10 = vcmp.ge.f32.partialorder %v1263_v18, 0.0 }
 0x378   : > { %vm1372_vm11 = vcmp.ge.f32.partialorder %v1336_v7, 0.0  ;;  %v1402_v14 = vmul.f32 0.2, %v1263_v18  ;;  %v1404_v12 = vmul.f32 0.2, %v1336_v7  ;;  %v1265_v31 = vadd.f32 %v1264_v47, %v1160_v33  ;;  %v1345_v36 = vpop.f32.mrb[46].mxu1 }
 0x379   : > { %v1338_v32 = vadd.f32 %v1337_v59, %v1160_v33  ;;  %v1274_v37 = vpop.f32.mrb[47].mxu0  ;;  %v1433_v19 = vsel %vm1369_vm9, %v1334_v58, %v1401_v46  ;;  %v1492_v20 = vpack.c.bf16 %v1459_v5, %v4564_v30  ;;  %v1494_v24 = vpack.c.bf16 %v1461_v6, %v1457_v48  ;;  %v1347_v42 = vpop.f32.mrb[47].mxu1 }
 0x37a   : > { %v1269_v13 = vadd.f32 %v1268_v61, %v1165_v8  ;;  %v1434_v25 = vsel %vm1370_vm10, %v1263_v18, %v1402_v14  ;;  %v1436_v54 = vsel %vm1372_vm11, %v1336_v7, %v1404_v12  ;;  %vm1371_vm12 = vcmp.ge.f32.partialorder %v1265_v31, 0.0  ;;  %v3781_v14 = vld [vmem:[%s5063_s1 + $0x60] sm:$0xff]   ;;  %v3782_v12 = vld [vmem:[%s5063_s1 + $0x68] sm:$0xff]  }
 0x37b   : > { %v1403_v17 = vmul.f32 0.2, %v1265_v31  ;;  %v1466_v21 = vmul.f32 1.4142135, %v1434_v25  ;;  %v1468_v26 = vmul.f32 1.4142135, %v1436_v54  ;;  %1586 = vmatprep.subr.bf16.mxu0 %v1492_v20  ;;  %1659 = vmatprep.subr.bf16.mxu1 %v1494_v24  ;;  %v1342_v49 = vadd.f32 %v1341_v9, %v1165_v8 }
 0x37c   : > { %vm1373_vm13 = vcmp.ge.f32.partialorder %v1338_v32, 0.0  ;;  %v1405_v50 = vmul.f32 0.2, %v1338_v32  ;;  %1587 = vmatpush1.bf16.msra.mxu0 %v1491_v56  ;;  %1660 = vmatpush1.bf16.msra.mxu1 %v1493_v43  ;;  %vm1374_vm14 = vcmp.ge.f32.partialorder %v1269_v13, 0.0  ;;  %v1406_v57 = vmul.f32 0.2, %v1269_v13 }
 0x37d   : > { %v1435_v27 = vsel %vm1371_vm12, %v1265_v31, %v1403_v17  ;;  %v1463_v51 = vmul.f32 1.4142135, %v1431_v11  ;;  %v1465_v30 = vmul.f32 1.4142135, %v1433_v19  ;;  %v1495_v41 = vpack.c.bf16 %v1466_v21, %v4579_v16  ;;  %v3783_v31 = vld [vmem:[%s5063_s1 + $0x70] sm:$0xff]  }
 0x37e   : > { %v1497_v3 = vpack.c.bf16 %v1468_v26, %v4581_v10  ;;  %v1467_v35 = vmul.f32 1.4142135, %v1435_v27  ;;  %v1437_v38 = vsel %vm1373_vm13, %v1338_v32, %v1405_v50  ;;  %v1271_v2 = vadd.f32 %v1270_v4, %v1165_v8  ;;  %v3784_v32 = vld [vmem:[%s5063_s1 + $0x78] sm:$0xff]   ;;  %v1520_v27 = vpop.permute.xlu1 %1519 }
 0x37f   : > { %v1344_v40 = vadd.f32 %v1343_v55, %v1165_v8  ;;  %v1438_v28 = vsel %vm1374_vm14, %v1269_v13, %v1406_v57  ;;  %vm1376_vm15 = vcmp.ge.f32.partialorder %v1342_v49, 0.0  ;;  %v1408_v34 = vmul.f32 0.2, %v1342_v49 }
 0x380   : > { %v1273_v48 = vadd.f32 %v1272_v52, %v1170_v22  ;;  %v1469_v53 = vmul.f32 1.4142135, %v1437_v38  ;;  %vm1375_vm1 = vcmp.ge.f32.partialorder %v1271_v2, 0.0  ;;  %v1407_v44 = vmul.f32 0.2, %v1271_v2 }
 0x381   : > { %vm1377_vm2 = vcmp.ge.f32.partialorder %v1344_v40, 0.0  ;;  %v1409_v45 = vmul.f32 0.2, %v1344_v40  ;;  %v1346_v59 = vadd.f32 %v1345_v36, %v1170_v22  ;;  %v1470_v56 = vmul.f32 1.4142135, %v1438_v28  ;;  %v1515_v36 = vpop.permute.xlu0 %1514 }
 0x382   : > { %vm1378_vm3 = vcmp.ge.f32.partialorder %v1273_v48, 0.0  ;;  %v1410_v47 = vmul.f32 0.2, %v1273_v48  ;;  %v1275_v5 = vadd.f32 %v1274_v37, %v1170_v22  ;;  %v1348_v29 = vadd.f32 %v1347_v42, %v1170_v22 }
 0x383   : > { %v1496_v39 = vpack.c.bf16 %v1467_v35, %v1463_v51  ;;  %v1440_v43 = vsel %vm1376_vm15, %v1342_v49, %v1408_v34  ;;  %v1439_v6 = vsel %vm1375_vm1, %v1271_v2, %v1407_v44  ;;  %vm1380_vm4 = vcmp.ge.f32.partialorder %v1346_v59, 0.0 }
 0x384   : > { %v1442_v60 = vsel %vm1378_vm3, %v1273_v48, %v1410_v47  ;;  %v1441_v58 = vsel %vm1377_vm2, %v1344_v40, %v1409_v45  ;;  %v1412_v62 = vmul.f32 0.2, %v1346_v59  ;;  %v1498_v63 = vpack.c.bf16 %v1469_v53, %v1465_v30 }
 0x385   : > { %v1474_v61 = vmul.f32 1.4142135, %v1442_v60  ;;  %1588 = vmatprep.subr.bf16.mxu0 %v1496_v39  ;;  %vm1379_vm5 = vcmp.ge.f32.partialorder %v1275_v5, 0.0  ;;  %v1411_v33 = vmul.f32 0.2, %v1275_v5  ;;  %vm1381_vm6 = vcmp.ge.f32.partialorder %v1348_v29, 0.0  ;;  %v1525_v40 = vpop.permute.xlu0 %1524 }
 0x386   : > { %v1413_v23 = vmul.f32 0.2, %v1348_v29  ;;  %1589 = vmatpush1.bf16.msra.mxu0 %v1495_v41  ;;  %v1472_v46 = vmul.f32 1.4142135, %v1440_v43  ;;  %v1444_v15 = vsel %vm1380_vm4, %v1346_v59, %v1412_v62  ;;  %1661 = vmatprep.subr.bf16.mxu1 %v1498_v63  ;;  %v1471_v18 = vmul.f32 1.4142135, %v1439_v6 }
 0x387   : > { %v1499_v1 = vpack.c.bf16 %v1474_v61, %v1470_v56  ;;  %v1476_v7 = vmul.f32 1.4142135, %v1444_v15  ;;  %v1443_v9 = vsel %vm1379_vm5, %v1275_v5, %v1411_v33  ;;  %1662 = vmatpush1.bf16.msra.mxu1 %v1497_v3  ;;  %v1473_v16 = vmul.f32 1.4142135, %v1441_v58 }
 0x388   : > { %v1445_v4 = vsel %vm1381_vm6, %v1348_v29, %v1413_v23  ;;  %v1475_v55 = vmul.f32 1.4142135, %v1443_v9 }
 0x389   : > { %v1477_v52 = vmul.f32 1.4142135, %v1445_v4  ;;  %v1501_v8 = vpack.c.bf16 %v1476_v7, %v1472_v46 }
 0x38a   : > { %v1500_v10 = vpack.c.bf16 %v1475_v55, %v1471_v18 }
 0x38b   : > { %v1502_v11 = vpack.c.bf16 %v1477_v52, %v1473_v16  ;;  %v1530_v52 = vpop.permute.xlu1 %1529 }
 0x38c   : > { %1590 = vmatprep.subr.bf16.mxu0 %v1500_v10 }
 0x38d   : > { %1663 = vmatprep.subr.bf16.mxu1 %v1502_v11  ;;  %1591 = vmatpush1.bf16.msra.mxu0 %v1499_v1 }
 0x38e   : > { %1664 = vmatpush1.bf16.msra.mxu1 %v1501_v8 }
 0x390   : > { %3599 = vmatmul.mubr.msk.bf16.vlgmr.msra.gmra.mrb[48].mxu0 %vm431_vm0, %v3781_v14 }
 0x391   : > { %3603 = vmatmul.mubr.msk.bf16.vlgmr.msra.gmra.mrb[48].mxu1 %vm431_vm0, %v3781_v14  ;;  %1626 = vmatprep.mubr.bf16.mxu0 %v3879_v0 }
 0x392   : > { %1699 = vmatprep.mubr.bf16.mxu1 %v3879_v0 }
 0x398   : > { %3600 = vmatmul.mubr.msk.bf16.gmra.mrb[52].mxu0 %vm431_vm0, %v3782_v12 }
 0x399   : > { %3604 = vmatmul.mubr.msk.bf16.gmra.mrb[52].mxu1 %vm431_vm0, %v3782_v12  ;;  %1636 = vmatprep.mubr.bf16.mxu0 %v3879_v0 }
 0x39a   : > { %1709 = vmatprep.mubr.bf16.mxu1 %v3879_v0 }
 0x3a0   : > { %3601 = vmatmul.mubr.msk.bf16.gmra.mrb[56].mxu0 %vm431_vm0, %v3783_v31 }
 0x3a1   : > { %3605 = vmatmul.mubr.msk.bf16.gmra.mrb[56].mxu1 %vm431_vm0, %v3783_v31  ;;  %1646 = vmatprep.mubr.bf16.mxu0 %v3879_v0 }
 0x3a2   : > { %1719 = vmatprep.mubr.bf16.mxu1 %v3879_v0 }
 0x3a8   : > { %3602 = vmatmul.mubr.msk.bf16.gmra.mrb[60].mxu0 %vm431_vm0, %v3784_v32 }
 0x3a9   : > { %3606 = vmatmul.mubr.msk.bf16.gmra.mrb[60].mxu1 %vm431_vm0, %v3784_v32  ;;  %1996 = vmatprep.mubr.bf16.mxu0 %v3879_v0 }
 0x3aa   : > { %2069 = vmatprep.mubr.bf16.mxu1 %v3879_v0 }
 0x463   : > { %v1618_v37 = vpop.f32.mrb[48].mxu0 }
 0x464   : > { %v1691_v19 = vpop.f32.mrb[48].mxu1  ;;  %v1619_v20 = vadd.f32 %v1618_v37, %v1515_v36  ;;  %v1620_v13 = vpop.f32.mrb[49].mxu0 }
 0x465   : > { %v1692_v24 = vadd.f32 %v1691_v19, %v1515_v36  ;;  %v1693_v42 = vpop.f32.mrb[49].mxu1  ;;  %v1621_v25 = vadd.f32 %v1620_v13, %v1515_v36  ;;  %v1622_v17 = vpop.f32.mrb[50].mxu0 }
 0x466   : > { %v1694_v54 = vadd.f32 %v1693_v42, %v1515_v36  ;;  %v1695_v21 = vpop.f32.mrb[50].mxu1  ;;  %vm1730_vm7 = vcmp.ge.f32.partialorder %v1619_v20, 0.0  ;;  %v1762_v26 = vmul.f32 0.2, %v1619_v20  ;;  %v1623_v41 = vadd.f32 %v1622_v17, %v1520_v27  ;;  %v1624_v22 = vpop.f32.mrb[51].mxu0 }
 0x467   : > { %vm1732_vm8 = vcmp.ge.f32.partialorder %v1692_v24, 0.0  ;;  %v1764_v49 = vmul.f32 0.2, %v1692_v24  ;;  %vm1731_vm9 = vcmp.ge.f32.partialorder %v1621_v25, 0.0  ;;  %v1763_v50 = vmul.f32 0.2, %v1621_v25 }
 0x468   : > { %vm1733_vm10 = vcmp.ge.f32.partialorder %v1694_v54, 0.0  ;;  %v1765_v57 = vmul.f32 0.2, %v1694_v54  ;;  %v1794_v51 = vsel %vm1730_vm7, %v1619_v20, %v1762_v26  ;;  %v1696_v3 = vadd.f32 %v1695_v21, %v1520_v27  ;;  %v1697_v35 = vpop.f32.mrb[51].mxu1 }
 0x469   : > { %v1796_v30 = vsel %vm1732_vm8, %v1692_v24, %v1764_v49  ;;  %v1795_v38 = vsel %vm1731_vm9, %v1621_v25, %v1763_v50  ;;  %v4615_v28 = vmul.f32 1.4142135, %v1794_v51  ;;  %vm1734_vm11 = vcmp.ge.f32.partialorder %v1623_v41, 0.0 }
 0x46a   : > { %v1797_v2 = vsel %vm1733_vm10, %v1694_v54, %v1765_v57  ;;  %v4617_v34 = vmul.f32 1.4142135, %v1796_v30  ;;  %vm1736_vm12 = vcmp.ge.f32.partialorder %v1696_v3, 0.0  ;;  %v1766_v48 = vmul.f32 0.2, %v1623_v41 }
 0x46b   : > { %v1768_v53 = vmul.f32 0.2, %v1696_v3  ;;  %v1625_v44 = vadd.f32 %v1624_v22, %v1520_v27  ;;  %v1698_v45 = vadd.f32 %v1697_v35, %v1520_v27  ;;  %v1628_v47 = vpop.f32.mrb[52].mxu0  ;;  %v1827_v56 = vmul.f32 1.4142135, %v1795_v38  ;;  %v1535_v38 = vpop.permute.xlu0 %1534 }
 0x46c   : > { %v1701_v59 = vpop.f32.mrb[52].mxu1  ;;  %v4619_v5 = vmul.f32 1.4142135, %v1797_v2  ;;  %v1629_v29 = vadd.f32 %v1628_v47, %v1525_v40  ;;  %v1630_v43 = vpop.f32.mrb[53].mxu0  ;;  %v1798_v60 = vsel %vm1734_vm11, %v1623_v41, %v1766_v48 }
 0x46d   : > { %v1702_v39 = vadd.f32 %v1701_v59, %v1525_v40  ;;  %v1703_v6 = vpop.f32.mrb[53].mxu1  ;;  %v1800_v58 = vsel %vm1736_vm12, %v1696_v3, %v1768_v53  ;;  %vm1735_vm13 = vcmp.ge.f32.partialorder %v1625_v44, 0.0  ;;  %v1767_v61 = vmul.f32 0.2, %v1625_v44  ;;  %v1632_v62 = vpop.f32.mrb[54].mxu0 }
 0x46e   : > { %v1705_v63 = vpop.f32.mrb[54].mxu1  ;;  %v1830_v33 = vmul.f32 1.4142135, %v1798_v60  ;;  %v4621_v23 = vmul.f32 1.4142135, %v1800_v58  ;;  %vm1737_vm14 = vcmp.ge.f32.partialorder %v1698_v45, 0.0  ;;  %v1631_v11 = vadd.f32 %v1630_v43, %v1525_v40 }
 0x46f   : > { %vm1738_vm15 = vcmp.ge.f32.partialorder %v1629_v29, 0.0  ;;  %v1799_v46 = vsel %vm1735_vm13, %v1625_v44, %v1767_v61  ;;  %v1769_v1 = vmul.f32 0.2, %v1698_v45  ;;  %v1770_v15 = vmul.f32 0.2, %v1629_v29  ;;  %v1634_v18 = vpop.f32.mrb[55].mxu0 }
 0x470   : > { %vm1740_vm1 = vcmp.ge.f32.partialorder %v1702_v39, 0.0  ;;  %v1867_v7 = vpack.c.bf16 %v1830_v33, %v4615_v28  ;;  %v1869_v9 = vpack.c.bf16 %v4621_v23, %v4617_v34  ;;  %v1831_v4 = vmul.f32 1.4142135, %v1799_v46  ;;  %v1707_v55 = vpop.f32.mrb[55].mxu1 }
 0x471   : > { %v1772_v16 = vmul.f32 0.2, %v1702_v39  ;;  %v1801_v8 = vsel %vm1737_vm14, %v1698_v45, %v1769_v1  ;;  %v1802_v10 = vsel %vm1738_vm15, %v1629_v29, %v1770_v15  ;;  %v1704_v14 = vadd.f32 %v1703_v6, %v1525_v40  ;;  %v1540_v6 = vpop.permute.xlu1 %1539 }
 0x472   : > { %v1833_v12 = vmul.f32 1.4142135, %v1801_v8  ;;  %v4626_v31 = vmul.f32 1.4142135, %v1802_v10  ;;  %v1633_v36 = vadd.f32 %v1632_v62, %v1530_v52  ;;  %vm1739_vm2 = vcmp.ge.f32.partialorder %v1631_v11, 0.0 }
 0x473   : > { %v1804_v32 = vsel %vm1740_vm1, %v1702_v39, %v1772_v16  ;;  %v1771_v19 = vmul.f32 0.2, %v1631_v11  ;;  %vm1741_vm3 = vcmp.ge.f32.partialorder %v1704_v14, 0.0  ;;  %v1773_v20 = vmul.f32 0.2, %v1704_v14  ;;  %v1638_v42 = vpop.f32.mrb[56].mxu0 }
 0x474   : > { %v4628_v37 = vmul.f32 1.4142135, %v1804_v32  ;;  %vm1742_vm4 = vcmp.ge.f32.partialorder %v1633_v36, 0.0  ;;  %v1774_v24 = vmul.f32 0.2, %v1633_v36  ;;  %v1706_v13 = vadd.f32 %v1705_v63, %v1530_v52  ;;  %v1711_v26 = vpop.f32.mrb[56].mxu1 }
 0x475   : > { %v1803_v25 = vsel %vm1739_vm2, %v1631_v11, %v1771_v19  ;;  %v1635_v54 = vadd.f32 %v1634_v18, %v1530_v52  ;;  %v1708_v17 = vadd.f32 %v1707_v55, %v1530_v52  ;;  %v1868_v21 = vpack.c.bf16 %v1831_v4, %v1827_v56  ;;  %v1640_v49 = vpop.f32.mrb[57].mxu0  ;;  %v1713_v51 = vpop.f32.mrb[57].mxu1 }
 0x476   : > { %v4630_v27 = vmul.f32 1.4142135, %v1803_v25  ;;  %v1805_v50 = vsel %vm1741_vm3, %v1704_v14, %v1773_v20  ;;  %v1806_v57 = vsel %vm1742_vm4, %v1633_v36, %v1774_v24  ;;  %vm1744_vm5 = vcmp.ge.f32.partialorder %v1706_v13, 0.0  ;;  %v1642_v30 = vpop.f32.mrb[58].mxu0  ;;  %v1715_v44 = vpop.f32.mrb[58].mxu1 }
 0x477   : > { %v4632_v41 = vmul.f32 1.4142135, %v1805_v50  ;;  %v4634_v3 = vmul.f32 1.4142135, %v1806_v57  ;;  %v1776_v22 = vmul.f32 0.2, %v1706_v13  ;;  %1964 = vmatprep.subr.bf16.mxu0 %v1868_v21  ;;  %v1870_v35 = vpack.c.bf16 %v1833_v12, %v4619_v5 }
 0x478   : > { %vm1743_vm6 = vcmp.ge.f32.partialorder %v1635_v54, 0.0  ;;  %v1775_v2 = vmul.f32 0.2, %v1635_v54  ;;  %vm1745_vm7 = vcmp.ge.f32.partialorder %v1708_v17, 0.0  ;;  %v1777_v40 = vmul.f32 0.2, %v1708_v17  ;;  %1965 = vmatpush1.bf16.msra.mxu0 %v1867_v7 }
 0x479   : > { %v1871_v28 = vpack.c.bf16 %v4634_v3, %v4626_v31  ;;  %v1808_v34 = vsel %vm1744_vm5, %v1706_v13, %v1776_v22  ;;  %2037 = vmatprep.subr.bf16.mxu1 %v1870_v35  ;;  %v1639_v48 = vadd.f32 %v1638_v42, %v1535_v38  ;;  %v1712_v53 = vadd.f32 %v1711_v26, %v1535_v38  ;;  %v1644_v45 = vpop.f32.mrb[59].mxu0  ;;  %v1717_v29 = vpop.f32.mrb[59].mxu1 }
 0x47a   : > { %v1840_v47 = vmul.f32 1.4142135, %v1808_v34  ;;  %v1807_v59 = vsel %vm1743_vm6, %v1635_v54, %v1775_v2  ;;  %v1809_v56 = vsel %vm1745_vm7, %v1708_v17, %v1777_v40  ;;  %2038 = vmatpush1.bf16.msra.mxu1 %v1869_v9  ;;  %v1641_v5 = vadd.f32 %v1640_v49, %v1535_v38  ;;  %v1545_v54 = vpop.permute.xlu0 %1544  ;;  %v1550_v2 = vpop.permute.xlu1 %1549 }
 0x47b   : > { %v1839_v39 = vmul.f32 1.4142135, %v1807_v59  ;;  %v1841_v43 = vmul.f32 1.4142135, %v1809_v56  ;;  %vm1746_vm8 = vcmp.ge.f32.partialorder %v1639_v48, 0.0  ;;  %vm1748_vm9 = vcmp.ge.f32.partialorder %v1712_v53, 0.0 }
 0x47c   : > { %v1873_v60 = vpack.c.bf16 %v1840_v47, %v4628_v37  ;;  %v1778_v58 = vmul.f32 0.2, %v1639_v48  ;;  %v1780_v61 = vmul.f32 0.2, %v1712_v53  ;;  %v1648_v62 = vpop.f32.mrb[60].mxu0  ;;  %v1714_v33 = vadd.f32 %v1713_v51, %v1535_v38  ;;  %v1721_v1 = vpop.f32.mrb[60].mxu1 }
 0x47d   : > { %v1779_v63 = vmul.f32 0.2, %v1641_v5  ;;  %v1643_v23 = vadd.f32 %v1642_v30, %v1540_v6  ;;  %v1716_v46 = vadd.f32 %v1715_v44, %v1540_v6  ;;  %v1650_v15 = vpop.f32.mrb[61].mxu0  ;;  %v1645_v9 = vadd.f32 %v1644_v45, %v1540_v6  ;;  %v1723_v16 = vpop.f32.mrb[61].mxu1 }
 0x47e   : > { %v1810_v18 = vsel %vm1746_vm8, %v1639_v48, %v1778_v58  ;;  %v1812_v7 = vsel %vm1748_vm9, %v1712_v53, %v1780_v61  ;;  %v1718_v4 = vadd.f32 %v1717_v29, %v1540_v6  ;;  %v1652_v55 = vpop.f32.mrb[62].mxu0  ;;  %vm1747_vm10 = vcmp.ge.f32.partialorder %v1641_v5, 0.0  ;;  %v1725_v10 = vpop.f32.mrb[62].mxu1 }
 0x47f   : > { %v4640_v52 = vmul.f32 1.4142135, %v1810_v18  ;;  %v4642_v8 = vmul.f32 1.4142135, %v1812_v7  ;;  %vm1749_vm11 = vcmp.ge.f32.partialorder %v1714_v33, 0.0  ;;  %vm1750_vm12 = vcmp.ge.f32.partialorder %v1643_v23, 0.0 }
 0x480   : > { %v1781_v11 = vmul.f32 0.2, %v1714_v33  ;;  %vm1752_vm13 = vcmp.ge.f32.partialorder %v1716_v46, 0.0  ;;  %v1782_v14 = vmul.f32 0.2, %v1643_v23  ;;  %vm1751_vm14 = vcmp.ge.f32.partialorder %v1645_v9, 0.0 }
 0x481   : > { %v1784_v12 = vmul.f32 0.2, %v1716_v46  ;;  %vm1753_vm15 = vcmp.ge.f32.partialorder %v1718_v4, 0.0  ;;  %v1783_v32 = vmul.f32 0.2, %v1645_v9  ;;  %v1872_v37 = vpack.c.bf16 %v1839_v39, %v4630_v27  ;;  %v1654_v19 = vpop.f32.mrb[63].mxu0 }
 0x482   : > { %v1785_v36 = vmul.f32 0.2, %v1718_v4  ;;  %v1727_v20 = vpop.f32.mrb[63].mxu1  ;;  %v1811_v24 = vsel %vm1747_vm10, %v1641_v5, %v1779_v63  ;;  %v1814_v13 = vsel %vm1750_vm12, %v1643_v23, %v1782_v14  ;;  %v1874_v25 = vpack.c.bf16 %v1841_v43, %v4632_v41  ;;  %v3786_v14 = vld [vmem:[%s5063_s1 + $0x88] sm:$0xff]  }
 0x483   : > { %v1816_v42 = vsel %vm1752_vm13, %v1716_v46, %v1784_v12  ;;  %v1813_v17 = vsel %vm1749_vm11, %v1714_v33, %v1781_v11  ;;  %v1846_v21 = vmul.f32 1.4142135, %v1814_v13  ;;  %v1815_v49 = vsel %vm1751_vm14, %v1645_v9, %v1783_v32  ;;  %1966 = vmatprep.subr.bf16.mxu0 %v1872_v37  ;;  %v3785_v11 = vld [vmem:[%s5063_s1 + $0x80] sm:$0xff]   ;;  %v3787_v12 = vld [vmem:[%s5063_s1 + $0x90] sm:$0xff]   ;;  %v3788_v32 = vld [vmem:[%s5063_s1 + $0x98] sm:$0xff]  }
 0x484   : > { %v1848_v26 = vmul.f32 1.4142135, %v1816_v42  ;;  %v1817_v50 = vsel %vm1753_vm15, %v1718_v4, %v1785_v36  ;;  %2039 = vmatprep.subr.bf16.mxu1 %v1874_v25  ;;  %1967 = vmatpush1.bf16.msra.mxu0 %v1871_v28  ;;  %v1649_v27 = vadd.f32 %v1648_v62, %v1545_v54  ;;  %v1722_v57 = vadd.f32 %v1721_v1, %v1545_v54  ;;  %v1895_v36 = vpop.permute.xlu0 %1894 }
 0x485   : > { %v1875_v51 = vpack.c.bf16 %v1846_v21, %v4640_v52  ;;  %2040 = vmatpush1.bf16.msra.mxu1 %v1873_v60  ;;  %v1651_v41 = vadd.f32 %v1650_v15, %v1545_v54  ;;  %v1724_v22 = vadd.f32 %v1723_v16, %v1545_v54  ;;  %v1843_v40 = vmul.f32 1.4142135, %v1811_v24 }
 0x486   : > { %v1877_v30 = vpack.c.bf16 %v1848_v26, %v4642_v8  ;;  %vm1754_vm1 = vcmp.ge.f32.partialorder %v1649_v27, 0.0  ;;  %v1786_v35 = vmul.f32 0.2, %v1649_v27  ;;  %vm1756_vm2 = vcmp.ge.f32.partialorder %v1722_v57, 0.0 }
 0x487   : > { %v1788_v38 = vmul.f32 0.2, %v1722_v57  ;;  %v1847_v34 = vmul.f32 1.4142135, %v1815_v49  ;;  %v1849_v48 = vmul.f32 1.4142135, %v1817_v50  ;;  %v1653_v3 = vadd.f32 %v1652_v55, %v1550_v2 }
 0x488   : > { %v1818_v53 = vsel %vm1754_vm1, %v1649_v27, %v1786_v35  ;;  %v1787_v31 = vmul.f32 0.2, %v1651_v41  ;;  %v1726_v28 = vadd.f32 %v1725_v10, %v1550_v2  ;;  %v1845_v44 = vmul.f32 1.4142135, %v1813_v17 }
 0x489   : > { %v1820_v45 = vsel %vm1756_vm2, %v1722_v57, %v1788_v38  ;;  %vm1755_vm3 = vcmp.ge.f32.partialorder %v1651_v41, 0.0  ;;  %vm1757_vm4 = vcmp.ge.f32.partialorder %v1724_v22, 0.0  ;;  %v1850_v47 = vmul.f32 1.4142135, %v1818_v53 }
 0x48a   : > { %v1789_v59 = vmul.f32 0.2, %v1724_v22  ;;  %vm1758_vm5 = vcmp.ge.f32.partialorder %v1653_v3, 0.0  ;;  %vm1760_vm6 = vcmp.ge.f32.partialorder %v1726_v28, 0.0  ;;  %v1790_v56 = vmul.f32 0.2, %v1653_v3 }
 0x48b   : > { %v1792_v5 = vmul.f32 0.2, %v1726_v28  ;;  %v1655_v29 = vadd.f32 %v1654_v19, %v1550_v2  ;;  %v1728_v39 = vadd.f32 %v1727_v20, %v1550_v2  ;;  %v1852_v43 = vmul.f32 1.4142135, %v1820_v45  ;;  %v1900_v19 = vpop.permute.xlu1 %1899 }
 0x48c   : > { %v1819_v6 = vsel %vm1755_vm3, %v1651_v41, %v1787_v31  ;;  %v1876_v60 = vpack.c.bf16 %v1847_v34, %v1843_v40  ;;  %v1878_v58 = vpack.c.bf16 %v1849_v48, %v1845_v44  ;;  %v1822_v61 = vsel %vm1758_vm5, %v1653_v3, %v1790_v56 }
 0x48d   : > { %v1824_v62 = vsel %vm1760_vm6, %v1726_v28, %v1792_v5  ;;  %vm1759_vm7 = vcmp.ge.f32.partialorder %v1655_v29, 0.0  ;;  %v1791_v63 = vmul.f32 0.2, %v1655_v29  ;;  %v1854_v33 = vmul.f32 1.4142135, %v1822_v61  ;;  %v1905_v28 = vpop.permute.xlu0 %1904 }
 0x48e   : > { %v1856_v23 = vmul.f32 1.4142135, %v1824_v62  ;;  %vm1761_vm8 = vcmp.ge.f32.partialorder %v1728_v39, 0.0  ;;  %1968 = vmatprep.subr.bf16.mxu0 %v1876_v60  ;;  %2041 = vmatprep.subr.bf16.mxu1 %v1878_v58  ;;  %v1821_v46 = vsel %vm1757_vm4, %v1724_v22, %v1789_v59  ;;  %v1793_v15 = vmul.f32 0.2, %v1728_v39 }
 0x48f   : > { %v1823_v1 = vsel %vm1759_vm7, %v1655_v29, %v1791_v63  ;;  %1969 = vmatpush1.bf16.msra.mxu0 %v1875_v51  ;;  %2042 = vmatpush1.bf16.msra.mxu1 %v1877_v30  ;;  %v1851_v18 = vmul.f32 1.4142135, %v1819_v6  ;;  %v1879_v7 = vpack.c.bf16 %v1854_v33, %v1850_v47  ;;  %v1853_v55 = vmul.f32 1.4142135, %v1821_v46 }
 0x490   : > { %v1881_v9 = vpack.c.bf16 %v1856_v23, %v1852_v43  ;;  %v1855_v4 = vmul.f32 1.4142135, %v1823_v1  ;;  %v1825_v16 = vsel %vm1761_vm8, %v1728_v39, %v1793_v15 }
 0x491   : > { %v1857_v52 = vmul.f32 1.4142135, %v1825_v16 }
 0x492   : > { %v1880_v8 = vpack.c.bf16 %v1855_v4, %v1851_v18 }
 0x493   : > { %v1882_v10 = vpack.c.bf16 %v1857_v52, %v1853_v55 }
 0x494   : > { %1970 = vmatprep.subr.bf16.mxu0 %v1880_v8  ;;  %v1910_v8 = vpop.permute.xlu1 %1909 }
 0x495   : > { %1971 = vmatpush1.bf16.msra.mxu0 %v1879_v7  ;;  %2043 = vmatprep.subr.bf16.mxu1 %v1882_v10 }
 0x496   : > { %2044 = vmatpush1.bf16.msra.mxu1 %v1881_v9 }
 0x498   : > { %3627 = vmatmul.mubr.msk.bf16.vlgmr.msra.gmra.mrb[64].mxu0 %vm431_vm0, %v3785_v11 }
 0x499   : > { %2006 = vmatprep.mubr.bf16.mxu0 %v3879_v0  ;;  %3631 = vmatmul.mubr.msk.bf16.vlgmr.msra.gmra.mrb[64].mxu1 %vm431_vm0, %v3785_v11 }
 0x49a   : > { %2079 = vmatprep.mubr.bf16.mxu1 %v3879_v0 }
 0x4a0   : > { %3628 = vmatmul.mubr.msk.bf16.gmra.mrb[68].mxu0 %vm431_vm0, %v3786_v14 }
 0x4a1   : > { %2016 = vmatprep.mubr.bf16.mxu0 %v3879_v0  ;;  %3632 = vmatmul.mubr.msk.bf16.gmra.mrb[68].mxu1 %vm431_vm0, %v3786_v14 }
 0x4a2   : > { %2089 = vmatprep.mubr.bf16.mxu1 %v3879_v0 }
 0x4a8   : > { %3629 = vmatmul.mubr.msk.bf16.gmra.mrb[72].mxu0 %vm431_vm0, %v3787_v12 }
 0x4a9   : > { %2026 = vmatprep.mubr.bf16.mxu0 %v3879_v0  ;;  %3633 = vmatmul.mubr.msk.bf16.gmra.mrb[72].mxu1 %vm431_vm0, %v3787_v12 }
 0x4aa   : > { %2099 = vmatprep.mubr.bf16.mxu1 %v3879_v0 }
 0x4b0   : > { %3630 = vmatmul.mubr.msk.bf16.gmra.mrb[76].mxu0 %vm431_vm0, %v3788_v32 }
 0x4b1   : > { %2376 = vmatprep.mubr.bf16.mxu0 %v3879_v0  ;;  %3634 = vmatmul.mubr.msk.bf16.gmra.mrb[76].mxu1 %vm431_vm0, %v3788_v32 }
 0x4b2   : > { %2449 = vmatprep.mubr.bf16.mxu1 %v3879_v0 }
 0x56b   : > { %v1998_v37 = vpop.f32.mrb[64].mxu0 }
 0x56c   : > { %v1999_v20 = vadd.f32 %v1998_v37, %v1895_v36  ;;  %v2000_v24 = vpop.f32.mrb[65].mxu0  ;;  %v2071_v13 = vpop.f32.mrb[64].mxu1 }
 0x56d   : > { %v2001_v42 = vadd.f32 %v2000_v24, %v1895_v36  ;;  %v2002_v25 = vpop.f32.mrb[66].mxu0  ;;  %v2072_v17 = vadd.f32 %v2071_v13, %v1895_v36  ;;  %v2073_v21 = vpop.f32.mrb[65].mxu1 }
 0x56e   : > { %vm2110_vm9 = vcmp.ge.f32.partialorder %v1999_v20, 0.0  ;;  %v2142_v54 = vmul.f32 0.2, %v1999_v20  ;;  %v2003_v26 = vadd.f32 %v2002_v25, %v1900_v19  ;;  %v2004_v49 = vpop.f32.mrb[67].mxu0  ;;  %v2074_v27 = vadd.f32 %v2073_v21, %v1895_v36  ;;  %v2075_v57 = vpop.f32.mrb[66].mxu1 }
 0x56f   : > { %vm2111_vm10 = vcmp.ge.f32.partialorder %v2001_v42, 0.0  ;;  %v2143_v50 = vmul.f32 0.2, %v2001_v42  ;;  %v2005_v51 = vadd.f32 %v2004_v49, %v1900_v19  ;;  %vm2112_vm11 = vcmp.ge.f32.partialorder %v2072_v17, 0.0  ;;  %v2077_v22 = vpop.f32.mrb[67].mxu1 }
 0x570   : > { %v2174_v30 = vsel %vm2110_vm9, %v1999_v20, %v2142_v54  ;;  %v2144_v41 = vmul.f32 0.2, %v2072_v17  ;;  %v2145_v2 = vmul.f32 0.2, %v2074_v27  ;;  %vm2114_vm12 = vcmp.ge.f32.partialorder %v2003_v26, 0.0 }
 0x571   : > { %v4682_v35 = vmul.f32 1.4142135, %v2174_v30  ;;  %v2175_v38 = vsel %vm2111_vm10, %v2001_v42, %v2143_v50  ;;  %vm2113_vm13 = vcmp.ge.f32.partialorder %v2074_v27, 0.0  ;;  %v2146_v34 = vmul.f32 0.2, %v2003_v26 }
 0x572   : > { %v2176_v40 = vsel %vm2112_vm11, %v2072_v17, %v2144_v41  ;;  %v2076_v48 = vadd.f32 %v2075_v57, %v1900_v19  ;;  %v4684_v53 = vmul.f32 1.4142135, %v2175_v38  ;;  %vm2115_vm14 = vcmp.ge.f32.partialorder %v2005_v51, 0.0  ;;  %v1915_v38 = vpop.permute.xlu0 %1914 }
 0x573   : > { %v2147_v31 = vmul.f32 0.2, %v2005_v51  ;;  %v2008_v3 = vpop.f32.mrb[68].mxu0  ;;  %v4686_v44 = vmul.f32 1.4142135, %v2176_v40  ;;  %v2178_v45 = vsel %vm2114_vm12, %v2003_v26, %v2146_v34  ;;  %v2177_v56 = vsel %vm2113_vm13, %v2074_v27, %v2145_v2 }
 0x574   : > { %vm2116_vm15 = vcmp.ge.f32.partialorder %v2076_v48, 0.0  ;;  %v2148_v47 = vmul.f32 0.2, %v2076_v48  ;;  %v2010_v59 = vpop.f32.mrb[69].mxu0  ;;  %v4688_v5 = vmul.f32 1.4142135, %v2178_v45  ;;  %v2078_v29 = vadd.f32 %v2077_v22, %v1900_v19 }
 0x575   : > { %v2009_v39 = vadd.f32 %v2008_v3, %v1905_v28  ;;  %v2081_v43 = vpop.f32.mrb[68].mxu1  ;;  %v2012_v6 = vpop.f32.mrb[70].mxu0  ;;  %v2179_v58 = vsel %vm2115_vm14, %v2005_v51, %v2147_v31  ;;  %v2011_v62 = vadd.f32 %v2010_v59, %v1905_v28  ;;  %v2209_v9 = vmul.f32 1.4142135, %v2177_v56 }
 0x576   : > { %v2180_v60 = vsel %vm2116_vm15, %v2076_v48, %v2148_v47  ;;  %v2082_v61 = vadd.f32 %v2081_v43, %v1905_v28  ;;  %v2083_v63 = vpop.f32.mrb[69].mxu1  ;;  %v2014_v33 = vpop.f32.mrb[71].mxu0  ;;  %v2247_v23 = vpack.c.bf16 %v4688_v5, %v4682_v35  ;;  %vm2117_vm1 = vcmp.ge.f32.partialorder %v2078_v29, 0.0 }
 0x577   : > { %v4693_v46 = vmul.f32 1.4142135, %v2180_v60  ;;  %v2149_v1 = vmul.f32 0.2, %v2078_v29  ;;  %v2085_v15 = vpop.f32.mrb[70].mxu1  ;;  %vm2118_vm2 = vcmp.ge.f32.partialorder %v2009_v39, 0.0  ;;  %v2084_v12 = vadd.f32 %v2083_v63, %v1905_v28  ;;  %v1920_v43 = vpop.permute.xlu1 %1919 }
 0x578   : > { %v2150_v18 = vmul.f32 0.2, %v2009_v39  ;;  %vm2120_vm3 = vcmp.ge.f32.partialorder %v2082_v61, 0.0  ;;  %v2152_v7 = vmul.f32 0.2, %v2082_v61  ;;  %v2087_v52 = vpop.f32.mrb[71].mxu1  ;;  %v2013_v37 = vadd.f32 %v2012_v6, %v1910_v8 }
 0x579   : > { %v2249_v4 = vpack.c.bf16 %v4693_v46, %v4686_v44  ;;  %v2211_v16 = vmul.f32 1.4142135, %v2179_v58  ;;  %v2181_v55 = vsel %vm2117_vm1, %v2078_v29, %v2149_v1  ;;  %v2151_v14 = vmul.f32 0.2, %v2011_v62 }
 0x57a   : > { %v2182_v10 = vsel %vm2118_vm2, %v2009_v39, %v2150_v18  ;;  %v2184_v11 = vsel %vm2120_vm3, %v2082_v61, %v2152_v7  ;;  %v2213_v32 = vmul.f32 1.4142135, %v2181_v55  ;;  %vm2119_vm4 = vcmp.ge.f32.partialorder %v2011_v62, 0.0 }
 0x57b   : > { %v4697_v36 = vmul.f32 1.4142135, %v2182_v10  ;;  %v2018_v19 = vpop.f32.mrb[72].mxu0  ;;  %v4699_v20 = vmul.f32 1.4142135, %v2184_v11  ;;  %vm2121_vm5 = vcmp.ge.f32.partialorder %v2084_v12, 0.0  ;;  %v2086_v13 = vadd.f32 %v2085_v15, %v1910_v8 }
 0x57c   : > { %v2153_v24 = vmul.f32 0.2, %v2084_v12  ;;  %v2020_v42 = vpop.f32.mrb[73].mxu0  ;;  %vm2122_vm6 = vcmp.ge.f32.partialorder %v2013_v37, 0.0  ;;  %v2154_v25 = vmul.f32 0.2, %v2013_v37  ;;  %v2015_v54 = vadd.f32 %v2014_v33, %v1910_v8 }
 0x57d   : > { %v2088_v17 = vadd.f32 %v2087_v52, %v1910_v8  ;;  %v2091_v21 = vpop.f32.mrb[72].mxu1  ;;  %v2022_v26 = vpop.f32.mrb[74].mxu0  ;;  %v2183_v49 = vsel %vm2119_vm4, %v2011_v62, %v2151_v14  ;;  %vm2124_vm7 = vcmp.ge.f32.partialorder %v2086_v13, 0.0  ;;  %v2156_v50 = vmul.f32 0.2, %v2086_v13 }
 0x57e   : > { %v2248_v27 = vpack.c.bf16 %v2211_v16, %v4684_v53  ;;  %v2093_v57 = vpop.f32.mrb[73].mxu1  ;;  %v2024_v51 = vpop.f32.mrb[75].mxu0  ;;  %v2185_v30 = vsel %vm2121_vm5, %v2084_v12, %v2153_v24  ;;  %v2186_v41 = vsel %vm2122_vm6, %v2013_v37, %v2154_v25  ;;  %vm2123_vm8 = vcmp.ge.f32.partialorder %v2015_v54, 0.0 }
 0x57f   : > { %v2155_v22 = vmul.f32 0.2, %v2015_v54  ;;  %v2095_v35 = vpop.f32.mrb[74].mxu1  ;;  %v4703_v2 = vmul.f32 1.4142135, %v2186_v41  ;;  %v2188_v40 = vsel %vm2124_vm7, %v2086_v13, %v2156_v50  ;;  %vm2125_vm9 = vcmp.ge.f32.partialorder %v2088_v17, 0.0 }
 0x580   : > { %v2157_v34 = vmul.f32 0.2, %v2088_v17  ;;  %2344 = vmatprep.subr.bf16.mxu0 %v2248_v27  ;;  %v2097_v48 = vpop.f32.mrb[75].mxu1  ;;  %v4705_v31 = vmul.f32 1.4142135, %v2188_v40  ;;  %v2250_v53 = vpack.c.bf16 %v2213_v32, %v2209_v9  ;;  %v2019_v28 = vadd.f32 %v2018_v19, %v1915_v38 }
 0x581   : > { %v2187_v3 = vsel %vm2123_vm8, %v2015_v54, %v2155_v22  ;;  %2345 = vmatpush1.bf16.msra.mxu0 %v2247_v23  ;;  %v2215_v44 = vmul.f32 1.4142135, %v2183_v49  ;;  %v2217_v45 = vmul.f32 1.4142135, %v2185_v30  ;;  %v2251_v47 = vpack.c.bf16 %v4703_v2, %v4697_v36  ;;  %v1925_v54 = vpop.permute.xlu0 %1924  ;;  %v1930_v2 = vpop.permute.xlu1 %1929 }
 0x582   : > { %v2092_v59 = vadd.f32 %v2091_v21, %v1915_v38  ;;  %v2253_v56 = vpack.c.bf16 %v4705_v31, %v4699_v20  ;;  %v2219_v5 = vmul.f32 1.4142135, %v2187_v3  ;;  %2417 = vmatprep.subr.bf16.mxu1 %v2250_v53  ;;  %vm2126_vm10 = vcmp.ge.f32.partialorder %v2019_v28, 0.0 }
 0x583   : > { %v2158_v29 = vmul.f32 0.2, %v2019_v28  ;;  %v2028_v39 = vpop.f32.mrb[76].mxu0  ;;  %v2189_v6 = vsel %vm2125_vm9, %v2088_v17, %v2157_v34  ;;  %2418 = vmatpush1.bf16.msra.mxu1 %v2249_v4  ;;  %v2021_v58 = vadd.f32 %v2020_v42, %v1915_v38  ;;  %v2094_v63 = vadd.f32 %v2093_v57, %v1915_v38 }
 0x584   : > { %vm2128_vm11 = vcmp.ge.f32.partialorder %v2092_v59, 0.0  ;;  %v2160_v60 = vmul.f32 0.2, %v2092_v59  ;;  %v2030_v61 = vpop.f32.mrb[77].mxu0  ;;  %v2023_v33 = vadd.f32 %v2022_v26, %v1920_v43  ;;  %v2096_v23 = vadd.f32 %v2095_v35, %v1920_v43  ;;  %v2101_v46 = vpop.f32.mrb[76].mxu1 }
 0x585   : > { %v2190_v62 = vsel %vm2126_vm10, %v2019_v28, %v2158_v29  ;;  %v2032_v1 = vpop.f32.mrb[78].mxu0  ;;  %vm2127_vm12 = vcmp.ge.f32.partialorder %v2021_v58, 0.0  ;;  %v2159_v18 = vmul.f32 0.2, %v2021_v58  ;;  %v2025_v7 = vadd.f32 %v2024_v51, %v1920_v43  ;;  %v2103_v9 = vpop.f32.mrb[77].mxu1 }
 0x586   : > { %v2192_v15 = vsel %vm2128_vm11, %v2092_v59, %v2160_v60  ;;  %v2221_v16 = vmul.f32 1.4142135, %v2189_v6  ;;  %v4712_v55 = vmul.f32 1.4142135, %v2190_v62  ;;  %vm2130_vm13 = vcmp.ge.f32.partialorder %v2023_v33, 0.0  ;;  %v2105_v8 = vpop.f32.mrb[78].mxu1 }
 0x587   : > { %v2162_v4 = vmul.f32 0.2, %v2023_v33  ;;  %vm2132_vm14 = vcmp.ge.f32.partialorder %v2096_v23, 0.0  ;;  %v2164_v52 = vmul.f32 0.2, %v2096_v23  ;;  %v2191_v11 = vsel %vm2127_vm12, %v2021_v58, %v2159_v18  ;;  %v2034_v12 = vpop.f32.mrb[79].mxu0 }
 0x588   : > { %v4714_v10 = vmul.f32 1.4142135, %v2192_v15  ;;  %v2161_v14 = vmul.f32 0.2, %v2094_v63  ;;  %v2163_v37 = vmul.f32 0.2, %v2025_v7  ;;  %v2098_v19 = vadd.f32 %v2097_v48, %v1920_v43 }
 0x589   : > { %v2194_v32 = vsel %vm2130_vm13, %v2023_v33, %v2162_v4  ;;  %v2196_v36 = vsel %vm2132_vm14, %v2096_v23, %v2164_v52  ;;  %v2107_v24 = vpop.f32.mrb[79].mxu1  ;;  %vm2131_vm15 = vcmp.ge.f32.partialorder %v2025_v7, 0.0  ;;  %v2252_v25 = vpack.c.bf16 %v2219_v5, %v2215_v44 }
 0x58a   : > { %v4716_v13 = vmul.f32 1.4142135, %v2194_v32  ;;  %v4718_v42 = vmul.f32 1.4142135, %v2196_v36  ;;  %vm2129_vm1 = vcmp.ge.f32.partialorder %v2094_v63, 0.0  ;;  %vm2133_vm2 = vcmp.ge.f32.partialorder %v2098_v19, 0.0  ;;  %v2275_v32 = vpop.permute.xlu0 %2274 }
 0x58b   : > { %v2165_v17 = vmul.f32 0.2, %v2098_v19  ;;  %v2254_v21 = vpack.c.bf16 %v2221_v16, %v2217_v45  ;;  %2346 = vmatprep.subr.bf16.mxu0 %v2252_v25  ;;  %v2029_v50 = vadd.f32 %v2028_v39, %v1925_v54  ;;  %v2102_v27 = vadd.f32 %v2101_v46, %v1925_v54 }
 0x58c   : > { %v2255_v26 = vpack.c.bf16 %v4716_v13, %v4712_v55  ;;  %v2257_v49 = vpack.c.bf16 %v4718_v42, %v4714_v10  ;;  %v2223_v57 = vmul.f32 1.4142135, %v2191_v11  ;;  %v2195_v51 = vsel %vm2131_vm15, %v2025_v7, %v2163_v37  ;;  %2347 = vmatpush1.bf16.msra.mxu0 %v2251_v47  ;;  %v3790_v11 = vld [vmem:[%s5063_s1 + $0xa8] sm:$0xff]  }
 0x58d   : > { %2419 = vmatprep.subr.bf16.mxu1 %v2254_v21  ;;  %v2031_v30 = vadd.f32 %v2030_v61, %v1925_v54  ;;  %v2104_v41 = vadd.f32 %v2103_v9, %v1925_v54  ;;  %v2193_v22 = vsel %vm2129_vm1, %v2094_v63, %v2161_v14  ;;  %v2197_v35 = vsel %vm2133_vm2, %v2098_v19, %v2165_v17  ;;  %v3791_v14 = vld [vmem:[%s5063_s1 + $0xb0] sm:$0xff]  }
 0x58e   : > { %2420 = vmatpush1.bf16.msra.mxu1 %v2253_v56  ;;  %vm2134_vm3 = vcmp.ge.f32.partialorder %v2029_v50, 0.0  ;;  %v2166_v38 = vmul.f32 0.2, %v2029_v50  ;;  %vm2136_vm4 = vcmp.ge.f32.partialorder %v2102_v27, 0.0  ;;  %v2168_v40 = vmul.f32 0.2, %v2102_v27 }
 0x58f   : > { %vm2135_vm5 = vcmp.ge.f32.partialorder %v2031_v30, 0.0  ;;  %v2167_v34 = vmul.f32 0.2, %v2031_v30  ;;  %v2227_v48 = vmul.f32 1.4142135, %v2195_v51  ;;  %v2033_v53 = vadd.f32 %v2032_v1, %v1930_v2 }
 0x590   : > { %v2198_v3 = vsel %vm2134_vm3, %v2029_v50, %v2166_v38  ;;  %v2106_v28 = vadd.f32 %v2105_v8, %v1930_v2  ;;  %v2225_v44 = vmul.f32 1.4142135, %v2193_v22  ;;  %v2229_v45 = vmul.f32 1.4142135, %v2197_v35  ;;  %v3789_v8 = vld [vmem:[%s5063_s1 + $0xa0] sm:$0xff]  }
 0x591   : > { %vm2137_vm6 = vcmp.ge.f32.partialorder %v2104_v41, 0.0  ;;  %v2035_v47 = vadd.f32 %v2034_v12, %v1930_v2  ;;  %v2200_v59 = vsel %vm2136_vm4, %v2102_v27, %v2168_v40  ;;  %v2199_v5 = vsel %vm2135_vm5, %v2031_v30, %v2167_v34  ;;  %v3792_v12 = vld [vmem:[%s5063_s1 + $0xb8] sm:$0xff]  }
 0x592   : > { %v2169_v29 = vmul.f32 0.2, %v2104_v41  ;;  %vm2138_vm7 = vcmp.ge.f32.partialorder %v2033_v53, 0.0  ;;  %v2230_v20 = vmul.f32 1.4142135, %v2198_v3  ;;  %vm2140_vm8 = vcmp.ge.f32.partialorder %v2106_v28, 0.0 }
 0x593   : > { %v2170_v31 = vmul.f32 0.2, %v2033_v53  ;;  %vm2139_vm9 = vcmp.ge.f32.partialorder %v2035_v47, 0.0  ;;  %v2172_v56 = vmul.f32 0.2, %v2106_v28  ;;  %v2108_v43 = vadd.f32 %v2107_v24, %v1930_v2  ;;  %v2280_v24 = vpop.permute.xlu1 %2279 }
 0x594   : > { %v2171_v39 = vmul.f32 0.2, %v2035_v47  ;;  %v2256_v6 = vpack.c.bf16 %v2227_v48, %v2223_v57  ;;  %v2232_v60 = vmul.f32 1.4142135, %v2200_v59  ;;  %v2231_v58 = vmul.f32 1.4142135, %v2199_v5 }
 0x595   : > { %v2202_v61 = vsel %vm2138_vm7, %v2033_v53, %v2170_v31  ;;  %v2258_v62 = vpack.c.bf16 %v2229_v45, %v2225_v44  ;;  %v2204_v33 = vsel %vm2140_vm8, %v2106_v28, %v2172_v56  ;;  %vm2141_vm10 = vcmp.ge.f32.partialorder %v2108_v43, 0.0 }
 0x596   : > { %v2234_v63 = vmul.f32 1.4142135, %v2202_v61  ;;  %v2203_v23 = vsel %vm2139_vm9, %v2035_v47, %v2171_v39  ;;  %2348 = vmatprep.subr.bf16.mxu0 %v2256_v6  ;;  %v2201_v46 = vsel %vm2137_vm6, %v2104_v41, %v2169_v29  ;;  %v2236_v1 = vmul.f32 1.4142135, %v2204_v33 }
 0x597   : > { %v2235_v15 = vmul.f32 1.4142135, %v2203_v23  ;;  %v2173_v18 = vmul.f32 0.2, %v2108_v43  ;;  %2421 = vmatprep.subr.bf16.mxu1 %v2258_v62  ;;  %2349 = vmatpush1.bf16.msra.mxu0 %v2255_v26  ;;  %v2233_v4 = vmul.f32 1.4142135, %v2201_v46 }
 0x598   : > { %v2259_v7 = vpack.c.bf16 %v2234_v63, %v2230_v20  ;;  %2422 = vmatpush1.bf16.msra.mxu1 %v2257_v49  ;;  %v2261_v9 = vpack.c.bf16 %v2236_v1, %v2232_v60  ;;  %v2285_v20 = vpop.permute.xlu0 %2284 }
 0x599   : > { %v2205_v16 = vsel %vm2141_vm10, %v2108_v43, %v2173_v18  ;;  %v2260_v55 = vpack.c.bf16 %v2235_v15, %v2231_v58 }
 0x59a   : > { %v2237_v52 = vmul.f32 1.4142135, %v2205_v16 }
 0x59b   : > { %2350 = vmatprep.subr.bf16.mxu0 %v2260_v55 }
 0x59c   : > { %v2262_v10 = vpack.c.bf16 %v2237_v52, %v2233_v4  ;;  %2351 = vmatpush1.bf16.msra.mxu0 %v2259_v7  ;;  %v2290_v4 = vpop.permute.xlu1 %2289 }
 0x59e   : > { %2423 = vmatprep.subr.bf16.mxu1 %v2262_v10 }
 0x59f   : > { %2424 = vmatpush1.bf16.msra.mxu1 %v2261_v9  ;;  %3655 = vmatmul.mubr.msk.bf16.vlgmr.msra.gmra.mrb[80].mxu0 %vm431_vm0, %v3789_v8 }
 0x5a0   : > { %2386 = vmatprep.mubr.bf16.mxu0 %v3879_v0 }
 0x5a2   : > { %3659 = vmatmul.mubr.msk.bf16.vlgmr.msra.gmra.mrb[80].mxu1 %vm431_vm0, %v3789_v8 }
 0x5a3   : > { %2459 = vmatprep.mubr.bf16.mxu1 %v3879_v0 }
 0x5a7   : > { %3656 = vmatmul.mubr.msk.bf16.gmra.mrb[84].mxu0 %vm431_vm0, %v3790_v11 }
 0x5a8   : > { %2396 = vmatprep.mubr.bf16.mxu0 %v3879_v0 }
 0x5aa   : > { %3660 = vmatmul.mubr.msk.bf16.gmra.mrb[84].mxu1 %vm431_vm0, %v3790_v11 }
 0x5ab   : > { %2469 = vmatprep.mubr.bf16.mxu1 %v3879_v0 }
 0x5af   : > { %3657 = vmatmul.mubr.msk.bf16.gmra.mrb[88].mxu0 %vm431_vm0, %v3791_v14 }
 0x5b0   : > { %2406 = vmatprep.mubr.bf16.mxu0 %v3879_v0 }
 0x5b2   : > { %3661 = vmatmul.mubr.msk.bf16.gmra.mrb[88].mxu1 %vm431_vm0, %v3791_v14 }
 0x5b3   : > { %2479 = vmatprep.mubr.bf16.mxu1 %v3879_v0 }
 0x5b7   : > { %3658 = vmatmul.mubr.msk.bf16.gmra.mrb[92].mxu0 %vm431_vm0, %v3792_v12 }
 0x5b8   : > { %2756 = vmatprep.mubr.bf16.mxu0 %v3879_v0 }
 0x5ba   : > { %3662 = vmatmul.mubr.msk.bf16.gmra.mrb[92].mxu1 %vm431_vm0, %v3792_v12 }
 0x5bb   : > { %2829 = vmatprep.mubr.bf16.mxu1 %v3879_v0 }
 0x672   : > { %v2378_v36 = vpop.f32.mrb[80].mxu0 }
 0x673   : > { %v2379_v37 = vadd.f32 %v2378_v36, %v2275_v32  ;;  %v2380_v19 = vpop.f32.mrb[81].mxu0 }
 0x674   : > { %v2381_v13 = vadd.f32 %v2380_v19, %v2275_v32  ;;  %v2382_v42 = vpop.f32.mrb[82].mxu0 }
 0x675   : > { %vm2490_vm11 = vcmp.ge.f32.partialorder %v2379_v37, 0.0  ;;  %v2522_v25 = vmul.f32 0.2, %v2379_v37  ;;  %v2451_v54 = vpop.f32.mrb[80].mxu1  ;;  %v2383_v17 = vadd.f32 %v2382_v42, %v2280_v24  ;;  %v2384_v21 = vpop.f32.mrb[83].mxu0 }
 0x676   : > { %v2452_v26 = vadd.f32 %v2451_v54, %v2275_v32  ;;  %vm2491_vm12 = vcmp.ge.f32.partialorder %v2381_v13, 0.0  ;;  %v2523_v49 = vmul.f32 0.2, %v2381_v13  ;;  %v2453_v50 = vpop.f32.mrb[81].mxu1  ;;  %v2385_v27 = vadd.f32 %v2384_v21, %v2280_v24 }
 0x677   : > { %v2554_v57 = vsel %vm2490_vm11, %v2379_v37, %v2522_v25  ;;  %v2454_v51 = vadd.f32 %v2453_v50, %v2275_v32  ;;  %vm2494_vm13 = vcmp.ge.f32.partialorder %v2383_v17, 0.0  ;;  %v2526_v30 = vmul.f32 0.2, %v2383_v17  ;;  %v2455_v41 = vpop.f32.mrb[82].mxu1 }
 0x678   : > { %v4756_v22 = vmul.f32 1.4142135, %v2554_v57  ;;  %vm2492_vm14 = vcmp.ge.f32.partialorder %v2452_v26, 0.0  ;;  %v2524_v35 = vmul.f32 0.2, %v2452_v26  ;;  %v2555_v38 = vsel %vm2491_vm12, %v2381_v13, %v2523_v49  ;;  %v2457_v2 = vpop.f32.mrb[83].mxu1 }
 0x679   : > { %v4758_v40 = vmul.f32 1.4142135, %v2555_v38  ;;  %vm2493_vm15 = vcmp.ge.f32.partialorder %v2454_v51, 0.0  ;;  %v2525_v34 = vmul.f32 0.2, %v2454_v51  ;;  %v2558_v48 = vsel %vm2494_vm13, %v2383_v17, %v2526_v30  ;;  %v2295_v38 = vpop.permute.xlu0 %2294 }
 0x67a   : > { %v2556_v3 = vsel %vm2492_vm14, %v2452_v26, %v2524_v35  ;;  %v4760_v53 = vmul.f32 1.4142135, %v2558_v48  ;;  %v2456_v28 = vadd.f32 %v2455_v41, %v2280_v24  ;;  %vm2495_vm1 = vcmp.ge.f32.partialorder %v2385_v27, 0.0  ;;  %v2388_v44 = vpop.f32.mrb[84].mxu0 }
 0x67b   : > { %v4762_v45 = vmul.f32 1.4142135, %v2556_v3  ;;  %v2557_v47 = vsel %vm2493_vm15, %v2454_v51, %v2525_v34  ;;  %v2527_v59 = vmul.f32 0.2, %v2385_v27  ;;  %v2458_v5 = vadd.f32 %v2457_v2, %v2280_v24  ;;  %v2390_v29 = vpop.f32.mrb[85].mxu0 }
 0x67c   : > { %v4764_v31 = vmul.f32 1.4142135, %v2557_v47  ;;  %v2627_v56 = vpack.c.bf16 %v4760_v53, %v4756_v22  ;;  %vm2496_vm2 = vcmp.ge.f32.partialorder %v2456_v28, 0.0  ;;  %v2528_v39 = vmul.f32 0.2, %v2456_v28  ;;  %v2392_v43 = vpop.f32.mrb[86].mxu0 }
 0x67d   : > { %v2559_v6 = vsel %vm2495_vm1, %v2385_v27, %v2527_v59  ;;  %vm2497_vm3 = vcmp.ge.f32.partialorder %v2458_v5, 0.0  ;;  %v2529_v60 = vmul.f32 0.2, %v2458_v5  ;;  %v2389_v58 = vadd.f32 %v2388_v44, %v2285_v20  ;;  %v2461_v61 = vpop.f32.mrb[84].mxu1  ;;  %v2394_v62 = vpop.f32.mrb[87].mxu0 }
 0x67e   : > { %v2560_v63 = vsel %vm2496_vm2, %v2456_v28, %v2528_v39  ;;  %v2591_v33 = vmul.f32 1.4142135, %v2559_v6  ;;  %v2462_v23 = vadd.f32 %v2461_v61, %v2285_v20  ;;  %v2391_v46 = vadd.f32 %v2390_v29, %v2285_v20  ;;  %v2463_v1 = vpop.f32.mrb[85].mxu1  ;;  %v2300_v6 = vpop.permute.xlu1 %2299 }
 0x67f   : > { %v2592_v15 = vmul.f32 1.4142135, %v2560_v63  ;;  %v2561_v18 = vsel %vm2497_vm3, %v2458_v5, %v2529_v60  ;;  %vm2498_vm4 = vcmp.ge.f32.partialorder %v2389_v58, 0.0  ;;  %v2530_v7 = vmul.f32 0.2, %v2389_v58  ;;  %v2465_v9 = vpop.f32.mrb[86].mxu1 }
 0x680   : > { %v2593_v16 = vmul.f32 1.4142135, %v2561_v18  ;;  %vm2500_vm5 = vcmp.ge.f32.partialorder %v2462_v23, 0.0  ;;  %v2532_v55 = vmul.f32 0.2, %v2462_v23  ;;  %v2464_v11 = vadd.f32 %v2463_v1, %v2285_v20  ;;  %v2467_v14 = vpop.f32.mrb[87].mxu1 }
 0x681   : > { %v2629_v52 = vpack.c.bf16 %v2592_v15, %v4762_v45  ;;  %v2562_v8 = vsel %vm2498_vm4, %v2389_v58, %v2530_v7  ;;  %v2531_v10 = vmul.f32 0.2, %v2391_v46  ;;  %vm2499_vm6 = vcmp.ge.f32.partialorder %v2391_v46, 0.0 }
 0x682   : > { %v2564_v12 = vsel %vm2500_vm5, %v2462_v23, %v2532_v55  ;;  %v2393_v32 = vadd.f32 %v2392_v43, %v2290_v4  ;;  %v2466_v36 = vadd.f32 %v2465_v9, %v2290_v4  ;;  %v2398_v37 = vpop.f32.mrb[88].mxu0  ;;  %v4769_v19 = vmul.f32 1.4142135, %v2562_v8 }
 0x683   : > { %vm2501_vm7 = vcmp.ge.f32.partialorder %v2464_v11, 0.0  ;;  %v2533_v24 = vmul.f32 0.2, %v2464_v11  ;;  %v2400_v13 = vpop.f32.mrb[89].mxu0  ;;  %v4771_v42 = vmul.f32 1.4142135, %v2564_v12  ;;  %v2563_v54 = vsel %vm2499_vm6, %v2391_v46, %v2531_v10 }
 0x684   : > { %vm2502_vm8 = vcmp.ge.f32.partialorder %v2393_v32, 0.0  ;;  %v2534_v25 = vmul.f32 0.2, %v2393_v32  ;;  %vm2504_vm9 = vcmp.ge.f32.partialorder %v2466_v36, 0.0  ;;  %v2536_v17 = vmul.f32 0.2, %v2466_v36 }
 0x685   : > { %v2395_v21 = vadd.f32 %v2394_v62, %v2290_v4  ;;  %v2468_v26 = vadd.f32 %v2467_v14, %v2290_v4  ;;  %v2471_v49 = vpop.f32.mrb[88].mxu1  ;;  %v2402_v50 = vpop.f32.mrb[90].mxu0  ;;  %v2565_v27 = vsel %vm2501_vm7, %v2464_v11, %v2533_v24  ;;  %v2628_v51 = vpack.c.bf16 %v2591_v33, %v4758_v40 }
 0x686   : > { %v2566_v57 = vsel %vm2502_vm8, %v2393_v32, %v2534_v25  ;;  %v2630_v30 = vpack.c.bf16 %v2593_v16, %v4764_v31  ;;  %v2473_v41 = vpop.f32.mrb[89].mxu1  ;;  %v2404_v35 = vpop.f32.mrb[91].mxu0  ;;  %v2568_v34 = vsel %vm2504_vm9, %v2466_v36, %v2536_v17  ;;  %v2399_v45 = vadd.f32 %v2398_v37, %v2295_v38 }
 0x687   : > { %v4775_v2 = vmul.f32 1.4142135, %v2566_v57  ;;  %vm2503_vm10 = vcmp.ge.f32.partialorder %v2395_v21, 0.0  ;;  %v2535_v48 = vmul.f32 0.2, %v2395_v21  ;;  %v2475_v3 = vpop.f32.mrb[90].mxu1  ;;  %2724 = vmatprep.subr.bf16.mxu0 %v2628_v51  ;;  %v2472_v29 = vadd.f32 %v2471_v49, %v2295_v38  ;;  %v2305_v37 = vpop.permute.xlu0 %2304 }
 0x688   : > { %v4777_v28 = vmul.f32 1.4142135, %v2568_v34  ;;  %vm2505_vm11 = vcmp.ge.f32.partialorder %v2468_v26, 0.0  ;;  %v2537_v44 = vmul.f32 0.2, %v2468_v26  ;;  %2797 = vmatprep.subr.bf16.mxu1 %v2630_v30  ;;  %v2477_v47 = vpop.f32.mrb[91].mxu1  ;;  %2725 = vmatpush1.bf16.msra.mxu0 %v2627_v56  ;;  %v2401_v61 = vadd.f32 %v2400_v13, %v2295_v38 }
 0x689   : > { %v2595_v40 = vmul.f32 1.4142135, %v2563_v54  ;;  %v2631_v59 = vpack.c.bf16 %v4775_v2, %v4769_v19  ;;  %v2567_v5 = vsel %vm2503_vm10, %v2395_v21, %v2535_v48  ;;  %2798 = vmatpush1.bf16.msra.mxu1 %v2629_v52  ;;  %v2597_v20 = vmul.f32 1.4142135, %v2565_v27  ;;  %v2310_v27 = vpop.permute.xlu1 %2309 }
 0x68a   : > { %v2633_v31 = vpack.c.bf16 %v4777_v28, %v4771_v42  ;;  %v2569_v39 = vsel %vm2505_vm11, %v2468_v26, %v2537_v44  ;;  %vm2506_vm12 = vcmp.ge.f32.partialorder %v2399_v45, 0.0  ;;  %v2408_v43 = vpop.f32.mrb[92].mxu0  ;;  %v2599_v60 = vmul.f32 1.4142135, %v2567_v5 }
 0x68b   : > { %v2538_v58 = vmul.f32 0.2, %v2399_v45  ;;  %vm2508_vm13 = vcmp.ge.f32.partialorder %v2472_v29, 0.0  ;;  %v2410_v62 = vpop.f32.mrb[93].mxu0  ;;  %v2540_v63 = vmul.f32 0.2, %v2472_v29  ;;  %v2474_v33 = vadd.f32 %v2473_v41, %v2295_v38 }
 0x68c   : > { %v2403_v23 = vadd.f32 %v2402_v50, %v2300_v6  ;;  %v2476_v22 = vadd.f32 %v2475_v3, %v2300_v6  ;;  %v2412_v53 = vpop.f32.mrb[94].mxu0  ;;  %v2601_v56 = vmul.f32 1.4142135, %v2569_v39  ;;  %v2539_v1 = vmul.f32 0.2, %v2401_v61 }
 0x68d   : > { %v2570_v46 = vsel %vm2506_vm12, %v2399_v45, %v2538_v58  ;;  %v2405_v15 = vadd.f32 %v2404_v35, %v2300_v6  ;;  %v2481_v18 = vpop.f32.mrb[92].mxu1  ;;  %v2414_v7 = vpop.f32.mrb[95].mxu0  ;;  %v2572_v16 = vsel %vm2508_vm13, %v2472_v29, %v2540_v63  ;;  %vm2507_vm14 = vcmp.ge.f32.partialorder %v2401_v61, 0.0 }
 0x68e   : > { %v4786_v9 = vmul.f32 1.4142135, %v2570_v46  ;;  %vm2509_vm15 = vcmp.ge.f32.partialorder %v2474_v33, 0.0  ;;  %v2483_v55 = vpop.f32.mrb[93].mxu1  ;;  %v2541_v4 = vmul.f32 0.2, %v2474_v33  ;;  %v2571_v12 = vsel %vm2507_vm14, %v2401_v61, %v2539_v1 }
 0x68f   : > { %vm2510_vm1 = vcmp.ge.f32.partialorder %v2403_v23, 0.0  ;;  %v2542_v52 = vmul.f32 0.2, %v2403_v23  ;;  %v2485_v8 = vpop.f32.mrb[94].mxu1  ;;  %v4788_v10 = vmul.f32 1.4142135, %v2572_v16  ;;  %v2478_v13 = vadd.f32 %v2477_v47, %v2300_v6 }
 0x690   : > { %vm2512_vm2 = vcmp.ge.f32.partialorder %v2476_v22, 0.0  ;;  %v2544_v11 = vmul.f32 0.2, %v2476_v22  ;;  %v2487_v14 = vpop.f32.mrb[95].mxu1  ;;  %vm2511_vm3 = vcmp.ge.f32.partialorder %v2405_v15, 0.0  ;;  %v2632_v42 = vpack.c.bf16 %v2599_v60, %v2595_v40 }
 0x691   : > { %v2574_v32 = vsel %vm2510_vm1, %v2403_v23, %v2542_v52  ;;  %v2543_v36 = vmul.f32 0.2, %v2405_v15  ;;  %v2573_v25 = vsel %vm2509_vm15, %v2474_v33, %v2541_v4  ;;  %v2634_v17 = vpack.c.bf16 %v2601_v56, %v2597_v20 }
 0x692   : > { %v4790_v19 = vmul.f32 1.4142135, %v2574_v32  ;;  %v2576_v24 = vsel %vm2512_vm2, %v2476_v22, %v2544_v11  ;;  %v2409_v21 = vadd.f32 %v2408_v43, %v2305_v37  ;;  %vm2513_vm4 = vcmp.ge.f32.partialorder %v2478_v13, 0.0  ;;  %2726 = vmatprep.subr.bf16.mxu0 %v2632_v42  ;;  %v3795_v11 = vld [vmem:[%s5063_s1 + $0xd0] sm:$0xff]   ;;  %v2660_v32 = vpop.permute.xlu1 %2659 }
 0x693   : > { %v4793_v54 = vmul.f32 1.4142135, %v2576_v24  ;;  %v2575_v49 = vsel %vm2511_vm3, %v2405_v15, %v2543_v36  ;;  %v2545_v50 = vmul.f32 0.2, %v2478_v13  ;;  %2799 = vmatprep.subr.bf16.mxu1 %v2634_v17  ;;  %2727 = vmatpush1.bf16.msra.mxu0 %v2631_v59  ;;  %v2482_v30 = vadd.f32 %v2481_v18, %v2305_v37 }
 0x694   : > { %v2635_v26 = vpack.c.bf16 %v4790_v19, %v4786_v9  ;;  %vm2514_vm5 = vcmp.ge.f32.partialorder %v2409_v21, 0.0  ;;  %v2546_v51 = vmul.f32 0.2, %v2409_v21  ;;  %2800 = vmatpush1.bf16.msra.mxu1 %v2633_v31  ;;  %v2411_v35 = vadd.f32 %v2410_v62, %v2305_v37 }
 0x695   : > { %v2637_v57 = vpack.c.bf16 %v4793_v54, %v4788_v10  ;;  %v2577_v41 = vsel %vm2513_vm4, %v2478_v13, %v2545_v50  ;;  %v2484_v38 = vadd.f32 %v2483_v55, %v2305_v37  ;;  %v2413_v2 = vadd.f32 %v2412_v53, %v2310_v27  ;;  %v3794_v10 = vld [vmem:[%s5063_s1 + $0xc8] sm:$0xff]  }
 0x696   : > { %v2603_v34 = vmul.f32 1.4142135, %v2571_v12  ;;  %v2605_v48 = vmul.f32 1.4142135, %v2573_v25  ;;  %v2578_v3 = vsel %vm2514_vm5, %v2409_v21, %v2546_v51  ;;  %v2548_v28 = vmul.f32 0.2, %v2482_v30  ;;  %v2655_v12 = vpop.permute.xlu0 %2654 }
 0x697   : > { %v2607_v44 = vmul.f32 1.4142135, %v2575_v49  ;;  %vm2516_vm6 = vcmp.ge.f32.partialorder %v2482_v30, 0.0  ;;  %v2547_v45 = vmul.f32 0.2, %v2411_v35  ;;  %vm2515_vm7 = vcmp.ge.f32.partialorder %v2411_v35, 0.0 }
 0x698   : > { %v2609_v47 = vmul.f32 1.4142135, %v2577_v41  ;;  %vm2518_vm8 = vcmp.ge.f32.partialorder %v2413_v2, 0.0  ;;  %v2550_v40 = vmul.f32 0.2, %v2413_v2  ;;  %v2486_v29 = vadd.f32 %v2485_v8, %v2310_v27  ;;  %v3793_v8 = vld [vmem:[%s5063_s1 + $0xc0] sm:$0xff]  }
 0x699   : > { %v2610_v59 = vmul.f32 1.4142135, %v2578_v3  ;;  %v2549_v5 = vmul.f32 0.2, %v2484_v38  ;;  %v2415_v20 = vadd.f32 %v2414_v7, %v2310_v27  ;;  %v2580_v39 = vsel %vm2516_vm6, %v2482_v30, %v2548_v28 }
 0x69a   : > { %vm2517_vm9 = vcmp.ge.f32.partialorder %v2484_v38, 0.0  ;;  %v2582_v31 = vsel %vm2518_vm8, %v2413_v2, %v2550_v40  ;;  %v2488_v43 = vadd.f32 %v2487_v14, %v2310_v27  ;;  %v2579_v6 = vsel %vm2515_vm7, %v2411_v35, %v2547_v45  ;;  %v3796_v14 = vld [vmem:[%s5063_s1 + $0xd8] sm:$0xff]   ;;  %v2665_v45 = vpop.permute.xlu0 %2664 }
 0x69b   : > { %v2614_v60 = vmul.f32 1.4142135, %v2582_v31  ;;  %vm2520_vm10 = vcmp.ge.f32.partialorder %v2486_v29, 0.0  ;;  %vm2519_vm11 = vcmp.ge.f32.partialorder %v2415_v20, 0.0  ;;  %v2552_v58 = vmul.f32 0.2, %v2486_v29 }
 0x69c   : > { %v2551_v61 = vmul.f32 0.2, %v2415_v20  ;;  %vm2521_vm12 = vcmp.ge.f32.partialorder %v2488_v43, 0.0  ;;  %v2636_v62 = vpack.c.bf16 %v2607_v44, %v2603_v34  ;;  %v2581_v63 = vsel %vm2517_vm9, %v2484_v38, %v2549_v5 }
 0x69d   : > { %v2639_v33 = vpack.c.bf16 %v2614_v60, %v2610_v59  ;;  %v2553_v23 = vmul.f32 0.2, %v2488_v43  ;;  %v2638_v22 = vpack.c.bf16 %v2609_v47, %v2605_v48  ;;  %v2612_v53 = vmul.f32 1.4142135, %v2580_v39 }
 0x69e   : > { %v2584_v56 = vsel %vm2520_vm10, %v2486_v29, %v2552_v58  ;;  %v2583_v46 = vsel %vm2519_vm11, %v2415_v20, %v2551_v61  ;;  %2728 = vmatprep.subr.bf16.mxu0 %v2636_v62  ;;  %v2611_v1 = vmul.f32 1.4142135, %v2579_v6  ;;  %v2613_v9 = vmul.f32 1.4142135, %v2581_v63 }
 0x69f   : > { %v2616_v15 = vmul.f32 1.4142135, %v2584_v56  ;;  %v2615_v18 = vmul.f32 1.4142135, %v2583_v46  ;;  %v2585_v7 = vsel %vm2521_vm12, %v2488_v43, %v2553_v23  ;;  %2801 = vmatprep.subr.bf16.mxu1 %v2638_v22  ;;  %2729 = vmatpush1.bf16.msra.mxu0 %v2635_v26 }
 0x6a0   : > { %v2617_v16 = vmul.f32 1.4142135, %v2585_v7  ;;  %2802 = vmatpush1.bf16.msra.mxu1 %v2637_v57 }
 0x6a1   : > { %v2641_v55 = vpack.c.bf16 %v2616_v15, %v2612_v53  ;;  %v2640_v4 = vpack.c.bf16 %v2615_v18, %v2611_v1 }
 0x6a2   : > { %v2642_v52 = vpack.c.bf16 %v2617_v16, %v2613_v9 }
 0x6a3   : > { %2730 = vmatprep.subr.bf16.mxu0 %v2640_v4 }
 0x6a4   : > { %2803 = vmatprep.subr.bf16.mxu1 %v2642_v52  ;;  %2731 = vmatpush1.bf16.msra.mxu0 %v2639_v33 }
 0x6a5   : > { %2804 = vmatpush1.bf16.msra.mxu1 %v2641_v55  ;;  %v2670_v55 = vpop.permute.xlu1 %2669 }
 0x6a7   : > { %3683 = vmatmul.mubr.msk.bf16.vlgmr.msra.gmra.mrb[96].mxu0 %vm431_vm0, %v3793_v8 }
 0x6a8   : > { %3687 = vmatmul.mubr.msk.bf16.vlgmr.msra.gmra.mrb[96].mxu1 %vm431_vm0, %v3793_v8  ;;  %2766 = vmatprep.mubr.bf16.mxu0 %v3879_v0 }
 0x6a9   : > { %2839 = vmatprep.mubr.bf16.mxu1 %v3879_v0 }
 0x6af   : > { %3684 = vmatmul.mubr.msk.bf16.gmra.mrb[100].mxu0 %vm431_vm0, %v3794_v10 }
 0x6b0   : > { %3688 = vmatmul.mubr.msk.bf16.gmra.mrb[100].mxu1 %vm431_vm0, %v3794_v10  ;;  %2776 = vmatprep.mubr.bf16.mxu0 %v3879_v0 }
 0x6b1   : > { %2849 = vmatprep.mubr.bf16.mxu1 %v3879_v0 }
 0x6b7   : > { %3685 = vmatmul.mubr.msk.bf16.gmra.mrb[104].mxu0 %vm431_vm0, %v3795_v11 }
 0x6b8   : > { %3689 = vmatmul.mubr.msk.bf16.gmra.mrb[104].mxu1 %vm431_vm0, %v3795_v11  ;;  %2786 = vmatprep.mubr.bf16.mxu0 %v3879_v0 }
 0x6b9   : > { %2859 = vmatprep.mubr.bf16.mxu1 %v3879_v0 }
 0x6bf   : > { %3686 = vmatmul.mubr.msk.bf16.gmra.mrb[108].mxu0 %vm431_vm0, %v3796_v14 }
 0x6c0   : > { %3690 = vmatmul.mubr.msk.bf16.gmra.mrb[108].mxu1 %vm431_vm0, %v3796_v14  ;;  %3136 = vmatprep.mubr.bf16.mxu0 %v3879_v0 }
 0x6c1   : > { %3209 = vmatprep.mubr.bf16.mxu1 %v3879_v0 }
 0x77a   : > { %v2758_v36 = vpop.f32.mrb[96].mxu0 }
 0x77b   : > { %v2759_v37 = vadd.f32 %v2758_v36, %v2655_v12  ;;  %v2831_v19 = vpop.f32.mrb[96].mxu1  ;;  %v2760_v24 = vpop.f32.mrb[97].mxu0 }
 0x77c   : > { %v2832_v13 = vadd.f32 %v2831_v19, %v2655_v12  ;;  %v2761_v42 = vadd.f32 %v2760_v24, %v2655_v12  ;;  %v2833_v25 = vpop.f32.mrb[97].mxu1  ;;  %v2762_v54 = vpop.f32.mrb[98].mxu0 }
 0x77d   : > { %vm2870_vm13 = vcmp.ge.f32.partialorder %v2759_v37, 0.0  ;;  %v2902_v17 = vmul.f32 0.2, %v2759_v37  ;;  %v2834_v21 = vadd.f32 %v2833_v25, %v2655_v12  ;;  %v2763_v26 = vadd.f32 %v2762_v54, %v2660_v32  ;;  %v2835_v49 = vpop.f32.mrb[98].mxu1  ;;  %v2764_v50 = vpop.f32.mrb[99].mxu0 }
 0x77e   : > { %vm2872_vm14 = vcmp.ge.f32.partialorder %v2832_v13, 0.0  ;;  %v2904_v27 = vmul.f32 0.2, %v2832_v13  ;;  %vm2871_vm15 = vcmp.ge.f32.partialorder %v2761_v42, 0.0  ;;  %v2903_v57 = vmul.f32 0.2, %v2761_v42 }
 0x77f   : > { %v2934_v51 = vsel %vm2870_vm13, %v2759_v37, %v2902_v17  ;;  %vm2873_vm1 = vcmp.ge.f32.partialorder %v2834_v21, 0.0  ;;  %v2905_v30 = vmul.f32 0.2, %v2834_v21  ;;  %vm2874_vm2 = vcmp.ge.f32.partialorder %v2763_v26, 0.0  ;;  %v2837_v41 = vpop.f32.mrb[99].mxu1 }
 0x780   : > { %v4827_v35 = vmul.f32 1.4142135, %v2934_v51  ;;  %v2936_v38 = vsel %vm2872_vm14, %v2832_v13, %v2904_v27  ;;  %v2935_v2 = vsel %vm2871_vm15, %v2761_v42, %v2903_v57  ;;  %v2906_v34 = vmul.f32 0.2, %v2763_v26  ;;  %v2675_v27 = vpop.permute.xlu0 %2674 }
 0x781   : > { %v4829_v48 = vmul.f32 1.4142135, %v2936_v38  ;;  %v4831_v3 = vmul.f32 1.4142135, %v2935_v2  ;;  %v2937_v28 = vsel %vm2873_vm1, %v2834_v21, %v2905_v30  ;;  %v2836_v44 = vadd.f32 %v2835_v49, %v2660_v32 }
 0x782   : > { %v4833_v47 = vmul.f32 1.4142135, %v2937_v28  ;;  %v2938_v40 = vsel %vm2874_vm2, %v2763_v26, %v2906_v34  ;;  %v2765_v59 = vadd.f32 %v2764_v50, %v2660_v32  ;;  %v2838_v5 = vadd.f32 %v2837_v41, %v2660_v32  ;;  %v2768_v29 = vpop.f32.mrb[100].mxu0 }
 0x783   : > { %v4835_v20 = vmul.f32 1.4142135, %v2938_v40  ;;  %vm2876_vm3 = vcmp.ge.f32.partialorder %v2836_v44, 0.0  ;;  %v2908_v39 = vmul.f32 0.2, %v2836_v44  ;;  %v2769_v31 = vadd.f32 %v2768_v29, %v2665_v45  ;;  %v2841_v43 = vpop.f32.mrb[100].mxu1 }
 0x784   : > { %vm2875_vm4 = vcmp.ge.f32.partialorder %v2765_v59, 0.0  ;;  %v2907_v6 = vmul.f32 0.2, %v2765_v59  ;;  %vm2877_vm5 = vcmp.ge.f32.partialorder %v2838_v5, 0.0  ;;  %v2909_v60 = vmul.f32 0.2, %v2838_v5 }
 0x785   : > { %v3007_v58 = vpack.c.bf16 %v4835_v20, %v4827_v35  ;;  %v2940_v61 = vsel %vm2876_vm3, %v2836_v44, %v2908_v39  ;;  %vm2878_vm6 = vcmp.ge.f32.partialorder %v2769_v31, 0.0  ;;  %v2910_v62 = vmul.f32 0.2, %v2769_v31  ;;  %v2770_v63 = vpop.f32.mrb[101].mxu0  ;;  %v2843_v33 = vpop.f32.mrb[101].mxu1 }
 0x786   : > { %v4839_v23 = vmul.f32 1.4142135, %v2940_v61  ;;  %v2939_v22 = vsel %vm2875_vm4, %v2765_v59, %v2907_v6  ;;  %v2941_v53 = vsel %vm2877_vm5, %v2838_v5, %v2909_v60  ;;  %v2842_v56 = vadd.f32 %v2841_v43, %v2665_v45  ;;  %v2772_v46 = vpop.f32.mrb[102].mxu0  ;;  %v2845_v1 = vpop.f32.mrb[102].mxu1 }
 0x787   : > { %v2971_v15 = vmul.f32 1.4142135, %v2939_v22  ;;  %v2973_v18 = vmul.f32 1.4142135, %v2941_v53  ;;  %v2771_v7 = vadd.f32 %v2770_v63, %v2665_v45  ;;  %v2774_v9 = vpop.f32.mrb[103].mxu0  ;;  %v2847_v16 = vpop.f32.mrb[103].mxu1  ;;  %v2942_v52 = vsel %vm2878_vm6, %v2769_v31, %v2910_v62 }
 0x788   : > { %v3009_v4 = vpack.c.bf16 %v4839_v23, %v4829_v48  ;;  %vm2880_vm7 = vcmp.ge.f32.partialorder %v2842_v56, 0.0  ;;  %v2912_v8 = vmul.f32 0.2, %v2842_v56  ;;  %v2844_v11 = vadd.f32 %v2843_v33, %v2665_v45  ;;  %v2680_v22 = vpop.permute.xlu1 %2679 }
 0x789   : > { %vm2879_vm8 = vcmp.ge.f32.partialorder %v2771_v7, 0.0  ;;  %v2911_v10 = vmul.f32 0.2, %v2771_v7  ;;  %v2773_v14 = vadd.f32 %v2772_v46, %v2670_v55  ;;  %v2846_v32 = vadd.f32 %v2845_v1, %v2670_v55 }
 0x78a   : > { %v2944_v12 = vsel %vm2880_vm7, %v2842_v56, %v2912_v8  ;;  %v2775_v36 = vadd.f32 %v2774_v9, %v2670_v55  ;;  %v2848_v37 = vadd.f32 %v2847_v16, %v2670_v55  ;;  %v2778_v19 = vpop.f32.mrb[104].mxu0  ;;  %v4844_v24 = vmul.f32 1.4142135, %v2942_v52  ;;  %v2685_v16 = vpop.permute.xlu0 %2684 }
 0x78b   : > { %v2943_v13 = vsel %vm2879_vm8, %v2771_v7, %v2911_v10  ;;  %vm2881_vm9 = vcmp.ge.f32.partialorder %v2844_v11, 0.0  ;;  %v2913_v42 = vmul.f32 0.2, %v2844_v11  ;;  %v2851_v25 = vpop.f32.mrb[104].mxu1  ;;  %v4846_v54 = vmul.f32 1.4142135, %v2944_v12 }
 0x78c   : > { %vm2882_vm10 = vcmp.ge.f32.partialorder %v2773_v14, 0.0  ;;  %v2914_v17 = vmul.f32 0.2, %v2773_v14  ;;  %vm2884_vm11 = vcmp.ge.f32.partialorder %v2846_v32, 0.0  ;;  %v2916_v26 = vmul.f32 0.2, %v2846_v32 }
 0x78d   : > { %v2945_v21 = vsel %vm2881_vm9, %v2844_v11, %v2913_v42  ;;  %vm2883_vm12 = vcmp.ge.f32.partialorder %v2775_v36, 0.0  ;;  %v2915_v49 = vmul.f32 0.2, %v2775_v36  ;;  %v2780_v50 = vpop.f32.mrb[105].mxu0  ;;  %v4848_v57 = vmul.f32 1.4142135, %v2943_v13 }
 0x78e   : > { %v2946_v51 = vsel %vm2882_vm10, %v2773_v14, %v2914_v17  ;;  %vm2885_vm13 = vcmp.ge.f32.partialorder %v2848_v37, 0.0  ;;  %v2917_v30 = vmul.f32 0.2, %v2848_v37  ;;  %v2853_v41 = vpop.f32.mrb[105].mxu1  ;;  %v2948_v2 = vsel %vm2884_vm11, %v2846_v32, %v2916_v26  ;;  %v2782_v28 = vpop.f32.mrb[106].mxu0 }
 0x78f   : > { %v4850_v38 = vmul.f32 1.4142135, %v2946_v51  ;;  %v2947_v34 = vsel %vm2883_vm12, %v2775_v36, %v2915_v49  ;;  %v3008_v48 = vpack.c.bf16 %v2971_v15, %v4831_v3  ;;  %v2855_v44 = vpop.f32.mrb[106].mxu1  ;;  %v2977_v45 = vmul.f32 1.4142135, %v2945_v21  ;;  %v2784_v29 = vpop.f32.mrb[107].mxu0 }
 0x790   : > { %v4853_v40 = vmul.f32 1.4142135, %v2948_v2  ;;  %v2949_v59 = vsel %vm2885_vm13, %v2848_v37, %v2917_v30  ;;  %v3010_v5 = vpack.c.bf16 %v2973_v18, %v4833_v47  ;;  %v2857_v39 = vpop.f32.mrb[107].mxu1  ;;  %v2979_v43 = vmul.f32 1.4142135, %v2947_v34 }
 0x791   : > { %v3011_v31 = vpack.c.bf16 %v4850_v38, %v4844_v24  ;;  %3104 = vmatprep.subr.bf16.mxu0 %v3008_v48  ;;  %v2779_v6 = vadd.f32 %v2778_v19, %v2675_v27  ;;  %v2852_v60 = vadd.f32 %v2851_v25, %v2675_v27  ;;  %v2981_v61 = vmul.f32 1.4142135, %v2949_v59 }
 0x792   : > { %v3013_v3 = vpack.c.bf16 %v4853_v40, %v4846_v54  ;;  %3177 = vmatprep.subr.bf16.mxu1 %v3010_v5  ;;  %3105 = vmatpush1.bf16.msra.mxu0 %v3007_v58  ;;  %v2781_v62 = vadd.f32 %v2780_v50, %v2675_v27  ;;  %v2854_v47 = vadd.f32 %v2853_v41, %v2675_v27  ;;  %v2788_v63 = vpop.f32.mrb[108].mxu0  ;;  %v2690_v41 = vpop.permute.xlu1 %2689 }
 0x793   : > { %3178 = vmatpush1.bf16.msra.mxu1 %v3009_v4  ;;  %vm2886_vm14 = vcmp.ge.f32.partialorder %v2779_v6, 0.0  ;;  %v2918_v33 = vmul.f32 0.2, %v2779_v6  ;;  %vm2888_vm15 = vcmp.ge.f32.partialorder %v2852_v60, 0.0  ;;  %v2920_v23 = vmul.f32 0.2, %v2852_v60 }
 0x794   : > { %vm2887_vm1 = vcmp.ge.f32.partialorder %v2781_v62, 0.0  ;;  %v2919_v53 = vmul.f32 0.2, %v2781_v62  ;;  %v2921_v56 = vmul.f32 0.2, %v2854_v47  ;;  %v2783_v15 = vadd.f32 %v2782_v28, %v2680_v22  ;;  %v2861_v7 = vpop.f32.mrb[108].mxu1 }
 0x795   : > { %v2950_v46 = vsel %vm2886_vm14, %v2779_v6, %v2918_v33  ;;  %v2952_v1 = vsel %vm2888_vm15, %v2852_v60, %v2920_v23  ;;  %v2856_v18 = vadd.f32 %v2855_v44, %v2680_v22  ;;  %v2790_v9 = vpop.f32.mrb[109].mxu0  ;;  %vm2889_vm2 = vcmp.ge.f32.partialorder %v2854_v47, 0.0  ;;  %v2863_v20 = vpop.f32.mrb[109].mxu1 }
 0x796   : > { %v4863_v35 = vmul.f32 1.4142135, %v2950_v46  ;;  %v2792_v58 = vpop.f32.mrb[110].mxu0  ;;  %v4865_v55 = vmul.f32 1.4142135, %v2952_v1  ;;  %v2951_v4 = vsel %vm2887_vm1, %v2781_v62, %v2919_v53  ;;  %vm2890_vm3 = vcmp.ge.f32.partialorder %v2783_v15, 0.0 }
 0x797   : > { %vm2892_vm4 = vcmp.ge.f32.partialorder %v2856_v18, 0.0  ;;  %v2922_v52 = vmul.f32 0.2, %v2783_v15  ;;  %v2924_v8 = vmul.f32 0.2, %v2856_v18  ;;  %v2785_v10 = vadd.f32 %v2784_v29, %v2680_v22  ;;  %v2865_v14 = vpop.f32.mrb[110].mxu1 }
 0x798   : > { %v2858_v11 = vadd.f32 %v2857_v39, %v2680_v22  ;;  %v2794_v12 = vpop.f32.mrb[111].mxu0  ;;  %v2953_v32 = vsel %vm2889_vm2, %v2854_v47, %v2921_v56  ;;  %v3012_v36 = vpack.c.bf16 %v2979_v43, %v4848_v57  ;;  %v3014_v37 = vpack.c.bf16 %v2981_v61, %v2977_v45  ;;  %v2867_v24 = vpop.f32.mrb[111].mxu1 }
 0x799   : > { %v2789_v19 = vadd.f32 %v2788_v63, %v2685_v16  ;;  %v2954_v13 = vsel %vm2890_vm3, %v2783_v15, %v2922_v52  ;;  %v2956_v42 = vsel %vm2892_vm4, %v2856_v18, %v2924_v8  ;;  %vm2891_vm5 = vcmp.ge.f32.partialorder %v2785_v10, 0.0  ;;  %v3797_v52 = vld [vmem:[%s5063_s1 + $0xe0] sm:$0xff]   ;;  %v3798_v8 = vld [vmem:[%s5063_s1 + $0xe8] sm:$0xff]  }
 0x79a   : > { %v2923_v25 = vmul.f32 0.2, %v2785_v10  ;;  %v2986_v54 = vmul.f32 1.4142135, %v2954_v13  ;;  %v2988_v17 = vmul.f32 1.4142135, %v2956_v42  ;;  %3106 = vmatprep.subr.bf16.mxu0 %v3012_v36  ;;  %3179 = vmatprep.subr.bf16.mxu1 %v3014_v37  ;;  %v2862_v21 = vadd.f32 %v2861_v7, %v2685_v16 }
 0x79b   : > { %vm2893_vm6 = vcmp.ge.f32.partialorder %v2858_v11, 0.0  ;;  %v2925_v49 = vmul.f32 0.2, %v2858_v11  ;;  %3107 = vmatpush1.bf16.msra.mxu0 %v3011_v31  ;;  %3180 = vmatpush1.bf16.msra.mxu1 %v3013_v3  ;;  %vm2894_vm7 = vcmp.ge.f32.partialorder %v2789_v19, 0.0  ;;  %v2926_v50 = vmul.f32 0.2, %v2789_v19 }
 0x79c   : > { %v2955_v26 = vsel %vm2891_vm5, %v2785_v10, %v2923_v25  ;;  %v2983_v27 = vmul.f32 1.4142135, %v2951_v4  ;;  %v2985_v57 = vmul.f32 1.4142135, %v2953_v32  ;;  %v3015_v51 = vpack.c.bf16 %v2986_v54, %v4863_v35  ;;  %v3799_v10 = vld [vmem:[%s5063_s1 + $0xf0] sm:$0xff]  }
 0x79d   : > { %v3017_v30 = vpack.c.bf16 %v2988_v17, %v4865_v55  ;;  %v2987_v38 = vmul.f32 1.4142135, %v2955_v26  ;;  %v2957_v2 = vsel %vm2893_vm6, %v2858_v11, %v2925_v49  ;;  %v2791_v34 = vadd.f32 %v2790_v9, %v2685_v16  ;;  %v3800_v11 = vld [vmem:[%s5063_s1 + $0xf8] sm:$0xff]  }
 0x79e   : > { %v2864_v48 = vadd.f32 %v2863_v20, %v2685_v16  ;;  %v2958_v28 = vsel %vm2894_vm7, %v2789_v19, %v2926_v50  ;;  %vm2896_vm8 = vcmp.ge.f32.partialorder %v2862_v21, 0.0  ;;  %v2928_v44 = vmul.f32 0.2, %v2862_v21 }
 0x79f   : > { %v2793_v45 = vadd.f32 %v2792_v58, %v2690_v41  ;;  %v2989_v40 = vmul.f32 1.4142135, %v2957_v2  ;;  %vm2895_vm9 = vcmp.ge.f32.partialorder %v2791_v34, 0.0  ;;  %v2927_v59 = vmul.f32 0.2, %v2791_v34 }
 0x7a0   : > { %vm2897_vm10 = vcmp.ge.f32.partialorder %v2864_v48, 0.0  ;;  %v2929_v5 = vmul.f32 0.2, %v2864_v48  ;;  %v2866_v39 = vadd.f32 %v2865_v14, %v2690_v41  ;;  %v2990_v31 = vmul.f32 1.4142135, %v2958_v28  ;;  %v3035_v14 = vpop.permute.xlu0 %3034 }
 0x7a1   : > { %vm2898_vm11 = vcmp.ge.f32.partialorder %v2793_v45, 0.0  ;;  %v2930_v29 = vmul.f32 0.2, %v2793_v45  ;;  %v2795_v43 = vadd.f32 %v2794_v12, %v2690_v41  ;;  %v2868_v6 = vadd.f32 %v2867_v24, %v2690_v41 }
 0x7a2   : > { %v3016_v60 = vpack.c.bf16 %v2987_v38, %v2983_v27  ;;  %v2960_v3 = vsel %vm2896_vm8, %v2862_v21, %v2928_v44  ;;  %v2959_v61 = vsel %vm2895_vm9, %v2791_v34, %v2927_v59  ;;  %vm2900_vm12 = vcmp.ge.f32.partialorder %v2866_v39, 0.0  ;;  %v3040_v21 = vpop.permute.xlu1 %3039 }
 0x7a3   : > { %v2962_v62 = vsel %vm2898_vm11, %v2793_v45, %v2930_v29  ;;  %v2961_v47 = vsel %vm2897_vm10, %v2864_v48, %v2929_v5  ;;  %v2932_v33 = vmul.f32 0.2, %v2866_v39  ;;  %v3018_v23 = vpack.c.bf16 %v2989_v40, %v2985_v57 }
 0x7a4   : > { %v2994_v63 = vmul.f32 1.4142135, %v2962_v62  ;;  %3108 = vmatprep.subr.bf16.mxu0 %v3016_v60  ;;  %vm2899_vm13 = vcmp.ge.f32.partialorder %v2795_v43, 0.0  ;;  %v2931_v22 = vmul.f32 0.2, %v2795_v43  ;;  %vm2901_vm14 = vcmp.ge.f32.partialorder %v2868_v6, 0.0  ;;  %v3045_v28 = vpop.permute.xlu0 %3044 }
 0x7a5   : > { %v2933_v53 = vmul.f32 0.2, %v2868_v6  ;;  %3109 = vmatpush1.bf16.msra.mxu0 %v3015_v51  ;;  %v2992_v56 = vmul.f32 1.4142135, %v2960_v3  ;;  %v2964_v1 = vsel %vm2900_vm12, %v2866_v39, %v2932_v33  ;;  %3181 = vmatprep.subr.bf16.mxu1 %v3018_v23  ;;  %v2991_v15 = vmul.f32 1.4142135, %v2959_v61 }
 0x7a6   : > { %v3019_v46 = vpack.c.bf16 %v2994_v63, %v2990_v31  ;;  %v2996_v18 = vmul.f32 1.4142135, %v2964_v1  ;;  %v2963_v7 = vsel %vm2899_vm13, %v2795_v43, %v2931_v22  ;;  %3182 = vmatpush1.bf16.msra.mxu1 %v3017_v30  ;;  %v2993_v35 = vmul.f32 1.4142135, %v2961_v47 }
 0x7a7   : > { %v2965_v9 = vsel %vm2901_vm14, %v2868_v6, %v2933_v53  ;;  %v2995_v20 = vmul.f32 1.4142135, %v2963_v7 }
 0x7a8   : > { %v2997_v58 = vmul.f32 1.4142135, %v2965_v9  ;;  %v3021_v16 = vpack.c.bf16 %v2996_v18, %v2992_v56 }
 0x7a9   : > { %v3020_v55 = vpack.c.bf16 %v2995_v20, %v2991_v15  ;;  %v3050_v15 = vpop.permute.xlu1 %3049 }
 0x7aa   : > { %v3022_v4 = vpack.c.bf16 %v2997_v58, %v2993_v35 }
 0x7ab   : > { %3110 = vmatprep.subr.bf16.mxu0 %v3020_v55 }
 0x7ac   : > { %3183 = vmatprep.subr.bf16.mxu1 %v3022_v4  ;;  %3111 = vmatpush1.bf16.msra.mxu0 %v3019_v46 }
 0x7ad   : > { %3184 = vmatpush1.bf16.msra.mxu1 %v3021_v16 }
 0x7af   : > { %3711 = vmatmul.mubr.msk.bf16.vlgmr.msra.gmra.mrb[112].mxu0 %vm431_vm0, %v3797_v52 }
 0x7b0   : > { %3715 = vmatmul.mubr.msk.bf16.vlgmr.msra.gmra.mrb[112].mxu1 %vm431_vm0, %v3797_v52  ;;  %3146 = vmatprep.mubr.bf16.mxu0 %v3879_v0 }
 0x7b1   : > { %3219 = vmatprep.mubr.bf16.mxu1 %v3879_v0 }
 0x7b7   : > { %3712 = vmatmul.mubr.msk.bf16.gmra.mrb[116].mxu0 %vm431_vm0, %v3798_v8 }
 0x7b8   : > { %3716 = vmatmul.mubr.msk.bf16.gmra.mrb[116].mxu1 %vm431_vm0, %v3798_v8  ;;  %3156 = vmatprep.mubr.bf16.mxu0 %v3879_v0 }
 0x7b9   : > { %3229 = vmatprep.mubr.bf16.mxu1 %v3879_v0 }
 0x7bf   : > { %3713 = vmatmul.mubr.msk.bf16.gmra.mrb[120].mxu0 %vm431_vm0, %v3799_v10 }
 0x7c0   : > { %3717 = vmatmul.mubr.msk.bf16.gmra.mrb[120].mxu1 %vm431_vm0, %v3799_v10  ;;  %3166 = vmatprep.mubr.bf16.mxu0 %v3879_v0 }
 0x7c1   : > { %3239 = vmatprep.mubr.bf16.mxu1 %v3879_v0 }
 0x7c7   : > { %3714 = vmatmul.mubr.msk.bf16.gmra.mrb[124].mxu0 %vm431_vm0, %v3800_v11 }
 0x7c8   : > { %3718 = vmatmul.mubr.msk.bf16.gmra.mrb[124].mxu1 %vm431_vm0, %v3800_v11 }
 0x882   : > { %v3138_v12 = vpop.f32.mrb[112].mxu0 }
 0x883   : > { %v3211_v32 = vpop.f32.mrb[112].mxu1  ;;  %v3139_v36 = vadd.f32 %v3138_v12, %v3035_v14  ;;  %v3140_v19 = vpop.f32.mrb[113].mxu0 }
 0x884   : > { %v3212_v37 = vadd.f32 %v3211_v32, %v3035_v14  ;;  %v3213_v24 = vpop.f32.mrb[113].mxu1  ;;  %v3141_v13 = vadd.f32 %v3140_v19, %v3035_v14  ;;  %v3142_v25 = vpop.f32.mrb[114].mxu0 }
 0x885   : > { %v3214_v42 = vadd.f32 %v3213_v24, %v3035_v14  ;;  %v3215_v54 = vpop.f32.mrb[114].mxu1  ;;  %vm3250_vm15 = vcmp.ge.f32.partialorder %v3139_v36, 0.0  ;;  %v3282_v0 = vmul.f32 0.2, %v3139_v36  ;;  %v3143_v57 = vadd.f32 %v3142_v25, %v3040_v21  ;;  %v3144_v30 = vpop.f32.mrb[115].mxu0 }
 0x886   : > { %vm3252_vm1 = vcmp.ge.f32.partialorder %v3212_v37, 0.0  ;;  %v3284_v17 = vmul.f32 0.2, %v3212_v37  ;;  %vm3251_vm2 = vcmp.ge.f32.partialorder %v3141_v13, 0.0  ;;  %v3283_v26 = vmul.f32 0.2, %v3141_v13  ;;  %v3055_v12 = vpop.permute.xlu0 %3054 }
 0x887   : > { %vm3253_vm3 = vcmp.ge.f32.partialorder %v3214_v42, 0.0  ;;  %v3285_v49 = vmul.f32 0.2, %v3214_v42  ;;  %v3314_v50 = vsel %vm3250_vm15, %v3139_v36, %v3282_v0  ;;  %v3216_v51 = vadd.f32 %v3215_v54, %v3040_v21  ;;  %v3217_v41 = vpop.f32.mrb[115].mxu1 }
 0x888   : > { %v3316_v27 = vsel %vm3252_vm1, %v3212_v37, %v3284_v17  ;;  %v4897_v38 = vmul.f32 1.4142135, %v3314_v50  ;;  %v3315_v34 = vsel %vm3251_vm2, %v3141_v13, %v3283_v26  ;;  %vm3254_vm0 = vcmp.ge.f32.partialorder %v3143_v57, 0.0 }
 0x889   : > { %v4899_v2 = vmul.f32 1.4142135, %v3316_v27  ;;  %v3317_v48 = vsel %vm3253_vm3, %v3214_v42, %v3285_v49  ;;  %v4901_v44 = vmul.f32 1.4142135, %v3315_v34  ;;  %vm3256_vm4 = vcmp.ge.f32.partialorder %v3216_v51, 0.0 }
 0x88a   : > { %v4903_v45 = vmul.f32 1.4142135, %v3317_v48  ;;  %v3286_v40 = vmul.f32 0.2, %v3143_v57  ;;  %v3288_v59 = vmul.f32 0.2, %v3216_v51  ;;  %v3145_v5 = vadd.f32 %v3144_v30, %v3040_v21 }
 0x88b   : > { %v3218_v29 = vadd.f32 %v3217_v41, %v3040_v21  ;;  %v3148_v39 = vpop.f32.mrb[116].mxu0  ;;  %v3221_v31 = vpop.f32.mrb[116].mxu1 }
 0x88c   : > { %v3149_v43 = vadd.f32 %v3148_v39, %v3045_v28  ;;  %v3222_v6 = vadd.f32 %v3221_v31, %v3045_v28  ;;  %v3150_v60 = vpop.f32.mrb[117].mxu0  ;;  %v3223_v3 = vpop.f32.mrb[117].mxu1  ;;  %v3318_v61 = vsel %vm3254_vm0, %v3143_v57, %v3286_v40  ;;  %v3320_v62 = vsel %vm3256_vm4, %v3216_v51, %v3288_v59 }
 0x88d   : > { %vm3255_vm5 = vcmp.ge.f32.partialorder %v3145_v5, 0.0  ;;  %v3287_v47 = vmul.f32 0.2, %v3145_v5  ;;  %v3152_v63 = vpop.f32.mrb[118].mxu0  ;;  %v3225_v33 = vpop.f32.mrb[118].mxu1  ;;  %vm3257_vm6 = vcmp.ge.f32.partialorder %v3218_v29, 0.0  ;;  %v3151_v9 = vadd.f32 %v3150_v60, %v3045_v28 }
 0x88e   : > { %v4905_v23 = vmul.f32 1.4142135, %v3318_v61  ;;  %v4907_v22 = vmul.f32 1.4142135, %v3320_v62  ;;  %vm3258_vm7 = vcmp.ge.f32.partialorder %v3149_v43, 0.0  ;;  %vm3260_vm8 = vcmp.ge.f32.partialorder %v3222_v6, 0.0  ;;  %v3060_v41 = vpop.permute.xlu1 %3059 }
 0x88f   : > { %v3319_v53 = vsel %vm3255_vm5, %v3145_v5, %v3287_v47  ;;  %v3289_v56 = vmul.f32 0.2, %v3218_v29  ;;  %v3290_v46 = vmul.f32 0.2, %v3149_v43  ;;  %v3154_v1 = vpop.f32.mrb[119].mxu0  ;;  %v3224_v35 = vadd.f32 %v3223_v3, %v3045_v28  ;;  %v3227_v20 = vpop.f32.mrb[119].mxu1 }
 0x890   : > { %v4909_v18 = vmul.f32 1.4142135, %v3319_v53  ;;  %v3292_v7 = vmul.f32 0.2, %v3222_v6  ;;  %v3153_v55 = vadd.f32 %v3152_v63, %v3050_v15  ;;  %v3226_v4 = vadd.f32 %v3225_v33, %v3050_v15 }
 0x891   : > { %v3321_v58 = vsel %vm3257_vm6, %v3218_v29, %v3289_v56  ;;  %v3322_v16 = vsel %vm3258_vm7, %v3149_v43, %v3290_v46  ;;  %vm3259_vm9 = vcmp.ge.f32.partialorder %v3151_v9, 0.0  ;;  %v3291_v14 = vmul.f32 0.2, %v3151_v9 }
 0x892   : > { %v4911_v52 = vmul.f32 1.4142135, %v3321_v58  ;;  %v4913_v8 = vmul.f32 1.4142135, %v3322_v16  ;;  %v3324_v10 = vsel %vm3260_vm8, %v3222_v6, %v3292_v7  ;;  %vm3261_vm10 = vcmp.ge.f32.partialorder %v3224_v35, 0.0  ;;  %v3158_v19 = vpop.f32.mrb[120].mxu0 }
 0x893   : > { %v4915_v11 = vmul.f32 1.4142135, %v3324_v10  ;;  %vm3262_vm11 = vcmp.ge.f32.partialorder %v3153_v55, 0.0  ;;  %v3293_v32 = vmul.f32 0.2, %v3224_v35  ;;  %vm3264_vm12 = vcmp.ge.f32.partialorder %v3226_v4, 0.0 }
 0x894   : > { %v3294_v36 = vmul.f32 0.2, %v3153_v55  ;;  %v3155_v37 = vadd.f32 %v3154_v1, %v3050_v15  ;;  %v3323_v24 = vsel %vm3259_vm9, %v3151_v9, %v3291_v14  ;;  %v3296_v13 = vmul.f32 0.2, %v3226_v4  ;;  %v3231_v54 = vpop.f32.mrb[120].mxu1  ;;  %v3160_v0 = vpop.f32.mrb[121].mxu0 }
 0x895   : > { %v3228_v42 = vadd.f32 %v3227_v20, %v3050_v15  ;;  %v3159_v25 = vadd.f32 %v3158_v19, %v3055_v12  ;;  %v4917_v17 = vmul.f32 1.4142135, %v3323_v24  ;;  %v3325_v21 = vsel %vm3261_vm10, %v3224_v35, %v3293_v32  ;;  %v3233_v49 = vpop.f32.mrb[121].mxu1  ;;  %v3162_v50 = vpop.f32.mrb[122].mxu0 }
 0x896   : > { %v3326_v26 = vsel %vm3262_vm11, %v3153_v55, %v3294_v36  ;;  %vm3263_vm13 = vcmp.ge.f32.partialorder %v3155_v37, 0.0  ;;  %v4919_v27 = vmul.f32 1.4142135, %v3325_v21  ;;  %v3328_v51 = vsel %vm3264_vm12, %v3226_v4, %v3296_v13  ;;  %v3235_v29 = vpop.f32.mrb[122].mxu1  ;;  %v3164_v39 = vpop.f32.mrb[123].mxu0 }
 0x897   : > { %v4921_v57 = vmul.f32 1.4142135, %v3326_v26  ;;  %v3295_v30 = vmul.f32 0.2, %v3155_v37  ;;  %v4924_v34 = vmul.f32 1.4142135, %v3328_v51  ;;  %v3232_v59 = vadd.f32 %v3231_v54, %v3055_v12  ;;  %v3065_v36 = vpop.permute.xlu0 %3064 }
 0x898   : > { %vm3265_vm14 = vcmp.ge.f32.partialorder %v3228_v42, 0.0  ;;  %v3297_v48 = vmul.f32 0.2, %v3228_v42  ;;  %vm3266_vm15 = vcmp.ge.f32.partialorder %v3159_v25, 0.0  ;;  %v3298_v40 = vmul.f32 0.2, %v3159_v25 }
 0x899   : > { %v3327_v28 = vsel %vm3263_vm13, %v3155_v37, %v3295_v30  ;;  %v3161_v5 = vadd.f32 %v3160_v0, %v3055_v12  ;;  %v3234_v6 = vadd.f32 %v3233_v49, %v3055_v12  ;;  %v3163_v60 = vadd.f32 %v3162_v50, %v3060_v41  ;;  %v3237_v3 = vpop.f32.mrb[123].mxu1 }
 0x89a   : > { %v4926_v31 = vmul.f32 1.4142135, %v3327_v28  ;;  %v3329_v43 = vsel %vm3265_vm14, %v3228_v42, %v3297_v48  ;;  %v3330_v62 = vsel %vm3266_vm15, %v3159_v25, %v3298_v40  ;;  %vm3268_vm1 = vcmp.ge.f32.partialorder %v3232_v59, 0.0  ;;  %v3168_v63 = vpop.f32.mrb[124].mxu0  ;;  %v3070_v40 = vpop.permute.xlu1 %3069 }
 0x89b   : > { %v4928_v61 = vmul.f32 1.4142135, %v3329_v43  ;;  %v3300_v47 = vmul.f32 0.2, %v3232_v59  ;;  %v4930_v33 = vmul.f32 1.4142135, %v3330_v62  ;;  %v3236_v35 = vadd.f32 %v3235_v29, %v3060_v41 }
 0x89c   : > { %vm3267_vm2 = vcmp.ge.f32.partialorder %v3161_v5, 0.0  ;;  %v3299_v53 = vmul.f32 0.2, %v3161_v5  ;;  %vm3269_vm3 = vcmp.ge.f32.partialorder %v3234_v6, 0.0  ;;  %v3301_v46 = vmul.f32 0.2, %v3234_v6 }
 0x89d   : > { %v3332_v56 = vsel %vm3268_vm1, %v3232_v59, %v3300_v47  ;;  %vm3270_vm0 = vcmp.ge.f32.partialorder %v3163_v60, 0.0  ;;  %v3302_v1 = vmul.f32 0.2, %v3163_v60  ;;  %v3241_v15 = vpop.f32.mrb[124].mxu1  ;;  %v3165_v20 = vadd.f32 %v3164_v39, %v3060_v41  ;;  %v3170_v58 = vpop.f32.mrb[125].mxu0 }
 0x89e   : > { %v4932_v7 = vmul.f32 1.4142135, %v3332_v56  ;;  %v3331_v9 = vsel %vm3267_vm2, %v3161_v5, %v3299_v53  ;;  %v3243_v16 = vpop.f32.mrb[125].mxu1  ;;  %v3333_v4 = vsel %vm3269_vm3, %v3234_v6, %v3301_v46  ;;  %v3238_v14 = vadd.f32 %v3237_v3, %v3060_v41  ;;  %v3172_v12 = vpop.f32.mrb[126].mxu0 }
 0x89f   : > { %v4934_v55 = vmul.f32 1.4142135, %v3331_v9  ;;  %v3334_v10 = vsel %vm3270_vm0, %v3163_v60, %v3302_v1  ;;  %v3245_v32 = vpop.f32.mrb[126].mxu1  ;;  %v4936_v37 = vmul.f32 1.4142135, %v3333_v4  ;;  %vm3272_vm4 = vcmp.ge.f32.partialorder %v3236_v35, 0.0 }
 0x8a0   : > { %v4938_v19 = vmul.f32 1.4142135, %v3334_v10  ;;  %vm3271_vm5 = vcmp.ge.f32.partialorder %v3165_v20, 0.0  ;;  %v3304_v24 = vmul.f32 0.2, %v3236_v35  ;;  %vm3273_vm6 = vcmp.ge.f32.partialorder %v3238_v14, 0.0 }
 0x8a1   : > { %v3303_v13 = vmul.f32 0.2, %v3165_v20  ;;  %v3169_v42 = vadd.f32 %v3168_v63, %v3065_v36  ;;  %v3174_v25 = vpop.f32.mrb[127].mxu0  ;;  %v3305_v54 = vmul.f32 0.2, %v3238_v14  ;;  %v3242_v0 = vadd.f32 %v3241_v15, %v3065_v36  ;;  %v3247_v49 = vpop.f32.mrb[127].mxu1 }
 0x8a2   : > { %v3171_v21 = vadd.f32 %v3170_v58, %v3065_v36  ;;  %v3244_v26 = vadd.f32 %v3243_v16, %v3065_v36  ;;  %v3336_v50 = vsel %vm3272_vm4, %v3236_v35, %v3304_v24  ;;  %v3173_v6 = vadd.f32 %v3172_v12, %v3070_v40 }
 0x8a3   : > { %v3335_v51 = vsel %vm3271_vm5, %v3165_v20, %v3303_v13  ;;  %vm3274_vm7 = vcmp.ge.f32.partialorder %v3169_v42, 0.0  ;;  %v3306_v30 = vmul.f32 0.2, %v3169_v42  ;;  %v4940_v41 = vmul.f32 1.4142135, %v3336_v50 }
 0x8a4   : > { %v3367_v48 = vmul.f32 1.4142135, %v3335_v51  ;;  %v3337_v28 = vsel %vm3273_vm6, %v3238_v14, %v3305_v54  ;;  %vm3276_vm8 = vcmp.ge.f32.partialorder %v3242_v0, 0.0  ;;  %v3308_v29 = vmul.f32 0.2, %v3242_v0 }
 0x8a5   : > { %v4942_v59 = vmul.f32 1.4142135, %v3337_v28  ;;  %v3338_v5 = vsel %vm3274_vm7, %v3169_v42, %v3306_v30  ;;  %vm3275_vm9 = vcmp.ge.f32.partialorder %v3171_v21, 0.0  ;;  %v3307_v43 = vmul.f32 0.2, %v3171_v21 }
 0x8a6   : > { %v3370_v39 = vmul.f32 1.4142135, %v3338_v5  ;;  %vm3277_vm10 = vcmp.ge.f32.partialorder %v3244_v26, 0.0  ;;  %v3340_v60 = vsel %vm3276_vm8, %v3242_v0, %v3308_v29  ;;  %v3309_v3 = vmul.f32 0.2, %v3244_v26 }
 0x8a7   : > { %v3246_v62 = vadd.f32 %v3245_v32, %v3070_v40  ;;  %v3175_v47 = vadd.f32 %v3174_v25, %v3070_v40  ;;  %v3372_v63 = vmul.f32 1.4142135, %v3340_v60  ;;  %v3339_v53 = vsel %vm3275_vm9, %v3171_v21, %v3307_v43 }
 0x8a8   : > { %vm3278_vm11 = vcmp.ge.f32.partialorder %v3173_v6, 0.0  ;;  %v3310_v56 = vmul.f32 0.2, %v3173_v6  ;;  %v3371_v46 = vmul.f32 1.4142135, %v3339_v53  ;;  %v3341_v1 = vsel %vm3277_vm10, %v3244_v26, %v3309_v3 }
 0x8a9   : > { %vm3280_vm12 = vcmp.ge.f32.partialorder %v3246_v62, 0.0  ;;  %v3312_v15 = vmul.f32 0.2, %v3246_v62  ;;  %v3373_v9 = vmul.f32 1.4142135, %v3341_v1  ;;  %vm3279_vm13 = vcmp.ge.f32.partialorder %v3175_v47, 0.0 }
 0x8aa   : > { %v3342_v35 = vsel %vm3278_vm11, %v3173_v6, %v3310_v56  ;;  %v3311_v20 = vmul.f32 0.2, %v3175_v47  ;;  %v3248_v4 = vadd.f32 %v3247_v49, %v3070_v40  ;;  %3381 = sbr.rel (%p3719_p7) target bundleno = 2225 (0x8b1), region = 40  ;;  %vm3382_vm15 = vcmask (!%p3719_p7), 7168  }
 0x8ab   : > { %v3374_v58 = vmul.f32 1.4142135, %v3342_v35  ;;  %v3344_v16 = vsel %vm3280_vm12, %v3246_v62, %v3312_v15  ;;  %v3880_v13 = vmov (!%p3719_p7), 0.0  }
 0x8ac   : > { %v3376_v10 = vmul.f32 1.4142135, %v3344_v16  ;;  %v3343_v14 = vsel %vm3279_vm13, %v3175_v47, %v3311_v20  ;;  %vm3281_vm14 = vcmp.ge.f32.partialorder %v3248_v4, 0.0  ;;  %v3313_v32 = vmul.f32 0.2, %v3248_v4  ;;  %3383 = vst.msk [vmem:[%s5065_s3] sm:$0xff] (!%p3719_p7), %vm3382_vm15, %v3880_v13 }
 0x8ad   : > { %v3375_v12 = vmul.f32 1.4142135, %v3343_v14  ;;  %3384 = vst.msk [vmem:[%s5065_s3 + $0x8] sm:$0xff] (!%p3719_p7), %vm3382_vm15, %v3880_v13  ;;  %3385 = vst.msk [vmem:[%s5065_s3 + $0x10] sm:$0xff] (!%p3719_p7), %vm3382_vm15, %v3880_v13 }
 0x8ae   : > { %v3345_v36 = vsel %vm3281_vm14, %v3248_v4, %v3313_v32  ;;  %3386 = vst.msk [vmem:[%s5065_s3 + $0x18] sm:$0xff] (!%p3719_p7), %vm3382_vm15, %v3880_v13  ;;  %3387 = vst.msk [vmem:[%s5065_s3 + $0x20] sm:$0xff] (!%p3719_p7), %vm3382_vm15, %v3880_v13 }
 0x8af   : > { %v3377_v24 = vmul.f32 1.4142135, %v3345_v36  ;;  %3388 = vst.msk [vmem:[%s5065_s3 + $0x28] sm:$0xff] (!%p3719_p7), %vm3382_vm15, %v3880_v13  ;;  %3389 = vst.msk [vmem:[%s5065_s3 + $0x30] sm:$0xff] (!%p3719_p7), %vm3382_vm15, %v3880_v13 }
 0x8b0   : > { %3390 = vst.msk [vmem:[%s5065_s3 + $0x38] sm:$0xff] (!%p3719_p7), %vm3382_vm15, %v3880_v13 }
 0x8b1 PF: > { %v3409_v42 = vadd.f32 %v4917_v17, %v4913_v8  ;;  %v3399_v25 = vadd.f32 %v4901_v44, %v4897_v38  ;;  %v3414_v54 = vadd.f32 %v4926_v31, %v4921_v57  ;;  %v3404_v0 = vadd.f32 %v4909_v18, %v4905_v23 }
 0x8b2   : > { %v3424_v21 = vadd.f32 %v3367_v48, %v4938_v19  ;;  %v3419_v26 = vadd.f32 %v4934_v55, %v4930_v33  ;;  %v3434_v23 = vadd.f32 %v3375_v12, %v3374_v58  ;;  %v3429_v18 = vadd.f32 %v3371_v46, %v3370_v39 }
 0x8b3   : > { %v3410_v49 = vadd.f32 %v3409_v42, %v4915_v11  ;;  %v3400_v50 = vadd.f32 %v3399_v25, %v4899_v2  ;;  %v3415_v8 = vadd.f32 %v3414_v54, %v4924_v34  ;;  %v3405_v17 = vadd.f32 %v3404_v0, %v4907_v22 }
 0x8b4   : > { %v3425_v57 = vadd.f32 %v3424_v21, %v4940_v41  ;;  %v3420_v2 = vadd.f32 %v3419_v26, %v4932_v7  ;;  %v3435_v33 = vadd.f32 %v3434_v23, %v3376_v10  ;;  %v3391_v7 = vld [vmem:[%s5065_s3] sm:$0xff]  ;;  %vm3455_vm1 = vcmask 7168  }
 0x8b5   : > { %v3411_v38 = vadd.f32 %v3410_v49, %v4919_v27  ;;  %v3401_v44 = vadd.f32 %v3400_v50, %v4903_v45  ;;  %v3416_v31 = vadd.f32 %v3415_v8, %v4928_v61  ;;  %v3406_v11 = vadd.f32 %v3405_v17, %v4911_v52  ;;  %v3393_v52 = vld [vmem:[%s5065_s3 + $0x10] sm:$0xff]  ;;  %v3394_v28 = vld [vmem:[%s5065_s3 + $0x18] sm:$0xff]  ;;  %v3395_v62 = vld [vmem:[%s5065_s3 + $0x20] sm:$0xff] }
 0x8b6   : > { %v3426_v22 = vadd.f32 %v3425_v57, %v4942_v59  ;;  %v3421_v27 = vadd.f32 %v3420_v2, %v4936_v37  ;;  %v3430_v45 = vadd.f32 %v3429_v18, %v3372_v63  ;;  %v3436_v34 = vadd.f32 %v3435_v33, %v3377_v24  ;;  %v3392_v59 = vld [vmem:[%s5065_s3 + $0x8] sm:$0xff] }
 0x8b7   : > { %3412 = vadd.xlane.f32.xlu1 %v3411_v38  ;;  %3402 = vadd.xlane.f32.xlu0 %v3401_v44  ;;  %v3396_v60 = vld [vmem:[%s5065_s3 + $0x28] sm:$0xff]  ;;  %v3398_v1 = vld [vmem:[%s5065_s3 + $0x38] sm:$0xff] }
 0x8b8   : > { %v3431_v55 = vadd.f32 %v3430_v45, %v3373_v9  ;;  %v3397_v9 = vld [vmem:[%s5065_s3 + $0x30] sm:$0xff] }
 0x8bb   : > { %3417 = vadd.xlane.f32.xlu1 %v3416_v31  ;;  %3407 = vadd.xlane.f32.xlu0 %v3406_v11 }
 0x8bf   : > { %3427 = vadd.xlane.f32.xlu1 %v3426_v22  ;;  %3422 = vadd.xlane.f32.xlu0 %v3421_v27 }
 0x8c3   : > { %3437 = vadd.xlane.f32.xlu1 %v3436_v34  ;;  %3432 = vadd.xlane.f32.xlu0 %v3431_v55 }
 0x944   : > { %v3413_v19 = vpop.xlane.xlu1 %3412  ;;  %v3403_v61 = vpop.xlane.xlu0 %3402 }
 0x945   : > { %v3441_v51 = vmul.f32 0.00024414063, %v3413_v19  ;;  %v3439_v30 = vmul.f32 0.00024414063, %v3403_v61 }
 0x947   : > { %v3449_v37 = vadd.f32 %v3441_v51, %v3393_v52  ;;  %v3447_v41 = vadd.f32 %v3439_v30, %v3391_v7 }
 0x948   : > { %v3418_v48 = vpop.xlane.xlu1 %3417  ;;  %v3408_v40 = vpop.xlane.xlu0 %3407 }
 0x949   : > { %3458 = vst.msk [vmem:[%s5065_s3 + $0x10] sm:$0xff] %vm3455_vm1, %v3449_v37  ;;  %3456 = vst.msk [vmem:[%s5065_s3] sm:$0xff] %vm3455_vm1, %v3447_v41  ;;  %v3442_v5 = vmul.f32 0.00024414063, %v3418_v48  ;;  %v3440_v29 = vmul.f32 0.00024414063, %v3408_v40 }
 0x94b   : > { %v3450_v39 = vadd.f32 %v3442_v5, %v3394_v28  ;;  %v3448_v43 = vadd.f32 %v3440_v29, %v3392_v59 }
 0x94c   : > { %v3428_v6 = vpop.xlane.xlu1 %3427  ;;  %v3423_v3 = vpop.xlane.xlu0 %3422 }
 0x94d   : > { %3459 = vst.msk [vmem:[%s5065_s3 + $0x18] sm:$0xff] %vm3455_vm1, %v3450_v39  ;;  %3457 = vst.msk [vmem:[%s5065_s3 + $0x8] sm:$0xff] %vm3455_vm1, %v3448_v43  ;;  %v3444_v47 = vmul.f32 0.00024414063, %v3428_v6  ;;  %v3443_v63 = vmul.f32 0.00024414063, %v3423_v3 }
 0x94f   : > { %v3452_v53 = vadd.f32 %v3444_v47, %v3396_v60  ;;  %v3451_v56 = vadd.f32 %v3443_v63, %v3395_v62 }
 0x950   : > { %v3438_v46 = vpop.xlane.xlu1 %3437  ;;  %v3433_v15 = vpop.xlane.xlu0 %3432 }
 0x951   : > { %3461 = vst.msk [vmem:[%s5065_s3 + $0x28] sm:$0xff] %vm3455_vm1, %v3452_v53  ;;  %3460 = vst.msk [vmem:[%s5065_s3 + $0x20] sm:$0xff] %vm3455_vm1, %v3451_v56  ;;  %v3446_v35 = vmul.f32 0.00024414063, %v3438_v46  ;;  %v3445_v20 = vmul.f32 0.00024414063, %v3433_v15 }
 0x953   : > { %v3454_v58 = vadd.f32 %v3446_v35, %v3398_v1  ;;  %v3453_v16 = vadd.f32 %v3445_v20, %v3397_v9 }
 0x955   : > { %3463 = vst.msk [vmem:[%s5065_s3 + $0x38] sm:$0xff] %vm3455_vm1, %v3454_v58  ;;  %3462 = vst.msk [vmem:[%s5065_s3 + $0x30] sm:$0xff] %vm3455_vm1, %v3453_v16 }
 0x956 PF: > { %p13_p8 = scmp.ge.s32.totalorder %s3921_s17, 10   ;;  %s5068_s12 = smov %s3865_s13 }
 0x957   : > { %s5069_s13 = smov %s3869_s14  ;;  %s5070_s14 = smov %s3931_s20 }
 0x958   : > { %s5071_s15 = smov %s3921_s17  ;;  %15 = sbr.rel (!%p13_p8) target bundleno = 3 (0x3), region = 86 }
 0x95f   :  { %3475 = vsyncpa [#allocation3], 1 }
 0x960   :  { %3477 = vsyncpa [#allocation3 + $0x1], 1 }

</bundles_post_ra>
